<compile_context>
chip_gen: v5e
topology: v5e:2x2
jax: 0.10.0
libtpu: 0.0.40
codegen_flags: <defaults>
</compile_context>

<pallas_src>
import numpy as np
import jax
import jax.numpy as jnp
from jax.experimental import pallas as pl
from jax.experimental.pallas import tpu as pltpu

# ---------------- config ----------------
HIDDEN = 64
HEADS = 4
HEAD_DIM = HIDDEN // HEADS          # 16
MLP_DIM = int(HIDDEN * 4.0)         # 256
EPS_LN = 1e-6
EPS_RMS = 1e-6


# ---------------- the fused kernel (one grid step = Bb batch elements) -------
def _fused_block_kernel(img_ref, txt_ref, vec_ref, wmod_ref, bmod_ref,
                        w1qkv_ref, b1qkv_ref, w1mlp_ref, b1mlp_ref,
                        cosq_ref, sinq_ref, cosk_ref, sink_ref,
                        blk_ref, rot_ref, w2a_ref, w2b_ref, b2_ref,
                        out_img_ref, out_txt_ref, attn_buf):
    f32 = jnp.float32
    Bb, Li, H = img_ref.shape
    Lt = txt_ref.shape[1]
    S = Li + Lt
    rows = Bb * S
    nh = HEADS
    hd = H // nh

    # ---- load img|txt once; concat along seq axis in VMEM ----
    x3 = jnp.concatenate([img_ref[...].astype(f32),
                          txt_ref[...].astype(f32)], axis=1)          # (Bb,S,H)

    # ---- modulation: SiLU(vec) @ Wmod + b -> shift | scale | gate ----
    v = vec_ref[...].reshape(Bb, H).astype(f32)
    sv = v * jax.nn.sigmoid(v)
    mod = jnp.dot(sv.astype(jnp.bfloat16), wmod_ref[...],
                  preferred_element_type=f32)
    mod = mod + bmod_ref[...].astype(f32)                             # (Bb,3H)
    m_shift = mod[:, :H][:, None, :]
    m_scale = mod[:, H:2 * H][:, None, :]
    m_gate = mod[:, 2 * H:][:, None, :]

    # ---- pre-norm (LayerNorm, no affine) + modulate ----
    mean = jnp.mean(x3, axis=-1, keepdims=True)
    var = jnp.mean((x3 - mean) ** 2, axis=-1, keepdims=True)
    ln = (x3 - mean) * jax.lax.rsqrt(var + EPS_LN)
    xm = (ln * (1.0 + m_scale) + m_shift).reshape(rows, H).astype(jnp.bfloat16)

    # ---- MLP branch first (consumed into y before q/k live) ----
    mlp = jnp.dot(xm, w1mlp_ref[...], preferred_element_type=f32)
    mlp = mlp + b1mlp_ref[...].astype(f32)                            # (rows, M)
    g = (0.5 * mlp * (1.0 + jnp.tanh(0.7978845608028654
                                     * (mlp + 0.044715 * mlp * mlp * mlp)))
         ).astype(jnp.bfloat16)                                       # early bf16 downcast
    y = jnp.dot(g, w2b_ref[...], preferred_element_type=f32)          # (rows, H)

    # ---- QKV ----
    qkv = jnp.dot(xm, w1qkv_ref[...], preferred_element_type=f32)
    qkv = qkv + b1qkv_ref[...].astype(f32)                            # (rows, 3H)
    q = qkv[:, :H]
    k = qkv[:, H:2 * H]
    vv = qkv[:, 2 * H:]

    # ---- per-head RMSNorm + rotary, lane-dense on (rows, H) ----
    # blk holds 1/hd in per-head diagonal blocks  -> mean(x^2) broadcast to H.
    # affine weights + attention scale are pre-folded into cos/sin tables.
    blk = blk_ref[...]                                                # (H,H) f32
    rot = rot_ref[...]                                                # (H,H) f32

    def rms_rope(t, cosw, sinw):
        ms = jnp.dot(t * t, blk, preferred_element_type=f32)          # f32 for accuracy
        tn = t * jax.lax.rsqrt(ms + EPS_RMS)
        rh = jnp.dot(tn, rot, preferred_element_type=f32)             # rotate_half
        return tn * cosw + rh * sinw

    qb = rms_rope(q, cosq_ref[...], sinq_ref[...]).astype(jnp.bfloat16)
    kT = rms_rope(k, cosk_ref[...], sink_ref[...]).T.astype(jnp.bfloat16)  # one transpose
    vb = vv.astype(jnp.bfloat16)

    # ---- attention per (batch, head); collect heads into one bf16 buffer ----
    for b in range(Bb):
        r0 = b * S
        for h in range(nh):
            lo = h * hd
            qh = qb[r0:r0 + S, lo:lo + hd]                            # (S, hd)
            khT = kT[lo:lo + hd, r0:r0 + S]                           # (hd, S)
            s = jnp.dot(qh, khT, preferred_element_type=f32)          # (S, S)
            m = jnp.max(s, axis=-1, keepdims=True)
            p = jnp.exp(s - m)
            p = p * pl.reciprocal(jnp.sum(p, axis=-1, keepdims=True),
                                  approx=True)
            o = jnp.dot(p.astype(jnp.bfloat16), vb[r0:r0 + S, lo:lo + hd],
                        preferred_element_type=f32)                   # (S, hd)
            attn_buf[r0:r0 + S, lo:lo + hd] = o.astype(jnp.bfloat16)

    # one fused K=64 matmul for the attention columns of linear2
    y = y + jnp.dot(attn_buf[...], w2a_ref[...], preferred_element_type=f32)
    y = y + b2_ref[...].astype(f32)

    # ---- gated residual, then split back into img / txt outputs ----
    out3 = (x3 + m_gate * y.reshape(Bb, S, H)).astype(jnp.bfloat16)
    out_img_ref[...] = out3[:, :Li, :]
    out_txt_ref[...] = out3[:, Li:, :]


# ---------------- constant matrices (host-built, f32) ----------------
def block_diag_mean(h, hd):
    m = np.zeros((h, h), np.float32)
    for i in range(0, h, hd):
        m[i:i + hd, i:i + hd] = 1.0 / hd
    return jnp.asarray(m)


def rotate_half_matrix(h):
    # rh = x @ M  gives rh[2i] = -x[2i+1], rh[2i+1] = x[2i]  (interleaved)
    m = np.zeros((h, h), np.float32)
    for i in range(h // 2):
        m[2 * i + 1, 2 * i] = -1.0
        m[2 * i, 2 * i + 1] = 1.0
    return jnp.asarray(m)


# ---------------- wrapper: full forward ----------------
def mm_single_stream_block(img, txt, vec, params, freqs_cos, freqs_sin,
                           batch_block=None):
    B, Li, H = img.shape
    Lt = txt.shape[1]
    S = Li + Lt
    nh, hd, M = HEADS, HEAD_DIM, MLP_DIM
    assert H == HIDDEN

    # Batch-blocking: keep the grid length even (>=2) so v7x's two TensorCores
    # both get a step, while each step still carries B/2 batch elements to
    # amortize per-step overhead / raise matmul M on v5e/v6e.
    if batch_block is None:
        nblk = 2 if (B % 2 == 0 and B >= 2) else 1
    else:
        assert B % batch_block == 0
        nblk = B // batch_block
    Bb = B // nblk
    rows = Bb * S
    scale = hd ** -0.5

    f32 = jnp.float32
    # rotary tables (txt tokens: identity rotation), tiled across heads, with
    # the per-head RMSNorm affine weights and the attention scale folded in:
    #   cosW = w * cos * s,  sinW = swap_pairs(w) * sin * s
    cos_full = jnp.concatenate([freqs_cos.astype(f32), jnp.ones((Lt, hd), f32)], 0)
    sin_full = jnp.concatenate([freqs_sin.astype(f32), jnp.zeros((Lt, hd), f32)], 0)
    cos_H = jnp.tile(cos_full, (1, nh))                               # (S, H)
    sin_H = jnp.tile(sin_full, (1, nh))

    def fold_tables(w, with_scale):
        wf = jnp.tile(w.astype(f32).reshape(1, hd), (1, nh))          # (1, H)
        ws = wf.reshape(1, H // 2, 2)[:, :, ::-1].reshape(1, H)       # pair-swap
        s = scale if with_scale else 1.0
        cw = jnp.tile(cos_H * wf * s, (Bb, 1))                        # (rows, H)
        sw = jnp.tile(sin_H * ws * s, (Bb, 1))
        return cw, sw

    cos_q, sin_q = fold_tables(params["q_norm_w"], True)
    cos_k, sin_k = fold_tables(params["k_norm_w"], False)

    blk = block_diag_mean(H, hd)
    rot = rotate_half_matrix(H)

    def rep(shape):
        nd = len(shape)
        return pl.BlockSpec(shape, lambda i, _nd=nd: (0,) * _nd)

    out_img, out_txt = pl.pallas_call(
        _fused_block_kernel,
        out_shape=(jax.ShapeDtypeStruct((B, Li, H), jnp.bfloat16),
                   jax.ShapeDtypeStruct((B, Lt, H), jnp.bfloat16)),
        grid=(nblk,),
        in_specs=[
            pl.BlockSpec((Bb, Li, H), lambda i: (i, 0, 0)),           # img
            pl.BlockSpec((Bb, Lt, H), lambda i: (i, 0, 0)),           # txt
            pl.BlockSpec((Bb, 1, H), lambda i: (i, 0, 0)),            # vec
            rep((H, 3 * H)), rep((1, 3 * H)),                         # w_mod, b_mod
            rep((H, 3 * H)), rep((1, 3 * H)),                         # w1_qkv, b1_qkv
            rep((H, M)), rep((1, M)),                                 # w1_mlp, b1_mlp
            rep((rows, H)), rep((rows, H)),                           # cos_q, sin_q
            rep((rows, H)), rep((rows, H)),                           # cos_k, sin_k
            rep((H, H)), rep((H, H)),                                 # blk, rot
            rep((H, H)), rep((M, H)), rep((1, H)),                    # w2_attn, w2_mlp, b2
        ],
        out_specs=(pl.BlockSpec((Bb, Li, H), lambda i: (i, 0, 0)),
                   pl.BlockSpec((Bb, Lt, H), lambda i: (i, 0, 0))),
        scratch_shapes=[pltpu.VMEM((rows, H), jnp.bfloat16)],
        compiler_params=pltpu.CompilerParams(
            dimension_semantics=("parallel",)),
    )(img, txt, vec[:, None, :],
      params["w_mod"], params["b_mod"],
      params["w1_qkv"], params["b1_qkv"],
      params["w1_mlp"], params["b1_mlp"],
      cos_q, sin_q, cos_k, sin_k, blk, rot,
      params["w2_attn"], params["w2_mlp"], params["b2"])

    return out_img, out_txt


# ---------------- deterministic parameter init ----------------
def init_params(key):
    ks = jax.random.split(key, 11)
    H, M, hd = HIDDEN, MLP_DIM, HEAD_DIM

    def lin(k, fan_in, shape):
        return (jax.random.normal(k, shape, jnp.float32) / np.sqrt(fan_in)
                ).astype(jnp.bfloat16)

    return {
        "w_mod": lin(ks[0], H, (H, 3 * H)),
        "b_mod": (0.02 * jax.random.normal(ks[1], (1, 3 * H))).astype(jnp.bfloat16),
        "w1_qkv": lin(ks[2], H, (H, 3 * H)),
        "b1_qkv": (0.02 * jax.random.normal(ks[3], (1, 3 * H))).astype(jnp.bfloat16),
        "w1_mlp": lin(ks[4], H, (H, M)),
        "b1_mlp": (0.02 * jax.random.normal(ks[5], (1, M))).astype(jnp.bfloat16),
        "w2_attn": lin(ks[6], H + M, (H, H)),       # linear2 columns for attn part
        "w2_mlp": lin(ks[7], H + M, (M, H)),        # linear2 columns for mlp part
        "b2": (0.02 * jax.random.normal(ks[8], (1, H))).astype(jnp.bfloat16),
        # non-trivial affine weights so the host folding is actually exercised
        "q_norm_w": (1.0 + 0.1 * jax.random.normal(ks[9], (1, hd))).astype(jnp.bfloat16),
        "k_norm_w": (1.0 + 0.1 * jax.random.normal(ks[10], (1, hd))).astype(jnp.bfloat16),
    }


# ---------------- pure-JAX f32 reference (for self-check) ----------------
def reference_forward(img, txt, vec, params, freqs_cos, freqs_sin):
    f = lambda a: jnp.asarray(a, jnp.float32)
    B, Li, H = img.shape
    Lt = txt.shape[1]
    S = Li + Lt
    nh, hd = HEADS, HEAD_DIM

    mod = jax.nn.silu(f(vec)) @ f(params["w_mod"]) + f(params["b_mod"])[0]
    shift, scale_, gate = jnp.split(mod, 3, axis=-1)
    x = jnp.concatenate([f(img), f(txt)], axis=1)
    mean = x.mean(-1, keepdims=True)
    var = ((x - mean) ** 2).mean(-1, keepdims=True)
    ln = (x - mean) / jnp.sqrt(var + EPS_LN)
    xm = ln * (1.0 + scale_[:, None, :]) + shift[:, None, :]
    qkv = xm @ f(params["w1_qkv"]) + f(params["b1_qkv"])[0]
    mlp_pre = xm @ f(params["w1_mlp"]) + f(params["b1_mlp"])[0]
    q = qkv[..., :H].reshape(B, S, nh, hd)
    k = qkv[..., H:2 * H].reshape(B, S, nh, hd)
    v = qkv[..., 2 * H:].reshape(B, S, nh, hd)

    def rms(t, w):
        return t * jax.lax.rsqrt((t ** 2).mean(-1, keepdims=True) + EPS_RMS) * f(w)[0]

    q, k = rms(q, params["q_norm_w"]), rms(k, params["k_norm_w"])
    cos_h = jnp.concatenate([f(freqs_cos)[:, 0::2], jnp.ones((Lt, hd // 2))], 0)
    sin_h = jnp.concatenate([f(freqs_sin)[:, 0::2], jnp.zeros((Lt, hd // 2))], 0)

    def rope(t):
        tr = t.reshape(B, S, nh, hd // 2, 2)
        t0, t1 = tr[..., 0], tr[..., 1]
        c, s = cos_h[None, :, None, :], sin_h[None, :, None, :]
        return jnp.stack([t0 * c - t1 * s, t1 * c + t0 * s], -1).reshape(B, S, nh, hd)

    q, k = rope(q), rope(k)
    logits = jnp.einsum("bqnd,bknd->bnqk", q, k) * (hd ** -0.5)
    p = jax.nn.softmax(logits, axis=-1)
    attn = jnp.einsum("bnqk,bknd->bqnd", p, v).reshape(B, S, H)
    y = (attn @ f(params["w2_attn"])
         + jax.nn.gelu(mlp_pre, approximate=True) @ f(params["w2_mlp"])
         + f(params["b2"])[0])
    out = x + gate[:, None, :] * y
    return out[:, :Li], out[:, Li:]


if __name__ == "__main__":
    key = jax.random.PRNGKey(0)
    kp, ki, kt, kv = jax.random.split(key, 4)
    B, Li, Lt = 2, 48, 16
    H, hd = HIDDEN, HEAD_DIM

    params = init_params(kp)
    img = (0.5 * jax.random.normal(ki, (B, Li, H))).astype(jnp.bfloat16)
    txt = (0.5 * jax.random.normal(kt, (B, Lt, H))).astype(jnp.bfloat16)
    vec = (0.5 * jax.random.normal(kv, (B, H))).astype(jnp.bfloat16)

    # rotary freqs for the image tokens (interleaved-repeat layout, HunyuanVideo style)
    pos = np.arange(Li, dtype=np.float32)
    inv = 1.0 / (10000.0 ** (np.arange(0, hd, 2, dtype=np.float32) / hd))
    ang = np.outer(pos, inv)                                          # (Li, hd//2)
    freqs_cos = jnp.asarray(np.repeat(np.cos(ang), 2, axis=-1))       # (Li, hd)
    freqs_sin = jnp.asarray(np.repeat(np.sin(ang), 2, axis=-1))

    img_out, txt_out = jax.jit(mm_single_stream_block)(
        img, txt, vec, params, freqs_cos, freqs_sin)
    jax.block_until_ready((img_out, txt_out))

    assert img_out.shape == (B, Li, H) and img_out.dtype == jnp.bfloat16
    assert txt_out.shape == (B, Lt, H) and txt_out.dtype == jnp.bfloat16

    ref_img, ref_txt = reference_forward(img, txt, vec, params, freqs_cos, freqs_sin)
    err = max(
        float(jnp.max(jnp.abs(img_out.astype(jnp.float32) - ref_img))),
        float(jnp.max(jnp.abs(txt_out.astype(jnp.float32) - ref_txt))))
    assert np.isfinite(err) and err < 0.25, f"mismatch vs f32 reference: {err}"

    print("KERNEL_OK")
</pallas_src>

<mosaic_0001>
module attributes {stable_mosaic.version = 11 : i64} {
  func.func @_fused_block_kernel(%arg0: i32, %arg1: memref<1x48x64xbf16, #tpu.memory_space<vmem>>, %arg2: memref<1x16x64xbf16, #tpu.memory_space<vmem>>, %arg3: memref<1x1x64xbf16, #tpu.memory_space<vmem>>, %arg4: memref<64x192xbf16, #tpu.memory_space<vmem>>, %arg5: memref<1x192xbf16, #tpu.memory_space<vmem>>, %arg6: memref<64x192xbf16, #tpu.memory_space<vmem>>, %arg7: memref<1x192xbf16, #tpu.memory_space<vmem>>, %arg8: memref<64x256xbf16, #tpu.memory_space<vmem>>, %arg9: memref<1x256xbf16, #tpu.memory_space<vmem>>, %arg10: memref<64x64xf32, #tpu.memory_space<vmem>>, %arg11: memref<64x64xf32, #tpu.memory_space<vmem>>, %arg12: memref<64x64xf32, #tpu.memory_space<vmem>>, %arg13: memref<64x64xf32, #tpu.memory_space<vmem>>, %arg14: memref<64x64xf32, #tpu.memory_space<vmem>>, %arg15: memref<64x64xf32, #tpu.memory_space<vmem>>, %arg16: memref<64x64xbf16, #tpu.memory_space<vmem>>, %arg17: memref<256x64xbf16, #tpu.memory_space<vmem>>, %arg18: memref<1x64xbf16, #tpu.memory_space<vmem>>, %arg19: memref<1x48x64xbf16, #tpu.memory_space<vmem>>, %arg20: memref<1x16x64xbf16, #tpu.memory_space<vmem>>, %arg21: memref<64x64xbf16, #tpu.memory_space<vmem>>) attributes {dimension_semantics = [#tpu.dimension_semantics<parallel>], iteration_bounds = array<i64: 2>, scalar_prefetch = 0 : i64, scratch_operands = 1 : i64, tpu.core_type = #tpu.core_type<tc>, window_params = [{transform_indices = @transform_0, window_bounds = array<i64: 1, 48, 64>}, {transform_indices = @transform_1, window_bounds = array<i64: 1, 16, 64>}, {transform_indices = @transform_2, window_bounds = array<i64: 1, 1, 64>}, {pipeline_mode = #tpu.pipeline_mode<synchronous>, transform_indices = @transform_3, window_bounds = array<i64: 64, 192>}, {pipeline_mode = #tpu.pipeline_mode<synchronous>, transform_indices = @transform_4, window_bounds = array<i64: 1, 192>}, {pipeline_mode = #tpu.pipeline_mode<synchronous>, transform_indices = @transform_5, window_bounds = array<i64: 64, 192>}, {pipeline_mode = #tpu.pipeline_mode<synchronous>, transform_indices = @transform_6, window_bounds = array<i64: 1, 192>}, {pipeline_mode = #tpu.pipeline_mode<synchronous>, transform_indices = @transform_7, window_bounds = array<i64: 64, 256>}, {pipeline_mode = #tpu.pipeline_mode<synchronous>, transform_indices = @transform_8, window_bounds = array<i64: 1, 256>}, {pipeline_mode = #tpu.pipeline_mode<synchronous>, transform_indices = @transform_9, window_bounds = array<i64: 64, 64>}, {pipeline_mode = #tpu.pipeline_mode<synchronous>, transform_indices = @transform_10, window_bounds = array<i64: 64, 64>}, {pipeline_mode = #tpu.pipeline_mode<synchronous>, transform_indices = @transform_11, window_bounds = array<i64: 64, 64>}, {pipeline_mode = #tpu.pipeline_mode<synchronous>, transform_indices = @transform_12, window_bounds = array<i64: 64, 64>}, {pipeline_mode = #tpu.pipeline_mode<synchronous>, transform_indices = @transform_13, window_bounds = array<i64: 64, 64>}, {pipeline_mode = #tpu.pipeline_mode<synchronous>, transform_indices = @transform_14, window_bounds = array<i64: 64, 64>}, {pipeline_mode = #tpu.pipeline_mode<synchronous>, transform_indices = @transform_15, window_bounds = array<i64: 64, 64>}, {pipeline_mode = #tpu.pipeline_mode<synchronous>, transform_indices = @transform_16, window_bounds = array<i64: 256, 64>}, {pipeline_mode = #tpu.pipeline_mode<synchronous>, transform_indices = @transform_17, window_bounds = array<i64: 1, 64>}, {transform_indices = @transform_18, window_bounds = array<i64: 1, 48, 64>}, {transform_indices = @transform_19, window_bounds = array<i64: 1, 16, 64>}]} {
    %c0 = arith.constant 0 : index
    %c0_0 = arith.constant 0 : index
    %c0_1 = arith.constant 0 : index
    %0 = vector.load %arg1[%c0, %c0_0, %c0_1] : memref<1x48x64xbf16, #tpu.memory_space<vmem>>, vector<1x48x64xbf16>
    %1 = arith.extf %0 : vector<1x48x64xbf16> to vector<1x48x64xf32>
    %c0_2 = arith.constant 0 : index
    %c0_3 = arith.constant 0 : index
    %c0_4 = arith.constant 0 : index
    %2 = vector.load %arg2[%c0_2, %c0_3, %c0_4] : memref<1x16x64xbf16, #tpu.memory_space<vmem>>, vector<1x16x64xbf16>
    %3 = arith.extf %2 : vector<1x16x64xbf16> to vector<1x16x64xf32>
    %4 = tpu.concatenate %1, %3 in 1 : vector<1x48x64xf32>, vector<1x16x64xf32> -> vector<1x64x64xf32>
    %c0_5 = arith.constant 0 : index
    %c0_6 = arith.constant 0 : index
    %c0_7 = arith.constant 0 : index
    %5 = vector.load %arg3[%c0_5, %c0_6, %c0_7] : memref<1x1x64xbf16, #tpu.memory_space<vmem>>, vector<1x1x64xbf16>
    %6 = vector.shape_cast %5 : vector<1x1x64xbf16> to vector<1x64xbf16>
    %7 = arith.extf %6 : vector<1x64xbf16> to vector<1x64xf32>
    %8 = arith.negf %7 : vector<1x64xf32>
    %9 = math.exp %8 : vector<1x64xf32>
    %cst = arith.constant 1.000000e+00 : f32
    %10 = vector.broadcast %cst : f32 to vector<1x64xf32>
    %11 = arith.addf %10, %9 : vector<1x64xf32>
    %12 = arith.divf %10, %11 : vector<1x64xf32>
    %13 = arith.mulf %7, %12 : vector<1x64xf32>
    %14 = arith.truncf %13 : vector<1x64xf32> to vector<1x64xbf16>
    %c0_8 = arith.constant 0 : index
    %c0_9 = arith.constant 0 : index
    %15 = vector.load %arg4[%c0_8, %c0_9] : memref<64x192xbf16, #tpu.memory_space<vmem>>, vector<64x192xbf16>
    %cst_10 = arith.constant dense<0.000000e+00> : vector<1x192xf32>
    %16 = tpu.matmul %14, %15, %cst_10 {dimension_numbers = #tpu.dot_dimension_numbers<[1], [0], [0], [1], [0, 0, 1, 1], [], []>} : vector<1x64xbf16>, vector<64x192xbf16>, vector<1x192xf32> -> vector<1x192xf32>
    %c0_11 = arith.constant 0 : index
    %c0_12 = arith.constant 0 : index
    %17 = vector.load %arg5[%c0_11, %c0_12] : memref<1x192xbf16, #tpu.memory_space<vmem>>, vector<1x192xbf16>
    %18 = arith.extf %17 : vector<1x192xbf16> to vector<1x192xf32>
    %19 = arith.addf %16, %18 : vector<1x192xf32>
    %20 = vector.extract_strided_slice %19 {offsets = [0, 0], sizes = [1, 64], strides = [1, 1]} : vector<1x192xf32> to vector<1x64xf32>
    %21 = vector.shape_cast %20 : vector<1x64xf32> to vector<1x1x64xf32>
    %22 = vector.extract_strided_slice %19 {offsets = [0, 64], sizes = [1, 64], strides = [1, 1]} : vector<1x192xf32> to vector<1x64xf32>
    %23 = vector.shape_cast %22 : vector<1x64xf32> to vector<1x1x64xf32>
    %24 = vector.extract_strided_slice %19 {offsets = [0, 128], sizes = [1, 64], strides = [1, 1]} : vector<1x192xf32> to vector<1x64xf32>
    %25 = vector.shape_cast %24 : vector<1x64xf32> to vector<1x1x64xf32>
    %cst_13 = arith.constant dense<0.000000e+00> : vector<1x64xf32>
    %26 = vector.multi_reduction <add>, %4, %cst_13 [2] : vector<1x64x64xf32> to vector<1x64xf32>
    %27 = vector.shape_cast %26 : vector<1x64xf32> to vector<1x64x1xf32>
    %cst_14 = arith.constant 6.400000e+01 : f32
    %28 = vector.broadcast %cst_14 : f32 to vector<1x64x1xf32>
    %29 = arith.divf %27, %28 : vector<1x64x1xf32>
    %30 = vector.broadcast %29 : vector<1x64x1xf32> to vector<1x64x64xf32>
    %31 = arith.subf %4, %30 : vector<1x64x64xf32>
    %32 = arith.mulf %31, %31 : vector<1x64x64xf32>
    %cst_15 = arith.constant dense<0.000000e+00> : vector<1x64xf32>
    %33 = vector.multi_reduction <add>, %32, %cst_15 [2] : vector<1x64x64xf32> to vector<1x64xf32>
    %34 = vector.shape_cast %33 : vector<1x64xf32> to vector<1x64x1xf32>
    %cst_16 = arith.constant 6.400000e+01 : f32
    %35 = vector.broadcast %cst_16 : f32 to vector<1x64x1xf32>
    %36 = arith.divf %34, %35 : vector<1x64x1xf32>
    %37 = vector.broadcast %29 : vector<1x64x1xf32> to vector<1x64x64xf32>
    %38 = arith.subf %4, %37 : vector<1x64x64xf32>
    %cst_17 = arith.constant 9.99999997E-7 : f32
    %39 = vector.broadcast %cst_17 : f32 to vector<1x64x1xf32>
    %40 = arith.addf %36, %39 : vector<1x64x1xf32>
    %41 = math.rsqrt %40 : vector<1x64x1xf32>
    %42 = vector.broadcast %41 : vector<1x64x1xf32> to vector<1x64x64xf32>
    %43 = arith.mulf %38, %42 : vector<1x64x64xf32>
    %cst_18 = arith.constant 1.000000e+00 : f32
    %44 = vector.broadcast %cst_18 : f32 to vector<1x1x64xf32>
    %45 = arith.addf %44, %23 : vector<1x1x64xf32>
    %46 = vector.broadcast %45 : vector<1x1x64xf32> to vector<1x64x64xf32>
    %47 = arith.mulf %43, %46 : vector<1x64x64xf32>
    %48 = vector.broadcast %21 : vector<1x1x64xf32> to vector<1x64x64xf32>
    %49 = arith.addf %47, %48 : vector<1x64x64xf32>
    %50 = vector.shape_cast %49 : vector<1x64x64xf32> to vector<64x64xf32>
    %51 = arith.truncf %50 : vector<64x64xf32> to vector<64x64xbf16>
    %c0_19 = arith.constant 0 : index
    %c0_20 = arith.constant 0 : index
    %52 = vector.load %arg8[%c0_19, %c0_20] : memref<64x256xbf16, #tpu.memory_space<vmem>>, vector<64x256xbf16>
    %cst_21 = arith.constant dense<0.000000e+00> : vector<64x256xf32>
    %53 = tpu.matmul %51, %52, %cst_21 {dimension_numbers = #tpu.dot_dimension_numbers<[1], [0], [0], [1], [0, 0, 1, 1], [], []>} : vector<64x64xbf16>, vector<64x256xbf16>, vector<64x256xf32> -> vector<64x256xf32>
    %c0_22 = arith.constant 0 : index
    %c0_23 = arith.constant 0 : index
    %54 = vector.load %arg9[%c0_22, %c0_23] : memref<1x256xbf16, #tpu.memory_space<vmem>>, vector<1x256xbf16>
    %55 = arith.extf %54 : vector<1x256xbf16> to vector<1x256xf32>
    %56 = vector.broadcast %55 : vector<1x256xf32> to vector<64x256xf32>
    %57 = arith.addf %53, %56 : vector<64x256xf32>
    %cst_24 = arith.constant 5.000000e-01 : f32
    %58 = vector.broadcast %cst_24 : f32 to vector<64x256xf32>
    %59 = arith.mulf %58, %57 : vector<64x256xf32>
    %cst_25 = arith.constant 4.471500e-02 : f32
    %60 = vector.broadcast %cst_25 : f32 to vector<64x256xf32>
    %61 = arith.mulf %60, %57 : vector<64x256xf32>
    %62 = arith.mulf %61, %57 : vector<64x256xf32>
    %63 = arith.mulf %62, %57 : vector<64x256xf32>
    %64 = arith.addf %57, %63 : vector<64x256xf32>
    %cst_26 = arith.constant 0.797884583 : f32
    %65 = vector.broadcast %cst_26 : f32 to vector<64x256xf32>
    %66 = arith.mulf %65, %64 : vector<64x256xf32>
    %67 = math.tanh %66 : vector<64x256xf32>
    %cst_27 = arith.constant 1.000000e+00 : f32
    %68 = vector.broadcast %cst_27 : f32 to vector<64x256xf32>
    %69 = arith.addf %68, %67 : vector<64x256xf32>
    %70 = arith.mulf %59, %69 : vector<64x256xf32>
    %71 = arith.truncf %70 : vector<64x256xf32> to vector<64x256xbf16>
    %c0_28 = arith.constant 0 : index
    %c0_29 = arith.constant 0 : index
    %72 = vector.load %arg17[%c0_28, %c0_29] : memref<256x64xbf16, #tpu.memory_space<vmem>>, vector<256x64xbf16>
    %cst_30 = arith.constant dense<0.000000e+00> : vector<64x64xf32>
    %73 = tpu.matmul %71, %72, %cst_30 {dimension_numbers = #tpu.dot_dimension_numbers<[1], [0], [0], [1], [0, 0, 1, 1], [], []>} : vector<64x256xbf16>, vector<256x64xbf16>, vector<64x64xf32> -> vector<64x64xf32>
    %c0_31 = arith.constant 0 : index
    %c0_32 = arith.constant 0 : index
    %74 = vector.load %arg6[%c0_31, %c0_32] : memref<64x192xbf16, #tpu.memory_space<vmem>>, vector<64x192xbf16>
    %cst_33 = arith.constant dense<0.000000e+00> : vector<64x192xf32>
    %75 = tpu.matmul %51, %74, %cst_33 {dimension_numbers = #tpu.dot_dimension_numbers<[1], [0], [0], [1], [0, 0, 1, 1], [], []>} : vector<64x64xbf16>, vector<64x192xbf16>, vector<64x192xf32> -> vector<64x192xf32>
    %c0_34 = arith.constant 0 : index
    %c0_35 = arith.constant 0 : index
    %76 = vector.load %arg7[%c0_34, %c0_35] : memref<1x192xbf16, #tpu.memory_space<vmem>>, vector<1x192xbf16>
    %77 = arith.extf %76 : vector<1x192xbf16> to vector<1x192xf32>
    %78 = vector.broadcast %77 : vector<1x192xf32> to vector<64x192xf32>
    %79 = arith.addf %75, %78 : vector<64x192xf32>
    %80 = vector.extract_strided_slice %79 {offsets = [0, 0], sizes = [64, 64], strides = [1, 1]} : vector<64x192xf32> to vector<64x64xf32>
    %81 = vector.extract_strided_slice %79 {offsets = [0, 64], sizes = [64, 64], strides = [1, 1]} : vector<64x192xf32> to vector<64x64xf32>
    %82 = vector.extract_strided_slice %79 {offsets = [0, 128], sizes = [64, 64], strides = [1, 1]} : vector<64x192xf32> to vector<64x64xf32>
    %c0_36 = arith.constant 0 : index
    %c0_37 = arith.constant 0 : index
    %83 = vector.load %arg14[%c0_36, %c0_37] : memref<64x64xf32, #tpu.memory_space<vmem>>, vector<64x64xf32>
    %c0_38 = arith.constant 0 : index
    %c0_39 = arith.constant 0 : index
    %84 = vector.load %arg15[%c0_38, %c0_39] : memref<64x64xf32, #tpu.memory_space<vmem>>, vector<64x64xf32>
    %c0_40 = arith.constant 0 : index
    %c0_41 = arith.constant 0 : index
    %85 = vector.load %arg10[%c0_40, %c0_41] : memref<64x64xf32, #tpu.memory_space<vmem>>, vector<64x64xf32>
    %c0_42 = arith.constant 0 : index
    %c0_43 = arith.constant 0 : index
    %86 = vector.load %arg11[%c0_42, %c0_43] : memref<64x64xf32, #tpu.memory_space<vmem>>, vector<64x64xf32>
    %87 = arith.mulf %80, %80 : vector<64x64xf32>
    %cst_44 = arith.constant dense<0.000000e+00> : vector<64x64xf32>
    %88 = tpu.matmul %87, %83, %cst_44 {dimension_numbers = #tpu.dot_dimension_numbers<[1], [0], [0], [1], [0, 0, 1, 1], [], []>} : vector<64x64xf32>, vector<64x64xf32>, vector<64x64xf32> -> vector<64x64xf32>
    %cst_45 = arith.constant 9.99999997E-7 : f32
    %89 = vector.broadcast %cst_45 : f32 to vector<64x64xf32>
    %90 = arith.addf %88, %89 : vector<64x64xf32>
    %91 = math.rsqrt %90 : vector<64x64xf32>
    %92 = arith.mulf %80, %91 : vector<64x64xf32>
    %cst_46 = arith.constant dense<0.000000e+00> : vector<64x64xf32>
    %93 = tpu.matmul %92, %84, %cst_46 {dimension_numbers = #tpu.dot_dimension_numbers<[1], [0], [0], [1], [0, 0, 1, 1], [], []>} : vector<64x64xf32>, vector<64x64xf32>, vector<64x64xf32> -> vector<64x64xf32>
    %94 = arith.mulf %92, %85 : vector<64x64xf32>
    %95 = arith.mulf %93, %86 : vector<64x64xf32>
    %96 = arith.addf %94, %95 : vector<64x64xf32>
    %97 = arith.truncf %96 : vector<64x64xf32> to vector<64x64xbf16>
    %c0_47 = arith.constant 0 : index
    %c0_48 = arith.constant 0 : index
    %98 = vector.load %arg12[%c0_47, %c0_48] : memref<64x64xf32, #tpu.memory_space<vmem>>, vector<64x64xf32>
    %c0_49 = arith.constant 0 : index
    %c0_50 = arith.constant 0 : index
    %99 = vector.load %arg13[%c0_49, %c0_50] : memref<64x64xf32, #tpu.memory_space<vmem>>, vector<64x64xf32>
    %100 = arith.mulf %81, %81 : vector<64x64xf32>
    %cst_51 = arith.constant dense<0.000000e+00> : vector<64x64xf32>
    %101 = tpu.matmul %100, %83, %cst_51 {dimension_numbers = #tpu.dot_dimension_numbers<[1], [0], [0], [1], [0, 0, 1, 1], [], []>} : vector<64x64xf32>, vector<64x64xf32>, vector<64x64xf32> -> vector<64x64xf32>
    %cst_52 = arith.constant 9.99999997E-7 : f32
    %102 = vector.broadcast %cst_52 : f32 to vector<64x64xf32>
    %103 = arith.addf %101, %102 : vector<64x64xf32>
    %104 = math.rsqrt %103 : vector<64x64xf32>
    %105 = arith.mulf %81, %104 : vector<64x64xf32>
    %cst_53 = arith.constant dense<0.000000e+00> : vector<64x64xf32>
    %106 = tpu.matmul %105, %84, %cst_53 {dimension_numbers = #tpu.dot_dimension_numbers<[1], [0], [0], [1], [0, 0, 1, 1], [], []>} : vector<64x64xf32>, vector<64x64xf32>, vector<64x64xf32> -> vector<64x64xf32>
    %107 = arith.mulf %105, %98 : vector<64x64xf32>
    %108 = arith.mulf %106, %99 : vector<64x64xf32>
    %109 = arith.addf %107, %108 : vector<64x64xf32>
    %110 = tpu.transpose %109, [1, 0] : vector<64x64xf32> -> vector<64x64xf32>
    %111 = arith.truncf %110 : vector<64x64xf32> to vector<64x64xbf16>
    %112 = arith.truncf %82 : vector<64x64xf32> to vector<64x64xbf16>
    %113 = vector.extract_strided_slice %97 {offsets = [0, 0], sizes = [64, 16], strides = [1, 1]} : vector<64x64xbf16> to vector<64x16xbf16>
    %114 = vector.extract_strided_slice %111 {offsets = [0, 0], sizes = [16, 64], strides = [1, 1]} : vector<64x64xbf16> to vector<16x64xbf16>
    %cst_54 = arith.constant dense<0.000000e+00> : vector<64x64xf32>
    %115 = tpu.matmul %113, %114, %cst_54 {dimension_numbers = #tpu.dot_dimension_numbers<[1], [0], [0], [1], [0, 0, 1, 1], [], []>} : vector<64x16xbf16>, vector<16x64xbf16>, vector<64x64xf32> -> vector<64x64xf32>
    %cst_55 = arith.constant dense<0xFF800000> : vector<64xf32>
    %116 = vector.multi_reduction <maximumf>, %115, %cst_55 [1] : vector<64x64xf32> to vector<64xf32>
    %117 = vector.shape_cast %116 : vector<64xf32> to vector<64x1xf32>
    %118 = vector.broadcast %117 : vector<64x1xf32> to vector<64x64xf32>
    %119 = arith.subf %115, %118 : vector<64x64xf32>
    %120 = math.exp %119 : vector<64x64xf32>
    %cst_56 = arith.constant dense<0.000000e+00> : vector<64xf32>
    %121 = vector.multi_reduction <add>, %120, %cst_56 [1] : vector<64x64xf32> to vector<64xf32>
    %122 = vector.shape_cast %121 : vector<64xf32> to vector<64x1xf32>
    %123 = tpu.reciprocal %122 {approx = true} : vector<64x1xf32> -> vector<64x1xf32>
    %124 = vector.broadcast %123 : vector<64x1xf32> to vector<64x64xf32>
    %125 = arith.mulf %120, %124 : vector<64x64xf32>
    %126 = arith.truncf %125 : vector<64x64xf32> to vector<64x64xbf16>
    %127 = vector.extract_strided_slice %112 {offsets = [0, 0], sizes = [64, 16], strides = [1, 1]} : vector<64x64xbf16> to vector<64x16xbf16>
    %cst_57 = arith.constant dense<0.000000e+00> : vector<64x16xf32>
    %128 = tpu.matmul %126, %127, %cst_57 {dimension_numbers = #tpu.dot_dimension_numbers<[1], [0], [0], [1], [0, 0, 1, 1], [], []>} : vector<64x64xbf16>, vector<64x16xbf16>, vector<64x16xf32> -> vector<64x16xf32>
    %129 = arith.truncf %128 : vector<64x16xf32> to vector<64x16xbf16>
    %c0_58 = arith.constant 0 : index
    %c0_59 = arith.constant 0 : index
    %130 = vector.load %arg21[%c0_58, %c0_59] : memref<64x64xbf16, #tpu.memory_space<vmem>>, vector<64x16xbf16>
    tpu.vector_store %arg21[%c0_58, %c0_59], %129 {strides = array<i32>} : memref<64x64xbf16, #tpu.memory_space<vmem>>, vector<64x16xbf16>,
    %131 = vector.extract_strided_slice %97 {offsets = [0, 16], sizes = [64, 16], strides = [1, 1]} : vector<64x64xbf16> to vector<64x16xbf16>
    %132 = vector.extract_strided_slice %111 {offsets = [16, 0], sizes = [16, 64], strides = [1, 1]} : vector<64x64xbf16> to vector<16x64xbf16>
    %cst_60 = arith.constant dense<0.000000e+00> : vector<64x64xf32>
    %133 = tpu.matmul %131, %132, %cst_60 {dimension_numbers = #tpu.dot_dimension_numbers<[1], [0], [0], [1], [0, 0, 1, 1], [], []>} : vector<64x16xbf16>, vector<16x64xbf16>, vector<64x64xf32> -> vector<64x64xf32>
    %cst_61 = arith.constant dense<0xFF800000> : vector<64xf32>
    %134 = vector.multi_reduction <maximumf>, %133, %cst_61 [1] : vector<64x64xf32> to vector<64xf32>
    %135 = vector.shape_cast %134 : vector<64xf32> to vector<64x1xf32>
    %136 = vector.broadcast %135 : vector<64x1xf32> to vector<64x64xf32>
    %137 = arith.subf %133, %136 : vector<64x64xf32>
    %138 = math.exp %137 : vector<64x64xf32>
    %cst_62 = arith.constant dense<0.000000e+00> : vector<64xf32>
    %139 = vector.multi_reduction <add>, %138, %cst_62 [1] : vector<64x64xf32> to vector<64xf32>
    %140 = vector.shape_cast %139 : vector<64xf32> to vector<64x1xf32>
    %141 = tpu.reciprocal %140 {approx = true} : vector<64x1xf32> -> vector<64x1xf32>
    %142 = vector.broadcast %141 : vector<64x1xf32> to vector<64x64xf32>
    %143 = arith.mulf %138, %142 : vector<64x64xf32>
    %144 = arith.truncf %143 : vector<64x64xf32> to vector<64x64xbf16>
    %145 = vector.extract_strided_slice %112 {offsets = [0, 16], sizes = [64, 16], strides = [1, 1]} : vector<64x64xbf16> to vector<64x16xbf16>
    %cst_63 = arith.constant dense<0.000000e+00> : vector<64x16xf32>
    %146 = tpu.matmul %144, %145, %cst_63 {dimension_numbers = #tpu.dot_dimension_numbers<[1], [0], [0], [1], [0, 0, 1, 1], [], []>} : vector<64x64xbf16>, vector<64x16xbf16>, vector<64x16xf32> -> vector<64x16xf32>
    %147 = arith.truncf %146 : vector<64x16xf32> to vector<64x16xbf16>
    %c0_64 = arith.constant 0 : index
    %c16 = arith.constant 16 : index
    %148 = vector.load %arg21[%c0_64, %c16] : memref<64x64xbf16, #tpu.memory_space<vmem>>, vector<64x16xbf16>
    tpu.vector_store %arg21[%c0_64, %c16], %147 {strides = array<i32>} : memref<64x64xbf16, #tpu.memory_space<vmem>>, vector<64x16xbf16>,
    %149 = vector.extract_strided_slice %97 {offsets = [0, 32], sizes = [64, 16], strides = [1, 1]} : vector<64x64xbf16> to vector<64x16xbf16>
    %150 = vector.extract_strided_slice %111 {offsets = [32, 0], sizes = [16, 64], strides = [1, 1]} : vector<64x64xbf16> to vector<16x64xbf16>
    %cst_65 = arith.constant dense<0.000000e+00> : vector<64x64xf32>
    %151 = tpu.matmul %149, %150, %cst_65 {dimension_numbers = #tpu.dot_dimension_numbers<[1], [0], [0], [1], [0, 0, 1, 1], [], []>} : vector<64x16xbf16>, vector<16x64xbf16>, vector<64x64xf32> -> vector<64x64xf32>
    %cst_66 = arith.constant dense<0xFF800000> : vector<64xf32>
    %152 = vector.multi_reduction <maximumf>, %151, %cst_66 [1] : vector<64x64xf32> to vector<64xf32>
    %153 = vector.shape_cast %152 : vector<64xf32> to vector<64x1xf32>
    %154 = vector.broadcast %153 : vector<64x1xf32> to vector<64x64xf32>
    %155 = arith.subf %151, %154 : vector<64x64xf32>
    %156 = math.exp %155 : vector<64x64xf32>
    %cst_67 = arith.constant dense<0.000000e+00> : vector<64xf32>
    %157 = vector.multi_reduction <add>, %156, %cst_67 [1] : vector<64x64xf32> to vector<64xf32>
    %158 = vector.shape_cast %157 : vector<64xf32> to vector<64x1xf32>
    %159 = tpu.reciprocal %158 {approx = true} : vector<64x1xf32> -> vector<64x1xf32>
    %160 = vector.broadcast %159 : vector<64x1xf32> to vector<64x64xf32>
    %161 = arith.mulf %156, %160 : vector<64x64xf32>
    %162 = arith.truncf %161 : vector<64x64xf32> to vector<64x64xbf16>
    %163 = vector.extract_strided_slice %112 {offsets = [0, 32], sizes = [64, 16], strides = [1, 1]} : vector<64x64xbf16> to vector<64x16xbf16>
    %cst_68 = arith.constant dense<0.000000e+00> : vector<64x16xf32>
    %164 = tpu.matmul %162, %163, %cst_68 {dimension_numbers = #tpu.dot_dimension_numbers<[1], [0], [0], [1], [0, 0, 1, 1], [], []>} : vector<64x64xbf16>, vector<64x16xbf16>, vector<64x16xf32> -> vector<64x16xf32>
    %165 = arith.truncf %164 : vector<64x16xf32> to vector<64x16xbf16>
    %c0_69 = arith.constant 0 : index
    %c32 = arith.constant 32 : index
    %166 = vector.load %arg21[%c0_69, %c32] : memref<64x64xbf16, #tpu.memory_space<vmem>>, vector<64x16xbf16>
    tpu.vector_store %arg21[%c0_69, %c32], %165 {strides = array<i32>} : memref<64x64xbf16, #tpu.memory_space<vmem>>, vector<64x16xbf16>,
    %167 = vector.extract_strided_slice %97 {offsets = [0, 48], sizes = [64, 16], strides = [1, 1]} : vector<64x64xbf16> to vector<64x16xbf16>
    %168 = vector.extract_strided_slice %111 {offsets = [48, 0], sizes = [16, 64], strides = [1, 1]} : vector<64x64xbf16> to vector<16x64xbf16>
    %cst_70 = arith.constant dense<0.000000e+00> : vector<64x64xf32>
    %169 = tpu.matmul %167, %168, %cst_70 {dimension_numbers = #tpu.dot_dimension_numbers<[1], [0], [0], [1], [0, 0, 1, 1], [], []>} : vector<64x16xbf16>, vector<16x64xbf16>, vector<64x64xf32> -> vector<64x64xf32>
    %cst_71 = arith.constant dense<0xFF800000> : vector<64xf32>
    %170 = vector.multi_reduction <maximumf>, %169, %cst_71 [1] : vector<64x64xf32> to vector<64xf32>
    %171 = vector.shape_cast %170 : vector<64xf32> to vector<64x1xf32>
    %172 = vector.broadcast %171 : vector<64x1xf32> to vector<64x64xf32>
    %173 = arith.subf %169, %172 : vector<64x64xf32>
    %174 = math.exp %173 : vector<64x64xf32>
    %cst_72 = arith.constant dense<0.000000e+00> : vector<64xf32>
    %175 = vector.multi_reduction <add>, %174, %cst_72 [1] : vector<64x64xf32> to vector<64xf32>
    %176 = vector.shape_cast %175 : vector<64xf32> to vector<64x1xf32>
    %177 = tpu.reciprocal %176 {approx = true} : vector<64x1xf32> -> vector<64x1xf32>
    %178 = vector.broadcast %177 : vector<64x1xf32> to vector<64x64xf32>
    %179 = arith.mulf %174, %178 : vector<64x64xf32>
    %180 = arith.truncf %179 : vector<64x64xf32> to vector<64x64xbf16>
    %181 = vector.extract_strided_slice %112 {offsets = [0, 48], sizes = [64, 16], strides = [1, 1]} : vector<64x64xbf16> to vector<64x16xbf16>
    %cst_73 = arith.constant dense<0.000000e+00> : vector<64x16xf32>
    %182 = tpu.matmul %180, %181, %cst_73 {dimension_numbers = #tpu.dot_dimension_numbers<[1], [0], [0], [1], [0, 0, 1, 1], [], []>} : vector<64x64xbf16>, vector<64x16xbf16>, vector<64x16xf32> -> vector<64x16xf32>
    %183 = arith.truncf %182 : vector<64x16xf32> to vector<64x16xbf16>
    %c0_74 = arith.constant 0 : index
    %c48 = arith.constant 48 : index
    %184 = vector.load %arg21[%c0_74, %c48] : memref<64x64xbf16, #tpu.memory_space<vmem>>, vector<64x16xbf16>
    tpu.vector_store %arg21[%c0_74, %c48], %183 {strides = array<i32>} : memref<64x64xbf16, #tpu.memory_space<vmem>>, vector<64x16xbf16>,
    %c0_75 = arith.constant 0 : index
    %c0_76 = arith.constant 0 : index
    %185 = vector.load %arg21[%c0_75, %c0_76] : memref<64x64xbf16, #tpu.memory_space<vmem>>, vector<64x64xbf16>
    %c0_77 = arith.constant 0 : index
    %c0_78 = arith.constant 0 : index
    %186 = vector.load %arg16[%c0_77, %c0_78] : memref<64x64xbf16, #tpu.memory_space<vmem>>, vector<64x64xbf16>
    %cst_79 = arith.constant dense<0.000000e+00> : vector<64x64xf32>
    %187 = tpu.matmul %185, %186, %cst_79 {dimension_numbers = #tpu.dot_dimension_numbers<[1], [0], [0], [1], [0, 0, 1, 1], [], []>} : vector<64x64xbf16>, vector<64x64xbf16>, vector<64x64xf32> -> vector<64x64xf32>
    %188 = arith.addf %73, %187 : vector<64x64xf32>
    %c0_80 = arith.constant 0 : index
    %c0_81 = arith.constant 0 : index
    %189 = vector.load %arg18[%c0_80, %c0_81] : memref<1x64xbf16, #tpu.memory_space<vmem>>, vector<1x64xbf16>
    %190 = arith.extf %189 : vector<1x64xbf16> to vector<1x64xf32>
    %191 = vector.broadcast %190 : vector<1x64xf32> to vector<64x64xf32>
    %192 = arith.addf %188, %191 : vector<64x64xf32>
    %193 = vector.shape_cast %192 : vector<64x64xf32> to vector<1x64x64xf32>
    %194 = vector.broadcast %25 : vector<1x1x64xf32> to vector<1x64x64xf32>
    %195 = arith.mulf %194, %193 : vector<1x64x64xf32>
    %196 = arith.addf %4, %195 : vector<1x64x64xf32>
    %197 = arith.truncf %196 : vector<1x64x64xf32> to vector<1x64x64xbf16>
    %198 = vector.extract_strided_slice %197 {offsets = [0, 0, 0], sizes = [1, 48, 64], strides = [1, 1, 1]} : vector<1x64x64xbf16> to vector<1x48x64xbf16>
    %c0_82 = arith.constant 0 : index
    %c0_83 = arith.constant 0 : index
    %c0_84 = arith.constant 0 : index
    %199 = vector.load %arg19[%c0_82, %c0_83, %c0_84] : memref<1x48x64xbf16, #tpu.memory_space<vmem>>, vector<1x48x64xbf16>
    tpu.vector_store %arg19[%c0_82, %c0_83, %c0_84], %198 {strides = array<i32>} : memref<1x48x64xbf16, #tpu.memory_space<vmem>>, vector<1x48x64xbf16>,
    %200 = vector.extract_strided_slice %197 {offsets = [0, 48, 0], sizes = [1, 16, 64], strides = [1, 1, 1]} : vector<1x64x64xbf16> to vector<1x16x64xbf16>
    %c0_85 = arith.constant 0 : index
    %c0_86 = arith.constant 0 : index
    %c0_87 = arith.constant 0 : index
    %201 = vector.load %arg20[%c0_85, %c0_86, %c0_87] : memref<1x16x64xbf16, #tpu.memory_space<vmem>>, vector<1x16x64xbf16>
    tpu.vector_store %arg20[%c0_85, %c0_86, %c0_87], %200 {strides = array<i32>} : memref<1x16x64xbf16, #tpu.memory_space<vmem>>, vector<1x16x64xbf16>,
    return
  }
  func.func @transform_0(%arg0: i32) -> (i32, i32, i32) {
    %c0_i32 = arith.constant 0 : i32
    %c0_i32_0 = arith.constant 0 : i32
    %c0_i32_1 = arith.constant 0 : i32
    return %arg0, %c0_i32, %c0_i32_0 : i32, i32, i32
  }
  func.func @transform_1(%arg0: i32) -> (i32, i32, i32) {
    %c0_i32 = arith.constant 0 : i32
    %c0_i32_0 = arith.constant 0 : i32
    %c0_i32_1 = arith.constant 0 : i32
    return %arg0, %c0_i32, %c0_i32_0 : i32, i32, i32
  }
  func.func @transform_2(%arg0: i32) -> (i32, i32, i32) {
    %c0_i32 = arith.constant 0 : i32
    %c0_i32_0 = arith.constant 0 : i32
    %c0_i32_1 = arith.constant 0 : i32
    return %arg0, %c0_i32, %c0_i32_0 : i32, i32, i32
  }
  func.func @transform_3(%arg0: i32) -> (i32, i32) {
    %c0_i32 = arith.constant 0 : i32
    %c0_i32_0 = arith.constant 0 : i32
    %c0_i32_1 = arith.constant 0 : i32
    return %c0_i32, %c0_i32_0 : i32, i32
  }
  func.func @transform_4(%arg0: i32) -> (i32, i32) {
    %c0_i32 = arith.constant 0 : i32
    %c0_i32_0 = arith.constant 0 : i32
    %c0_i32_1 = arith.constant 0 : i32
    return %c0_i32, %c0_i32_0 : i32, i32
  }
  func.func @transform_5(%arg0: i32) -> (i32, i32) {
    %c0_i32 = arith.constant 0 : i32
    %c0_i32_0 = arith.constant 0 : i32
    %c0_i32_1 = arith.constant 0 : i32
    return %c0_i32, %c0_i32_0 : i32, i32
  }
  func.func @transform_6(%arg0: i32) -> (i32, i32) {
    %c0_i32 = arith.constant 0 : i32
    %c0_i32_0 = arith.constant 0 : i32
    %c0_i32_1 = arith.constant 0 : i32
    return %c0_i32, %c0_i32_0 : i32, i32
  }
  func.func @transform_7(%arg0: i32) -> (i32, i32) {
    %c0_i32 = arith.constant 0 : i32
    %c0_i32_0 = arith.constant 0 : i32
    %c0_i32_1 = arith.constant 0 : i32
    return %c0_i32, %c0_i32_0 : i32, i32
  }
  func.func @transform_8(%arg0: i32) -> (i32, i32) {
    %c0_i32 = arith.constant 0 : i32
    %c0_i32_0 = arith.constant 0 : i32
    %c0_i32_1 = arith.constant 0 : i32
    return %c0_i32, %c0_i32_0 : i32, i32
  }
  func.func @transform_9(%arg0: i32) -> (i32, i32) {
    %c0_i32 = arith.constant 0 : i32
    %c0_i32_0 = arith.constant 0 : i32
    %c0_i32_1 = arith.constant 0 : i32
    return %c0_i32, %c0_i32_0 : i32, i32
  }
  func.func @transform_10(%arg0: i32) -> (i32, i32) {
    %c0_i32 = arith.constant 0 : i32
    %c0_i32_0 = arith.constant 0 : i32
    %c0_i32_1 = arith.constant 0 : i32
    return %c0_i32, %c0_i32_0 : i32, i32
  }
  func.func @transform_11(%arg0: i32) -> (i32, i32) {
    %c0_i32 = arith.constant 0 : i32
    %c0_i32_0 = arith.constant 0 : i32
    %c0_i32_1 = arith.constant 0 : i32
    return %c0_i32, %c0_i32_0 : i32, i32
  }
  func.func @transform_12(%arg0: i32) -> (i32, i32) {
    %c0_i32 = arith.constant 0 : i32
    %c0_i32_0 = arith.constant 0 : i32
    %c0_i32_1 = arith.constant 0 : i32
    return %c0_i32, %c0_i32_0 : i32, i32
  }
  func.func @transform_13(%arg0: i32) -> (i32, i32) {
    %c0_i32 = arith.constant 0 : i32
    %c0_i32_0 = arith.constant 0 : i32
    %c0_i32_1 = arith.constant 0 : i32
    return %c0_i32, %c0_i32_0 : i32, i32
  }
  func.func @transform_14(%arg0: i32) -> (i32, i32) {
    %c0_i32 = arith.constant 0 : i32
    %c0_i32_0 = arith.constant 0 : i32
    %c0_i32_1 = arith.constant 0 : i32
    return %c0_i32, %c0_i32_0 : i32, i32
  }
  func.func @transform_15(%arg0: i32) -> (i32, i32) {
    %c0_i32 = arith.constant 0 : i32
    %c0_i32_0 = arith.constant 0 : i32
    %c0_i32_1 = arith.constant 0 : i32
    return %c0_i32, %c0_i32_0 : i32, i32
  }
  func.func @transform_16(%arg0: i32) -> (i32, i32) {
    %c0_i32 = arith.constant 0 : i32
    %c0_i32_0 = arith.constant 0 : i32
    %c0_i32_1 = arith.constant 0 : i32
    return %c0_i32, %c0_i32_0 : i32, i32
  }
  func.func @transform_17(%arg0: i32) -> (i32, i32) {
    %c0_i32 = arith.constant 0 : i32
    %c0_i32_0 = arith.constant 0 : i32
    %c0_i32_1 = arith.constant 0 : i32
    return %c0_i32, %c0_i32_0 : i32, i32
  }
  func.func @transform_18(%arg0: i32) -> (i32, i32, i32) {
    %c0_i32 = arith.constant 0 : i32
    %c0_i32_0 = arith.constant 0 : i32
    %c0_i32_1 = arith.constant 0 : i32
    return %arg0, %c0_i32, %c0_i32_0 : i32, i32, i32
  }
  func.func @transform_19(%arg0: i32) -> (i32, i32, i32) {
    %c0_i32 = arith.constant 0 : i32
    %c0_i32_0 = arith.constant 0 : i32
    %c0_i32_1 = arith.constant 0 : i32
    return %arg0, %c0_i32, %c0_i32_0 : i32, i32, i32
  }
}

</mosaic_0001>

<bundles_post_ra>
// kernel: reverse
= control target key start
LH: loop header
LB: loop body
LE: loop exit
PB: predicated region body
PF: predicated region fallthrough
CT: control target
= control target key end

     0   :  { %v42_v1 = vld [vmem:[#allocation1] sm:$0x3]  ;;  %v52_v3 = vlaneseq  ;;  %s120_s0 = inlined_call_operand.vmem [shape: f32[32,2], index: 0, kind: input, shape index: {}]   ;;  %s121_s1 = inlined_call_operand.vmem [shape: f32[32,2], index: 1, kind: output, shape index: {}]  }
   0x1   :  { %v19_v0 = vld [vmem:[%s120_s0] sm:$0x3]  ;;  %43 = vst [vmem:[#allocation0] sm:$0x3] %v42_v1 }
   0x2   :  { %20 = vst [vmem:[#allocation1 + $0x2] sm:$0x3] %v19_v0  ;;  %v53_v6 = vshrl.u32 %v52_v3, 7 }
   0x4   :  { %vm54_vm0 = vcmp.lt.s32.totalorder %v53_v6, 2 }
   0x8   :  { %v45_v4 = vld [vmem:[#allocation0 + $0x7] ss:$-1 sm:$0xff] }
   0x9   :  { %v39_v2 = vld [vmem:[#allocation1 + $0x2] sm:$0x3]  ;;  %v46_v5 = vrot.slane %v45_v4, 6 }
   0xa   :  { %41 = vst [vmem:[#allocation0 + $0x8] sm:$0x3] %v39_v2 }
   0xb   :  { %47 = vst [vmem:[#allocation2] sm:$0xff] %v46_v5 }
  0x11   :  { %v50_v7 = vld [vmem:[#allocation0 + $0xf] ss:$-1 sm:$0xff] }
  0x12   :  { %v51_v8 = vrot.slane %v50_v7, 6 }
  0x14   :  { %55 = vst.msk [vmem:[#allocation2] sm:$0xff] %vm54_vm0, %v51_v8 }
  0x1b   :  { %v58_v9 = vld [vmem:[#allocation2] sm:$0x3] }
  0x1c   :  { %61 = vst [vmem:[#allocation3] sm:$0x3] %v58_v9 }
  0x23   :  { %v78_v10 = vld [vmem:[#allocation3] sm:$0x3] }
  0x24   :  { %79 = vst [vmem:[%s121_s1] sm:$0x3] %v78_v10 }

// kernel: mul.33
= control target key start
LH: loop header
LB: loop body
LE: loop exit
PB: predicated region body
PF: predicated region fallthrough
CT: control target
= control target key end

     0   :  { %s259_s10 = smov 62   ;;  %s260_s11 = smov 58   ;;  %vm3_vm0 = vcmask 15360   ;;  %vm9_vm1 = vcmask 523760   ;;  %vm15_vm2 = vcmask 507360   ;;  %vm21_vm3 = vcmask 490960   ;;  %s399_s0 = inlined_call_operand.vmem [shape: f32[32,2], index: 0, kind: input, shape index: {}]   ;;  %s400_s1 = inlined_call_operand.vmem [shape: f32[64], index: 1, kind: output, shape index: {}]  }
   0x1   :  { %v197_v0 = vld [vmem:[%s399_s0 + $0x1f] sm:$0x1]   ;;  %v199_v1 = vld [vmem:[%s399_s0 + $0x1d] sm:$0x1]   ;;  %v201_v2 = vld [vmem:[%s399_s0 + $0x1b] sm:$0x1]  }
   0x2   :  { %7 = vrot.lane.b32.xlu0 %v197_v0, %s259_s10  ;;  %19 = vrot.lane.b32.xlu1 %v199_v1, %s260_s11  ;;  %s261_s14 = smov 54   ;;  %v198_v3 = vld [vmem:[%s399_s0 + $0x1e] sm:$0x1]   ;;  %v200_v4 = vld [vmem:[%s399_s0 + $0x1c] sm:$0x1]   ;;  %s262_s19 = smov 60  }
   0x3   :  { %31 = vrot.lane.b32.xlu2 %v201_v2, %s261_s14  ;;  %s263_s20 = smov 56   ;;  %v202_v5 = vld [vmem:[%s399_s0 + $0x1a] sm:$0x1]   ;;  %s264_s23 = smov 52   ;;  %v203_v6 = vld [vmem:[%s399_s0 + $0x19] sm:$0x1]  }
   0x4   :  { %v204_v7 = vld [vmem:[%s399_s0 + $0x18] sm:$0x1]   ;;  %s265_s28 = smov 50   ;;  %s266_s29 = smov 48   ;;  %v205_v8 = vld [vmem:[%s399_s0 + $0x17] sm:$0x1]  }
   0x5   :  { %s267_s3 = smov 46   ;;  %v206_v9 = vld [vmem:[%s399_s0 + $0x16] sm:$0x1]   ;;  %v207_v10 = vld [vmem:[%s399_s0 + $0x15] sm:$0x1]   ;;  %s268_s8 = smov 44  }
   0x6   :  { %s269_s9 = smov 42   ;;  %v208_v11 = vld [vmem:[%s399_s0 + $0x14] sm:$0x1]   ;;  %s270_s12 = smov 40   ;;  %v209_v12 = vld [vmem:[%s399_s0 + $0x13] sm:$0x1]  }
   0x7   :  { %v210_v13 = vld [vmem:[%s399_s0 + $0x12] sm:$0x1]   ;;  %s271_s17 = smov 38   ;;  %s272_s18 = smov 36   ;;  %v211_v14 = vld [vmem:[%s399_s0 + $0x11] sm:$0x1]  }
   0x8   :  { %s273_s21 = smov 34   ;;  %v212_v15 = vld [vmem:[%s399_s0 + $0x10] sm:$0x1]   ;;  %v213_v16 = vld [vmem:[%s399_s0 + $0xf] sm:$0x1]   ;;  %s274_s26 = smov 32  }
   0x9   :  { %s275_s27 = smov 30   ;;  %v214_v17 = vld [vmem:[%s399_s0 + $0xe] sm:$0x1]   ;;  %s276_s30 = smov 28   ;;  %v215_v18 = vld [vmem:[%s399_s0 + $0xd] sm:$0x1]  }
   0xa   :  { %13 = vrot.lane.b32.xlu0 %v198_v3, %s262_s19  ;;  %25 = vrot.lane.b32.xlu1 %v200_v4, %s263_s20  ;;  %v216_v19 = vld [vmem:[%s399_s0 + $0xc] sm:$0x1]   ;;  %s277_s6 = smov 26   ;;  %s278_s7 = smov 24   ;;  %v217_v20 = vld [vmem:[%s399_s0 + $0xb] sm:$0x1]  }
   0xb   :  { %37 = vrot.lane.b32.xlu2 %v202_v5, %s264_s23  ;;  %s279_s10 = smov 22   ;;  %v218_v21 = vld [vmem:[%s399_s0 + $0xa] sm:$0x1]   ;;  %v219_v22 = vld [vmem:[%s399_s0 + $0x9] sm:$0x1]   ;;  %s280_s15 = smov 20  }
   0xc   :  { %s281_s16 = smov 18   ;;  %v220_v23 = vld [vmem:[%s399_s0 + $0x8] sm:$0x1]   ;;  %s282_s19 = smov 16   ;;  %v221_v24 = vld [vmem:[%s399_s0 + $0x7] sm:$0x1]  }
   0xd   :  { %v222_v25 = vld [vmem:[%s399_s0 + $0x6] sm:$0x1]   ;;  %s283_s24 = smov 14   ;;  %s284_s25 = smov 12   ;;  %v223_v26 = vld [vmem:[%s399_s0 + $0x5] sm:$0x1]  }
   0xe   :  { %v224_v27 = vld [vmem:[%s399_s0 + $0x4] sm:$0x1]   ;;  %v225_v28 = vld [vmem:[%s399_s0 + $0x3] sm:$0x1]   ;;  %s286_s4 = smov 8   ;;  %s287_s5 = smov 6  }
   0xf   :  { %v226_v29 = vld [vmem:[%s399_s0 + $0x2] sm:$0x1]   ;;  %v227_v30 = vld [vmem:[%s399_s0 + $0x1] sm:$0x1]   ;;  %s289_s11 = smov 2   ;;  %vm27_vm4 = vcmask 474560  }
  0x10   :  { %v2_v31 = vld [vmem:[%s399_s0] sm:$0x1]   ;;  %vm33_vm5 = vcmask 458160   ;;  %vm39_vm6 = vcmask 441760   ;;  %vm45_vm7 = vcmask 425360   ;;  %vm51_vm8 = vcmask 408960  }
  0x11   :  { %4 = vst.msk [vmem:[#allocation0] sm:$0x1] %vm3_vm0, %v2_v31   ;;  %vm57_vm9 = vcmask 392560   ;;  %vm63_vm10 = vcmask 376160   ;;  %vm69_vm11 = vcmask 359760   ;;  %vm75_vm12 = vcmask 343360  }
  0x12   :  { %43 = vrot.lane.b32.xlu0 %v203_v6, %s265_s28  ;;  %49 = vrot.lane.b32.xlu1 %v204_v7, %s266_s29  ;;  %s285_s28 = smov 10   ;;  %vm81_vm13 = vcmask 326960   ;;  %vm87_vm14 = vcmask 310560   ;;  %vm93_vm15 = vcmask 294160   ;;  %vm99_vm0 = vcmask 277760  }
  0x13   :  { %55 = vrot.lane.b32.xlu2 %v205_v8, %s267_s3 }
  0x1a   :  { %61 = vrot.lane.b32.xlu0 %v206_v9, %s268_s8  ;;  %67 = vrot.lane.b32.xlu1 %v207_v10, %s269_s9  ;;  %s288_s8 = smov 4  }
  0x1b   :  { %73 = vrot.lane.b32.xlu2 %v208_v11, %s270_s12 }
  0x22   :  { %79 = vrot.lane.b32.xlu0 %v209_v12, %s271_s17  ;;  %85 = vrot.lane.b32.xlu1 %v210_v13, %s272_s18 }
  0x23   :  { %91 = vrot.lane.b32.xlu2 %v211_v14, %s273_s21 }
  0x2a   :  { %97 = vrot.lane.b32.xlu0 %v212_v15, %s274_s26  ;;  %103 = vrot.lane.b32.xlu1 %v213_v16, %s275_s27 }
  0x2b   :  { %109 = vrot.lane.b32.xlu2 %v214_v17, %s276_s30 }
  0x32   :  { %115 = vrot.lane.b32.xlu0 %v215_v18, %s277_s6  ;;  %121 = vrot.lane.b32.xlu1 %v216_v19, %s278_s7 }
  0x33   :  { %127 = vrot.lane.b32.xlu2 %v217_v20, %s279_s10 }
  0x3a   :  { %133 = vrot.lane.b32.xlu0 %v218_v21, %s280_s15  ;;  %139 = vrot.lane.b32.xlu1 %v219_v22, %s281_s16 }
  0x3b   :  { %145 = vrot.lane.b32.xlu2 %v220_v23, %s282_s19 }
  0x42   :  { %151 = vrot.lane.b32.xlu0 %v221_v24, %s283_s24  ;;  %157 = vrot.lane.b32.xlu1 %v222_v25, %s284_s25 }
  0x43   :  { %163 = vrot.lane.b32.xlu2 %v223_v26, %s285_s28 }
  0x4a   :  { %169 = vrot.lane.b32.xlu0 %v224_v27, %s286_s4  ;;  %175 = vrot.lane.b32.xlu1 %v225_v28, %s287_s5 }
  0x4b   :  { %181 = vrot.lane.b32.xlu2 %v226_v29, %s288_s8 }
  0x52   :  { %187 = vrot.lane.b32.xlu0 %v227_v30, %s289_s11 }
  0x5d   :  { %v32_v32 = vpop.permute.xlu2 %31  }
  0x65   :  { %v38_v33 = vpop.permute.xlu2 %37  }
  0x6d   :  { %v56_v34 = vpop.permute.xlu2 %55  }
  0x74   :  { %v8_v35 = vpop.permute.xlu0 %7   ;;  %v20_v36 = vpop.permute.xlu1 %19  }
  0x75   :  { %10 = vst.msk [vmem:[#allocation0] sm:$0x1] %vm9_vm1, %v8_v35   ;;  %v74_v37 = vpop.permute.xlu2 %73   ;;  %vm105_vm1 = vcmask 261360  }
  0x7c   :  { %v14_v38 = vpop.permute.xlu0 %13   ;;  %v26_v39 = vpop.permute.xlu1 %25  }
  0x7d   :  { %16 = vst.msk [vmem:[#allocation0] sm:$0x1] %vm15_vm2, %v14_v38   ;;  %v92_v40 = vpop.permute.xlu2 %91   ;;  %vm111_vm2 = vcmask 244960  }
  0x7e   :  { %22 = vst.msk [vmem:[#allocation0] sm:$0x1] %vm21_vm3, %v20_v36   ;;  %vm117_vm3 = vcmask 228560  }
  0x7f   :  { %28 = vst.msk [vmem:[#allocation0] sm:$0x1] %vm27_vm4, %v26_v39   ;;  %vm123_vm4 = vcmask 212160  }
  0x80   :  { %34 = vst.msk [vmem:[#allocation0] sm:$0x1] %vm33_vm5, %v32_v32   ;;  %vm129_vm5 = vcmask 195760  }
  0x81   :  { %40 = vst.msk [vmem:[#allocation0] sm:$0x1] %vm39_vm6, %v38_v33   ;;  %vm135_vm6 = vcmask 179360  }
  0x84   :  { %v44_v41 = vpop.permute.xlu0 %43   ;;  %v50_v42 = vpop.permute.xlu1 %49  }
  0x85   :  { %46 = vst.msk [vmem:[#allocation0] sm:$0x1] %vm45_vm7, %v44_v41   ;;  %v110_v43 = vpop.permute.xlu2 %109   ;;  %vm141_vm7 = vcmask 162960  }
  0x86   :  { %52 = vst.msk [vmem:[#allocation0] sm:$0x1] %vm51_vm8, %v50_v42   ;;  %vm147_vm8 = vcmask 146560  }
  0x87   :  { %58 = vst.msk [vmem:[#allocation0] sm:$0x1] %vm57_vm9, %v56_v34   ;;  %vm153_vm9 = vcmask 130160  }
  0x8c   :  { %v62_v44 = vpop.permute.xlu0 %61   ;;  %v68_v45 = vpop.permute.xlu1 %67  }
  0x8d   :  { %64 = vst.msk [vmem:[#allocation0] sm:$0x1] %vm63_vm10, %v62_v44   ;;  %v128_v46 = vpop.permute.xlu2 %127   ;;  %vm159_vm10 = vcmask 113760  }
  0x8e   :  { %70 = vst.msk [vmem:[#allocation0] sm:$0x1] %vm69_vm11, %v68_v45   ;;  %vm165_vm11 = vcmask 97360  }
  0x8f   :  { %76 = vst.msk [vmem:[#allocation0] sm:$0x1] %vm75_vm12, %v74_v37   ;;  %vm171_vm12 = vcmask 80960  }
  0x94   :  { %v80_v47 = vpop.permute.xlu0 %79   ;;  %v86_v48 = vpop.permute.xlu1 %85  }
  0x95   :  { %82 = vst.msk [vmem:[#allocation0] sm:$0x1] %vm81_vm13, %v80_v47   ;;  %v146_v49 = vpop.permute.xlu2 %145   ;;  %vm177_vm13 = vcmask 64560  }
  0x96   :  { %88 = vst.msk [vmem:[#allocation0] sm:$0x1] %vm87_vm14, %v86_v48   ;;  %vm183_vm14 = vcmask 48160  }
  0x97   :  { %94 = vst.msk [vmem:[#allocation0] sm:$0x1] %vm93_vm15, %v92_v40   ;;  %vm189_vm15 = vcmask 31760  }
  0x9c   :  { %v98_v50 = vpop.permute.xlu0 %97   ;;  %v104_v51 = vpop.permute.xlu1 %103  }
  0x9d   :  { %100 = vst.msk [vmem:[#allocation0] sm:$0x1] %vm99_vm0, %v98_v50   ;;  %v164_v52 = vpop.permute.xlu2 %163  }
  0x9e   :  { %106 = vst.msk [vmem:[#allocation0] sm:$0x1] %vm105_vm1, %v104_v51  }
  0x9f   :  { %112 = vst.msk [vmem:[#allocation0] sm:$0x1] %vm111_vm2, %v110_v43  }
  0xa4   :  { %v116_v53 = vpop.permute.xlu0 %115   ;;  %v122_v54 = vpop.permute.xlu1 %121  }
  0xa5   :  { %118 = vst.msk [vmem:[#allocation0] sm:$0x1] %vm117_vm3, %v116_v53   ;;  %v182_v55 = vpop.permute.xlu2 %181  }
  0xa6   :  { %124 = vst.msk [vmem:[#allocation0] sm:$0x1] %vm123_vm4, %v122_v54  }
  0xa7   :  { %130 = vst.msk [vmem:[#allocation0] sm:$0x1] %vm129_vm5, %v128_v46  }
  0xac   :  { %v134_v56 = vpop.permute.xlu0 %133   ;;  %v140_v57 = vpop.permute.xlu1 %139  }
  0xad   :  { %136 = vst.msk [vmem:[#allocation0] sm:$0x1] %vm135_vm6, %v134_v56  }
  0xae   :  { %142 = vst.msk [vmem:[#allocation0] sm:$0x1] %vm141_vm7, %v140_v57  }
  0xaf   :  { %148 = vst.msk [vmem:[#allocation0] sm:$0x1] %vm147_vm8, %v146_v49  }
  0xb4   :  { %v152_v58 = vpop.permute.xlu0 %151   ;;  %v158_v59 = vpop.permute.xlu1 %157  }
  0xb5   :  { %154 = vst.msk [vmem:[#allocation0] sm:$0x1] %vm153_vm9, %v152_v58  }
  0xb6   :  { %160 = vst.msk [vmem:[#allocation0] sm:$0x1] %vm159_vm10, %v158_v59  }
  0xb7   :  { %166 = vst.msk [vmem:[#allocation0] sm:$0x1] %vm165_vm11, %v164_v52  }
  0xbc   :  { %v170_v60 = vpop.permute.xlu0 %169   ;;  %v176_v61 = vpop.permute.xlu1 %175  }
  0xbd   :  { %172 = vst.msk [vmem:[#allocation0] sm:$0x1] %vm171_vm12, %v170_v60  }
  0xbe   :  { %178 = vst.msk [vmem:[#allocation0] sm:$0x1] %vm177_vm13, %v176_v61  }
  0xbf   :  { %184 = vst.msk [vmem:[#allocation0] sm:$0x1] %vm183_vm14, %v182_v55  }
  0xc4   :  { %v188_v62 = vpop.permute.xlu0 %187  }
  0xc5   :  { %190 = vst.msk [vmem:[#allocation0] sm:$0x1] %vm189_vm15, %v188_v62  }
  0xcc   :  { %v193_v63 = vld [vmem:[#allocation0] sm:$0x1] }
  0xcd   :  { %196 = vst [vmem:[%s400_s1] sm:$0x1] %v193_v63 }

// kernel: mm_single_stream_block.1
= control target key start
LH: loop header
LB: loop body
LE: loop exit
PB: predicated region body
PF: predicated region fallthrough
CT: control target
= control target key end

     0   :  { %s5993_s0 = inlined_call_operand.vmem [shape: bf16[2,48,64], index: 0, kind: input, shape index: {}]   ;;  %s5994_s1 = inlined_call_operand.vmem [shape: bf16[2,16,64], index: 1, kind: input, shape index: {}]   ;;  %s5995_s2 = inlined_call_operand.vmem [shape: bf16[2,1,64], index: 2, kind: input, shape index: {}]   ;;  %s5996_s3 = inlined_call_operand.vmem [shape: bf16[64,192], index: 3, kind: input, shape index: {}]   ;;  %s5997_s4 = inlined_call_operand.vmem [shape: bf16[1,192], index: 4, kind: input, shape index: {}]   ;;  %s5998_s5 = inlined_call_operand.vmem [shape: bf16[64,192], index: 5, kind: input, shape index: {}]   ;;  %s5999_s6 = inlined_call_operand.vmem [shape: bf16[1,192], index: 6, kind: input, shape index: {}]   ;;  %s6000_s7 = inlined_call_operand.vmem [shape: bf16[64,256], index: 7, kind: input, shape index: {}]   ;;  %s6001_s8 = inlined_call_operand.vmem [shape: bf16[1,256], index: 8, kind: input, shape index: {}]   ;;  %s6002_s9 = inlined_call_operand.vmem [shape: f32[64,64], index: 9, kind: input, shape index: {}]   ;;  %s6003_s10 = inlined_call_operand.vmem [shape: f32[64,64], index: 10, kind: input, shape index: {}]   ;;  %s6004_s11 = inlined_call_operand.vmem [shape: f32[64,64], index: 11, kind: input, shape index: {}]   ;;  %s6005_s12 = inlined_call_operand.vmem [shape: f32[64,64], index: 12, kind: input, shape index: {}]   ;;  %s6006_s13 = inlined_call_operand.vmem [shape: f32[64,64], index: 13, kind: input, shape index: {}]   ;;  %s6007_s14 = inlined_call_operand.vmem [shape: f32[64,64], index: 14, kind: input, shape index: {}]   ;;  %s6008_s15 = inlined_call_operand.vmem [shape: bf16[64,64], index: 15, kind: input, shape index: {}]   ;;  %s6009_s16 = inlined_call_operand.vmem [shape: bf16[256,64], index: 16, kind: input, shape index: {}]   ;;  %s6010_s17 = inlined_call_operand.vmem [shape: bf16[1,64], index: 17, kind: input, shape index: {}]   ;;  %s6011_s18 = inlined_call_operand.hbm [shape: bf16[2,48,64], index: 18, kind: output, shape index: {0}]   ;;  %s6012_s19 = inlined_call_operand.hbm [shape: bf16[2,16,64], index: 19, kind: output, shape index: {1}]  }
   0x1   :  { %6032 = sst [smem:[#allocation19_spill]] %s5993_s0 }
   0x2   :  { %6033 = sst [smem:[#allocation20_spill]] %s5994_s1 }
   0x3   :  { %6034 = sst [smem:[#allocation21_spill]] %s5995_s2 }
   0x4   :  { %6035 = sst [smem:[#allocation22_spill]] %s5996_s3 }
   0x5   :  { %6036 = sst [smem:[#allocation23_spill]] %s5997_s4 }
   0x6   :  { %6037 = sst [smem:[#allocation24_spill]] %s5998_s5 }
   0x7   :  { %6038 = sst [smem:[#allocation25_spill]] %s5999_s6 }
   0x8   :  { %6039 = sst [smem:[#allocation26_spill]] %s6011_s18 }
   0x9   :  { %6040 = sst [smem:[#allocation27_spill]] %s6012_s19 }
   0xa   :  { %25 = vsyncpa [#allocation4], 0 }
   0xb   :  { %27 = vsyncpa [#allocation4 + $0x1], 0 }
   0xc   :  { %28 = vsyncpa [#allocation6], 0 }
   0xd   :  { %30 = vsyncpa [#allocation6 + $0x1], 0  ;;  %s4456_s0 = smov 0   ;;  %s4458_s30 = smov 0  }
   0xe   :  { %s4460_s20 = smov 0   ;;  %s4462_s21 = smov 0  }
   0xf LB: > { %6041 = sst [smem:[#allocation9_spill]] %s4333_s0  ;;  %s4477_s1 = sadd.s32 4294967295, %s4345_s21   ;;  %s4345_s21 = sphi %s4462_s21, %s6078_s21   ;;  %s4341_s20 = sphi %s4460_s20, %s6080_s20   ;;  %s4337_s30 = sphi %s4458_s30, %s6082_s30   ;;  %s4333_s0 = sphi %s4456_s0, %s6081_s0  }
  0x10   : > { %6042 = sst [smem:[#allocation10_spill]] %s4341_s20  ;;  %s3598_s22 = sadd.s32 4294967294, %s4345_s21  }
  0x11   : > { %6043 = sst [smem:[#allocation11_spill]] %s4345_s21  ;;  %s4481_s2 = sadd.s32 1, %s4345_s21  }
  0x12   : > { %6044 = sst [smem:[#allocation12_spill]] %s4481_s2  ;;  %s436_s23 = sadd.s32 1, %s4341_s20 }
  0x13   : > { %s433_s24 = ssub.s32 %s4345_s21, %s4481_s2  ;;  %p446_p0 = scmp.ne.s32.totalorder %s4341_s20, %s4337_s30 }
  0x14   : > { %p434_p1 = scmp.eq.s32.totalorder %s433_s24, 0  ;;  %p447_p2 = scmp.eq.s32.totalorder %s4477_s1, 1 }
  0x15   : > { %p452_p3 = scmp.ne.s32.totalorder %s4337_s30, %s4333_s0  ;;  %p453_p4 = scmp.eq.s32.totalorder %s3598_s22, 1 }
  0x16   : > { %s4492_s25 = scalar_select %p434_p1, %s4341_s20, %s436_s23  }
  0x17   : > { %p4494_p5 = por %p447_p2, %p446_p0  ;;  %p4498_p6 = por %p453_p4, %p452_p3 }
  0x18   : > { %6045 = sst [smem:[#allocation13_spill]] %s4492_s25  ;;  %p3601_p7 = scmp.ge.s32.totalorder %s4345_s21, 1 }
  0x19   : > { %s6046_s3 = scalar_select %p4494_p5, 1, 0 }
  0x1a   : > { %s6048_s26 = scalar_select %p4498_p6, 1, 0 }
  0x1b   : > { %6047 = sst [smem:[#allocation14_spill]] %s6046_s3  ;;  %p564_p8 = scmp.lt.s32.totalorder %s4345_s21, 3 }
  0x1c   : > { %6049 = sst [smem:[#allocation15_spill]] %s6048_s26 }
  0x1d   : > { %p565_p9 = pnand %p3601_p7, %p564_p8 }
  0x1f   : > { %568 = sbr.rel (%p565_p9) target bundleno = 3002 (0xbba), region = 92 }
  0x24   : > { %p633_p10 = scmp.lt.s32.totalorder %s4477_s1, 1  ;;  %s6050_s29 = sld [smem:[#allocation22_spill]]  ;;  %vm741_vm0 = vcmask 523264   ;;  %v4347_v47 = vmov 64.0  }
  0x25   : > { %s6051_s22 = sld [smem:[#allocation21_spill]]  ;;  %s6029_s24 = smov 64  }
  0x26   : > { %s4518_s26 = scalar_select %p633_p10, %s4477_s1, 1 }
  0x27   : > { %s6052_s18 = sld [smem:[#allocation19_spill]]  ;;  %s4350_s25 = smov 96  }
  0x28   : > { %s3961_s27 = smul.u32 24, %s4518_s26  ;;  %s6057_s4 = sld [smem:[#allocation23_spill]] }
  0x29   : > { %s6058_s5 = sld [smem:[#allocation24_spill]]  ;;  %s4351_s20 = smov 80  }
  0x2a   : > { %v3633_v0 = vld [vmem:[%s6050_s29 + $0x30] sm:$0xf]  ;;  %v3899_v1 = vld [vmem:[%s6050_s29 + $0x34] sm:$0xf0]  ;;  %v3625_v3 = vld [vmem:[%s6050_s29 + $0x20] sm:$0xf] }
  0x2b   : > { %v3634_v2 = vor.u32 %v3899_v1, %v3633_v0  ;;  %v3897_v4 = vld [vmem:[%s6050_s29 + $0x24] sm:$0xf0]  ;;  %s645_s23 = scalar_lea.vmem %s6051_s22, %s4518_s26  ;;  %v3617_v6 = vld [vmem:[%s6050_s29 + $0x10] sm:$0xf]  ;;  %v3895_v7 = vld [vmem:[%s6050_s29 + $0x14] sm:$0xf0] }
  0x2c   : > { %v3626_v5 = vor.u32 %v3897_v4, %v3625_v3  ;;  %v663_v8 = vld [vmem:[%s645_s23] sm:$0x1]  ;;  %v3618_v16 = vor.u32 %v3895_v7, %v3617_v6  ;;  %v3893_v18 = vld [vmem:[%s6050_s29 + $0x4] sm:$0xf0]  ;;  %s6054_s22 = sld [smem:[#allocation20_spill]]  ;;  %s5893_s28 = sand.u32 1, %s4337_s30  }
  0x2d   : > { %749 = vmatpush.bf16.msra.mxu0 %v3634_v2  ;;  %s637_s3 = scalar_lea.vmem %s6052_s18, %s3961_s27  ;;  %v664_v9 = vunpack.c.l.bf16 %v663_v8  ;;  %v3609_v17 = vld [vmem:[%s6050_s29] sm:$0xf]  ;;  %s6059_s6 = sld [smem:[#allocation25_spill]] }
  0x2e   : > { %v3957_v10 = vld [vmem:[%s637_s3 + $0x8] sm:$0xff]   ;;  %v3942_v11 = vld [vmem:[%s637_s3] sm:$0xff]   ;;  %v3958_v12 = vld [vmem:[%s637_s3 + $0x10] sm:$0xff]   ;;  %v3610_v25 = vor.u32 %v3893_v18, %v3609_v17  ;;  %s3891_s3 = sshll.u32 %s4518_s26, 3  ;;  %s4349_s26 = smov 112  }
  0x2f   : > { %v4534_v13 = vunpack.c.l.bf16 %v3957_v10  ;;  %v4536_v14 = vunpack.c.l.bf16 %v3942_v11  ;;  %v4538_v15 = vunpack.c.l.bf16 %v3958_v12  ;;  %v3606_v19 = vmul.f32 -1.442695, %v664_v9  ;;  %s6067_s21 = sld [smem:[#allocation26_spill]]  ;;  %s3445_s27 = scalar_lea.sflag [#allocation4], %s5893_s28 }
  0x30   : > { %v4552_v23 = vunpack.c.h.bf16 %v3957_v10  ;;  %v4554_v24 = vunpack.c.h.bf16 %v3942_v11  ;;  %v4557_v26 = vunpack.c.h.bf16 %v3958_v12 }
  0x31   : > { %750 = vmatpush.bf16.msra.mxu0 %v3626_v5  ;;  %v777_v20 = vsel %vm741_vm0, %v4534_v13, 0.0  ;;  %v771_v21 = vsel %vm741_vm0, %v4536_v14, 0.0  ;;  %v783_v22 = vsel %vm741_vm0, %v4538_v15, 0.0  ;;  %4037 = vpow2.f32 %v3606_v19 }
  0x32   : > { %778 = vadd.xlane.f32.xlu1 %v777_v20  ;;  %772 = vadd.xlane.f32.xlu0 %v771_v21  ;;  %6053 = vst [vmem:[#allocation16_spill] sm:$0xff] %v4557_v26  ;;  %s642_s23 = scalar_lea.vmem %s6054_s22, %s3891_s3  ;;  %v780_v27 = vsel %vm741_vm0, %v4552_v23, 0.0  ;;  %v774_v28 = vsel %vm741_vm0, %v4554_v24, 0.0  ;;  %v786_v30 = vsel %vm741_vm0, %v4557_v26, 0.0  ;;  %s4353_s22 = smov 32  }
  0x33   : > { %784 = vadd.xlane.f32.xlu2 %v783_v22  ;;  %v3954_v32 = vld [vmem:[%s642_s23] sm:$0xff]   ;;  %s4354_s23 = smov 48  }
  0x34   : > { %v4568_v33 = vunpack.c.l.bf16 %v3954_v32  ;;  %v4587_v2 = vunpack.c.h.bf16 %v3954_v32 }
  0x35   : > { %751 = vmatpush.bf16.msra.mxu0 %v3618_v16  ;;  %s6068_s18 = smov %s6067_s21 }
  0x36   : > { %6055 = vst [vmem:[#allocation17_spill] sm:$0xff] %v4568_v33  ;;  %v789_v34 = vsel %vm741_vm0, %v4568_v33, 0.0  ;;  %s4271_s0 = scalar_lea.hbm %s6068_s18, 48 }
  0x37   : > { %v4038_v29 = vpop.eup %4037  ;;  %6056 = vst [vmem:[#allocation18_spill] sm:$0xff] %v4587_v2 }
  0x38   : > { %v668_v31 = vadd.f32 1.0, %v4038_v29 }
  0x39   : > { %752 = vmatpush.bf16.msra.mxu0 %v3610_v25 }
  0x3a   : > { %781 = vadd.xlane.f32.xlu1 %v780_v27  ;;  %775 = vadd.xlane.f32.xlu0 %v774_v28  ;;  %4039 = vrcp.f32 %v668_v31  ;;  %v680_v37 = vand.u32 2147483648, %v668_v31  ;;  %vm674_vm1 = vweird.f32 %v668_v31  ;;  %v678_v39 = vand.u32 2147483647, %v668_v31 }
  0x3b   : > { %787 = vadd.xlane.f32.xlu2 %v786_v30  ;;  %4041 = vrcp.f32 %v4347_v47  ;;  %v3627_v47 = vld [vmem:[%s6050_s29 + $0x28] sm:$0xf0] }
  0x3c   : > { %v681_v41 = vor.u32 1.1754944e-38, %v680_v37  ;;  %vm679_vm4 = vcmp.eq.f32.partialorder %v678_v39, 8.507059e+37 }
  0x40   : > { %v4040_v35 = vpop.eup %4039 }
  0x41   : > { %v670_v36 = vmul.f32 %v4040_v35, %v668_v31  ;;  %vm675_vm2 = vweird.f32 %v4040_v35  ;;  %v4042_v48 = vpop.eup %4041  ;;  %v4631_v31 = vld [vmem:[%s6057_s4] sm:$0x3] }
  0x42   : > { %vm676_vm3 = vmor %vm674_vm1, %vm675_vm2  ;;  %v796_v49 = vmul.f32 64.0, %v4042_v48  ;;  %vm800_vm5 = vweird.f32 %v4042_v48  ;;  %v6024_v32 = vunpack.c.l.bf16 %v4631_v31 }
  0x43   : > { %790 = vadd.xlane.f32.xlu2 %v789_v34  ;;  %v671_v38 = vsub.f32 1.0, %v670_v36 }
  0x44   : > { %v797_v50 = vsub.f32 1.0, %v796_v49  ;;  %v3894_v49 = vld [vmem:[%s6050_s29 + $0x14] sm:$0xf] }
  0x45   : > { %v672_v40 = vmul.f32 %v4040_v35, %v671_v38 }
  0x46   : > { %v798_v51 = vmul.f32 %v4042_v48, %v797_v50  ;;  %v3619_v50 = vld [vmem:[%s6050_s29 + $0x18] sm:$0xf0] }
  0x47   : > { %v673_v42 = vadd.f32 %v4040_v35, %v672_v40 }
  0x48   : > { %v799_v52 = vadd.f32 %v4042_v48, %v798_v51  ;;  %v3622_v51 = vor.u32 %v3894_v49, %v3619_v50  ;;  %v3643_v49 = vld [vmem:[%s6000_s7] sm:$0xf]  ;;  %v3901_v50 = vld [vmem:[%s6000_s7 + $0x4] sm:$0xf0] }
  0x49   : > { %v677_v43 = vsel %vm676_vm3, %v4040_v35, %v673_v42  ;;  %v737_v35 = vperm.slane %v6024_v32, 0  ;;  %v3898_v42 = vld [vmem:[%s6050_s29 + $0x34] sm:$0xf] }
  0x4a   : > { %v682_v44 = vsel %vm679_vm4, %v681_v41, %v677_v43  ;;  %v4576_v53 = vsel %vm800_vm5, %v4042_v48, %v799_v52  ;;  %v3635_v43 = vld [vmem:[%s6050_s29 + $0x38] sm:$0xf0]  ;;  %v3892_v52 = vld [vmem:[%s6050_s29 + $0x4] sm:$0xf] }
  0x4b   : > { %v684_v45 = vmul.f32 %v682_v44, %v664_v9  ;;  %v792_v9 = vsel %vm741_vm0, %v4587_v2, 0.0  ;;  %v3638_v44 = vor.u32 %v3898_v42, %v3635_v43  ;;  %v3927_v43 = vld [vmem:[%s6058_s5 + $0x14] sm:$0xf0] }
  0x4d   : > { %v4572_v46 = vpack.c.bf16 %v684_v45, %v684_v45  ;;  %762 = vmatpush.bf16.msra.mxu1 %v3638_v44  ;;  %v3896_v45 = vld [vmem:[%s6050_s29 + $0x24] sm:$0xf]  ;;  %v3926_v44 = vld [vmem:[%s6058_s5 + $0x14] sm:$0xf] }
  0x4e   : > { %v3630_v48 = vor.u32 %v3896_v45, %v3627_v47  ;;  %v3693_v45 = vld [vmem:[%s6058_s5 + $0x18] sm:$0xf0] }
  0x4f   : > { %3639 = vmatmul.msk.bf16.vlgmr.msra.gmra.mxu0 %vm741_vm0, %v4572_v46 }
  0x51   : > { %763 = vmatpush.bf16.msra.mxu1 %v3630_v48  ;;  %v3696_v48 = vor.u32 %v3926_v44, %v3693_v45 }
  0x55   : > { %764 = vmatpush.bf16.msra.mxu1 %v3622_v51  ;;  %v3900_v51 = vld [vmem:[%s6000_s7 + $0x4] sm:$0xf] }
  0xa5   : > { %v779_v54 = vpop.xlane.xlu1 %778  ;;  %v773_v55 = vpop.xlane.xlu0 %772 }
  0xa6   : > { %v802_v56 = vmul.f32 %v4576_v53, %v773_v55  ;;  %v785_v57 = vpop.xlane.xlu2 %784  ;;  %v804_v3 = vmul.f32 %v4576_v53, %v779_v54  ;;  %v3611_v54 = vld [vmem:[%s6050_s29 + $0x8] sm:$0xf0] }
  0xa7   : > { %v806_v18 = vmul.f32 %v4576_v53, %v785_v57  ;;  %v3614_v55 = vor.u32 %v3892_v52, %v3611_v54  ;;  %v3907_v57 = vld [vmem:[%s6000_s7 + $0x34] sm:$0xf0]  ;;  %v3644_v54 = vor.u32 %v3901_v50, %v3643_v49 }
  0xa8   : > { %v4580_v58 = vsub.f32 %v4536_v14, %v802_v56  ;;  %v4607_v11 = vsub.f32 %v4534_v13, %v804_v3  ;;  %v3667_v56 = vld [vmem:[%s6000_s7 + $0x30] sm:$0xf]  ;;  %v3930_v3 = vld [vmem:[%s6058_s5 + $0x34] sm:$0xf] }
  0xa9   : > { %v4618_v21 = vsub.f32 %v4538_v15, %v806_v18  ;;  %765 = vmatpush.bf16.msra.mxu1 %v3614_v55  ;;  %v3699_v18 = vld [vmem:[%s6058_s5 + $0x20] sm:$0xf]  ;;  %v3645_v55 = vld [vmem:[%s6000_s7 + $0x8] sm:$0xf0] }
  0xaa   : > { %v818_v59 = vmul.f32 %v4580_v58, %v4580_v58  ;;  %v820_v19 = vmul.f32 %v4607_v11, %v4607_v11 }
  0xab   : > { %v822_v28 = vmul.f32 %v4618_v21, %v4618_v21 }
  0xac   : > { %v826_v60 = vsel %vm741_vm0, %v818_v59, 0.0  ;;  %v832_v22 = vsel %vm741_vm0, %v820_v19, 0.0  ;;  %v3906_v59 = vld [vmem:[%s6000_s7 + $0x34] sm:$0xf]  ;;  %3640 = vmatmul.msk.bf16.vlgmr.msra.gmra.mxu1 %vm741_vm0, %v4572_v46  ;;  %v3905_v46 = vld [vmem:[%s6000_s7 + $0x24] sm:$0xf0] }
  0xad   : > { %v782_v61 = vpop.xlane.xlu1 %781  ;;  %827 = vadd.xlane.f32.xlu0 %v826_v60  ;;  %v776_v62 = vpop.xlane.xlu0 %775  ;;  %v838_v30 = vsel %vm741_vm0, %v822_v28, 0.0  ;;  %v3668_v60 = vor.u32 %v3907_v57, %v3667_v56  ;;  %v3929_v19 = vld [vmem:[%s6058_s5 + $0x24] sm:$0xf0]  ;;  %v3701_v28 = vld [vmem:[%s6058_s5 + $0x28] sm:$0xf0] }
  0xae   : > { %v805_v63 = vmul.f32 %v4576_v53, %v782_v61  ;;  %v803_v0 = vmul.f32 %v4576_v53, %v776_v62  ;;  %v788_v1 = vpop.xlane.xlu2 %787  ;;  %v3669_v61 = vld [vmem:[%s6000_s7 + $0x38] sm:$0xf0]  ;;  %v3707_v62 = vld [vmem:[%s6058_s5 + $0x30] sm:$0xf]  ;;  %v3683_v56 = vld [vmem:[%s6058_s5] sm:$0xf] }
  0xaf   : > { %v807_v4 = vmul.f32 %v4576_v53, %v788_v1  ;;  %1054 = vmatpush.bf16.msra.mxu2 %v3668_v60  ;;  %v3925_v57 = vld [vmem:[%s6058_s5 + $0x4] sm:$0xf0] }
  0xb0   : > { %v4592_v5 = vsub.f32 %v4552_v23, %v805_v63  ;;  %v4595_v6 = vsub.f32 %v4554_v24, %v803_v0  ;;  %v3931_v63 = vld [vmem:[%s6058_s5 + $0x34] sm:$0xf0]  ;;  %v3672_v0 = vor.u32 %v3906_v59, %v3669_v61 }
  0xb1   : > { %v4598_v7 = vsub.f32 %v4557_v26, %v807_v4  ;;  %v3708_v1 = vor.u32 %v3931_v63, %v3707_v62  ;;  %v3709_v4 = vld [vmem:[%s6058_s5 + $0x38] sm:$0xf0]  ;;  %v3648_v62 = vor.u32 %v3900_v51, %v3645_v55  ;;  %v3684_v63 = vor.u32 %v3925_v57, %v3683_v56 }
  0xb2   : > { %v821_v8 = vmul.f32 %v4592_v5, %v4592_v5  ;;  %v819_v10 = vmul.f32 %v4595_v6, %v4595_v6  ;;  %1083 = vmatpush.bf16.msra.mxu3 %v3672_v0  ;;  %v3924_v0 = vld [vmem:[%s6058_s5 + $0x4] sm:$0xf] }
  0xb3   : > { %v823_v17 = vmul.f32 %v4598_v7, %v4598_v7  ;;  %1353 = vmatpush.bf16.msrb.mxu0 %v3708_v1  ;;  %v3685_v1 = vld [vmem:[%s6058_s5 + $0x8] sm:$0xf0] }
  0xb4   : > { %v835_v12 = vsel %vm741_vm0, %v821_v8, 0.0  ;;  %v829_v16 = vsel %vm741_vm0, %v819_v10, 0.0  ;;  %v3712_v8 = vor.u32 %v3930_v3, %v3709_v4  ;;  %v3904_v10 = vld [vmem:[%s6000_s7 + $0x24] sm:$0xf]  ;;  %v3688_v4 = vor.u32 %v3924_v0, %v3685_v1 }
  0xb5   : > { %836 = vadd.xlane.f32.xlu2 %v835_v12  ;;  %793 = vadd.xlane.f32.xlu0 %v792_v9  ;;  %v841_v20 = vsel %vm741_vm0, %v823_v17, 0.0  ;;  %v3659_v9 = vld [vmem:[%s6000_s7 + $0x20] sm:$0xf]  ;;  %v3661_v17 = vld [vmem:[%s6000_s7 + $0x28] sm:$0xf0] }
  0xb6   : > { %830 = vadd.xlane.f32.xlu1 %v829_v16  ;;  %v791_v25 = vpop.xlane.xlu2 %790  ;;  %1382 = vmatpush.bf16.msrb.mxu1 %v3712_v8  ;;  %v3660_v16 = vor.u32 %v3905_v46, %v3659_v9 }
  0xb7   : > { %v808_v27 = vmul.f32 %v4576_v53, %v791_v25  ;;  %v3700_v25 = vor.u32 %v3929_v19, %v3699_v18 }
  0xb8   : > { %1055 = vmatpush.bf16.msra.mxu2 %v3660_v16 }
  0xb9   : > { %v4625_v29 = vsub.f32 %v4568_v33, %v808_v27  ;;  %v3928_v27 = vld [vmem:[%s6058_s5 + $0x24] sm:$0xf]  ;;  %1354 = vmatpush.bf16.msrb.mxu0 %v3700_v25 }
  0xbb   : > { %v824_v34 = vmul.f32 %v4625_v29, %v4625_v29 }
  0xbd   : > { %842 = vadd.xlane.f32.xlu2 %v841_v20  ;;  %v844_v36 = vsel %vm741_vm0, %v824_v34, 0.0 }
  0xbe   : > { %833 = vadd.xlane.f32.xlu1 %v832_v22  ;;  %v3664_v22 = vor.u32 %v3904_v10, %v3661_v17 }
  0xc0   : > { %1084 = vmatpush.bf16.msra.mxu3 %v3664_v22 }
  0xc6   : > { %839 = vadd.xlane.f32.xlu1 %v838_v30  ;;  %v3704_v30 = vor.u32 %v3928_v27, %v3701_v28 }
  0xc8   : > { %1383 = vmatpush.bf16.msrb.mxu1 %v3704_v30 }
  0xcc   : > { %v754_v37 = vpop.f32.mrf.mxu0  ;;  %1384 = vmatpush.bf16.msrb.mxu1 %v3696_v48 }
  0xcd   : > { %v4639_v38 = vadd.f32 %v754_v37, %v737_v35  ;;  %v3651_v35 = vld [vmem:[%s6000_s7 + $0x10] sm:$0xf] }
  0xce   : > { %845 = vadd.xlane.f32.xlu1 %v844_v36  ;;  %v3903_v36 = vld [vmem:[%s6000_s7 + $0x14] sm:$0xf0] }
  0xcf   : > { %v954_v39 = vadd.f32 1.0, %v4639_v38  ;;  %v3652_v37 = vor.u32 %v3903_v36, %v3651_v35 }
  0xd0   : > { %1385 = vmatpush.bf16.msrb.mxu1 %v3688_v4 }
  0xd1   : > { %v955_v40 = vperm.slane %v954_v39, 0  ;;  %v3902_v39 = vld [vmem:[%s6000_s7 + $0x14] sm:$0xf]  ;;  %1056 = vmatpush.bf16.msra.mxu2 %v3652_v37 }
  0xd3   : > { %957 = vrot.lane.b32.xlu0 %v955_v40, %s6029_s24  ;;  %v3653_v40 = vld [vmem:[%s6000_s7 + $0x18] sm:$0xf0] }
  0xd4   : > { %v756_v41 = vpop.f32.mrf.mxu0  ;;  %v3656_v42 = vor.u32 %v3902_v39, %v3653_v40 }
  0xd5   : > { %v3691_v41 = vld [vmem:[%s6058_s5 + $0x10] sm:$0xf]  ;;  %1057 = vmatpush.bf16.msra.mxu2 %v3644_v54 }
  0xd6   : > { %v3692_v47 = vor.u32 %v3927_v43, %v3691_v41  ;;  %1085 = vmatpush.bf16.msra.mxu3 %v3656_v42 }
  0xd8   : > { %1355 = vmatpush.bf16.msrb.mxu0 %v3692_v47 }
  0xda   : > { %1086 = vmatpush.bf16.msra.mxu3 %v3648_v62 }
  0xdc   : > { %1356 = vmatpush.bf16.msrb.mxu0 %v3684_v63 }
 0x120   : > { %v828_v12 = vpop.xlane.xlu0 %827 }
 0x121   : > { %v850_v20 = vmul.f32 %v828_v12, %v4576_v53 }
 0x123   : > { %v4718_v34 = vadd.f32 1e-06, %v850_v20 }
 0x125   : > { %4043 = vrsqrt.f32 %v4718_v34  ;;  %vm872_vm9 = vweird.f32 %v4718_v34 }
 0x128   : > { %v794_v52 = vpop.xlane.xlu0 %793  ;;  %v837_v59 = vpop.xlane.xlu2 %836 }
 0x129   : > { %v831_v60 = vpop.xlane.xlu1 %830  ;;  %v809_v61 = vmul.f32 %v4576_v53, %v794_v52  ;;  %v853_v46 = vmul.f32 %v837_v59, %v4576_v53 }
 0x12a   : > { %v851_v3 = vmul.f32 %v831_v60, %v4576_v53 }
 0x12b   : > { %v4044_v8 = vpop.eup %4043  ;;  %v4772_v9 = vsub.f32 %v4587_v2, %v809_v61  ;;  %v4779_v18 = vadd.f32 1e-06, %v853_v46 }
 0x12c   : > { %v859_v10 = vadd.f32 1e-06, %v851_v3  ;;  %v867_v16 = vmul.f32 %v4044_v8, %v4718_v34  ;;  %vm873_vm8 = vweird.f32 %v4044_v8  ;;  %v4795_v34 = vperm.slane %v4639_v38, 0 }
 0x12d   : > { %v825_v12 = vmul.f32 %v4772_v9, %v4772_v9  ;;  %vm874_vm11 = vmor %vm872_vm9, %vm873_vm8  ;;  %vm902_vm15 = vweird.f32 %v4779_v18 }
 0x12e   : > { %4045 = vrsqrt.f32 %v859_v10  ;;  %v868_v20 = vmul.f32 %v4044_v8, %v867_v16  ;;  %vm882_vm6 = vweird.f32 %v859_v10 }
 0x12f   : > { %v847_v17 = vsel %vm741_vm0, %v825_v12, 0.0  ;;  %4047 = vrsqrt.f32 %v4779_v18 }
 0x130   : > { %848 = vadd.xlane.f32.xlu2 %v847_v17  ;;  %v869_v30 = vmul.f32 0.5, %v868_v20  ;;  %v843_v36 = vpop.xlane.xlu2 %842 }
 0x131   : > { %v834_v19 = vpop.xlane.xlu1 %833  ;;  %v855_v42 = vmul.f32 %v843_v36, %v4576_v53 }
 0x132   : > { %v852_v22 = vmul.f32 %v834_v19, %v4576_v53  ;;  %v870_v41 = vsub.f32 1.5, %v869_v30 }
 0x133   : > { %v863_v51 = vadd.f32 1e-06, %v855_v42 }
 0x134   : > { %v4046_v25 = vpop.eup %4045  ;;  %v860_v27 = vadd.f32 1e-06, %v852_v22  ;;  %v871_v50 = vmul.f32 %v4044_v8, %v870_v41 }
 0x135   : > { %v877_v28 = vmul.f32 %v4046_v25, %v859_v10  ;;  %v4048_v40 = vpop.eup %4047  ;;  %vm883_vm7 = vweird.f32 %v4046_v25  ;;  %vm922_vm5 = vweird.f32 %v863_v51 }
 0x136   : > { %4049 = vrsqrt.f32 %v860_v27  ;;  %v897_v48 = vmul.f32 %v4048_v40, %v4779_v18  ;;  %vm884_vm10 = vmor %vm882_vm6, %vm883_vm7  ;;  %v875_v57 = vsel %vm874_vm11, %v4044_v8, %v871_v50  ;;  %vm892_vm12 = vweird.f32 %v860_v27 }
 0x137   : > { %v878_v35 = vmul.f32 %v4046_v25, %v877_v28  ;;  %v946_v60 = vmul.f32 %v875_v57, %v4580_v58  ;;  %vm903_vm1 = vweird.f32 %v4048_v40 }
 0x138   : > { %v898_v55 = vmul.f32 %v4048_v40, %v897_v48  ;;  %vm904_vm2 = vmor %vm902_vm15, %vm903_vm1 }
 0x139   : > { %v879_v37 = vmul.f32 0.5, %v878_v35  ;;  %v840_v39 = vpop.xlane.xlu1 %839 }
 0x13a   : > { %v854_v43 = vmul.f32 %v840_v39, %v4576_v53  ;;  %v899_v61 = vmul.f32 0.5, %v898_v55  ;;  %v4829_v55 = vpop.f32.mrf.mxu1 }
 0x13b   : > { %v880_v44 = vsub.f32 1.5, %v879_v37 }
 0x13c   : > { %v4050_v45 = vpop.eup %4049  ;;  %v4785_v47 = vadd.f32 1e-06, %v854_v43  ;;  %v900_v46 = vsub.f32 1.5, %v899_v61 }
 0x13d   : > { %v887_v49 = vmul.f32 %v4050_v45, %v860_v27  ;;  %v881_v52 = vmul.f32 %v4046_v25, %v880_v44  ;;  %vm893_vm13 = vweird.f32 %v4050_v45 }
 0x13e   : > { %4051 = vrsqrt.f32 %v4785_v47  ;;  %vm894_vm14 = vmor %vm892_vm12, %vm893_vm13  ;;  %v901_v17 = vmul.f32 %v4048_v40, %v900_v46  ;;  %vm912_vm3 = vweird.f32 %v4785_v47 }
 0x13f   : > { %v888_v54 = vmul.f32 %v4050_v45, %v887_v49  ;;  %4053 = vrsqrt.f32 %v863_v51  ;;  %v885_v59 = vsel %vm884_vm10, %v4046_v25, %v881_v52 }
 0x140   : > { %v947_v0 = vmul.f32 %v885_v59, %v4595_v6  ;;  %v905_v27 = vsel %vm904_vm2, %v4048_v40, %v901_v17  ;;  %v1408_v17 = vld [vmem:[%s6006_s13 + $0x8] sm:$0xff] }
 0x141   : > { %v889_v56 = vmul.f32 0.5, %v888_v54  ;;  %v949_v30 = vmul.f32 %v905_v27, %v4592_v5 }
 0x142   : > { %v769_v59 = vpop.f32.mrf.mxu1 }
 0x143   : > { %v890_v62 = vsub.f32 1.5, %v889_v56 }
 0x144   : > { %v4052_v63 = vpop.eup %4051 }
 0x145   : > { %v4792_v1 = vpop.permute.xlu0 %957  ;;  %v4054_v4 = vpop.eup %4053  ;;  %v891_v10 = vmul.f32 %v4050_v45, %v890_v62  ;;  %v907_v58 = vmul.f32 %v4052_v63, %v4785_v47  ;;  %vm913_vm4 = vweird.f32 %v4052_v63  ;;  %v1414_v62 = vld [vmem:[%s6006_s13 + $0x38] sm:$0xff] }
 0x146   : > { %v960_v3 = vmul.f32 %v4792_v1, %v946_v60  ;;  %v961_v8 = vmul.f32 %v4792_v1, %v947_v0  ;;  %v917_v38 = vmul.f32 %v4054_v4, %v863_v51  ;;  %v963_v37 = vmul.f32 %v4792_v1, %v949_v30  ;;  %vm914_vm7 = vmor %vm912_vm3, %vm913_vm4  ;;  %1479 = vmatpush.msrb.mxu2 %v1414_v62 }
 0x147   : > { %v895_v19 = vsel %vm894_vm14, %v4050_v45, %v891_v10  ;;  %v908_v20 = vmul.f32 %v4052_v63, %v907_v58  ;;  %vm923_vm6 = vweird.f32 %v4054_v4  ;;  %1753 = vmatpush.msra.mxu0 %v1414_v62  ;;  %v1411_v10 = vld [vmem:[%s6006_s13 + $0x20] sm:$0xff] }
 0x148   : > { %v969_v12 = vadd.f32 %v4795_v34, %v960_v3  ;;  %v970_v6 = vadd.f32 %v4795_v34, %v961_v8  ;;  %v918_v22 = vmul.f32 %v4054_v4, %v917_v38  ;;  %v948_v25 = vmul.f32 %v895_v19, %v4607_v11  ;;  %vm924_vm8 = vmor %vm922_vm5, %vm923_vm6  ;;  %v1412_v3 = vld [vmem:[%s6006_s13 + $0x28] sm:$0xff]  ;;  %v1409_v38 = vld [vmem:[%s6006_s13 + $0x10] sm:$0xff] }
 0x149   : > { %v909_v18 = vmul.f32 0.5, %v908_v20  ;;  %v972_v11 = vadd.f32 %v4795_v34, %v963_v37 }
 0x14a   : > { %v977_v16 = vpack.c.bf16 %v970_v6, %v969_v12  ;;  %v919_v28 = vmul.f32 0.5, %v918_v22  ;;  %v962_v35 = vmul.f32 %v4792_v1, %v948_v25  ;;  %v1407_v22 = vld [vmem:[%s6006_s13] sm:$0xff] }
 0x14b   : > { %v910_v36 = vsub.f32 1.5, %v909_v18 }
 0x14c   : > { %3673 = vmatmul.msk.bf16.vlgmr.msra.gmra.mxu2 %vm741_vm0, %v977_v16  ;;  %3677 = vmatmul.msk.bf16.vlgmr.msra.gmra.mxu3 %vm741_vm0, %v977_v16  ;;  %v920_v39 = vsub.f32 1.5, %v919_v28  ;;  %v971_v41 = vadd.f32 %v4795_v34, %v962_v35 }
 0x14d   : > { %3713 = vmatmul.msk.bf16.vlgmr.msrb.gmra.mxu0 %vm741_vm0, %v977_v16  ;;  %3717 = vmatmul.msk.bf16.vlgmr.msrb.gmra.mxu1 %vm741_vm0, %v977_v16  ;;  %v911_v42 = vmul.f32 %v4052_v63, %v910_v36 }
 0x14e   : > { %v921_v40 = vmul.f32 %v4054_v4, %v920_v39  ;;  %v978_v5 = vpack.c.bf16 %v972_v11, %v971_v41  ;;  %v1300_v41 = vld [vmem:[%s6059_s6] sm:$0x3] }
 0x14f   : > { %v915_v43 = vsel %vm914_vm7, %v4052_v63, %v911_v42  ;;  %v1413_v63 = vld [vmem:[%s6006_s13 + $0x30] sm:$0xff] }
 0x150   : > { %v925_v44 = vsel %vm924_vm8, %v4054_v4, %v921_v40  ;;  %v950_v45 = vmul.f32 %v915_v43, %v4618_v21  ;;  %v846_v21 = vpop.xlane.xlu1 %845  ;;  %1480 = vmatpush.msrb.mxu2 %v1413_v63  ;;  %1754 = vmatpush.msra.mxu0 %v1413_v63 }
 0x151   : > { %v951_v47 = vmul.f32 %v925_v44, %v4598_v7  ;;  %v856_v7 = vmul.f32 %v846_v21, %v4576_v53 }
 0x152   : > { %v964_v48 = vmul.f32 %v4792_v1, %v950_v45  ;;  %1481 = vmatpush.msrb.mxu2 %v1412_v3  ;;  %1755 = vmatpush.msra.mxu0 %v1412_v3 }
 0x153   : > { %v965_v49 = vmul.f32 %v4792_v1, %v951_v47  ;;  %v864_v54 = vadd.f32 1e-06, %v856_v7 }
 0x154   : > { %v973_v50 = vadd.f32 %v4795_v34, %v964_v48  ;;  %1482 = vmatpush.msrb.mxu2 %v1411_v10  ;;  %1756 = vmatpush.msra.mxu0 %v1411_v10 }
 0x155   : > { %v974_v51 = vadd.f32 %v4795_v34, %v965_v49  ;;  %4055 = vrsqrt.f32 %v864_v54  ;;  %vm932_vm9 = vweird.f32 %v864_v54 }
 0x157   : > { %v979_v52 = vpack.c.bf16 %v974_v51, %v973_v50 }
 0x15b   : > { %v4056_v56 = vpop.eup %4055 }
 0x15c   : > { %3674 = vmatmul.msk.bf16.gmra.mxu2 %vm741_vm0, %v978_v5  ;;  %3678 = vmatmul.msk.bf16.gmra.mxu3 %vm741_vm0, %v978_v5  ;;  %v927_v57 = vmul.f32 %v4056_v56, %v864_v54  ;;  %vm933_vm10 = vweird.f32 %v4056_v56 }
 0x15d   : > { %3714 = vmatmul.msk.bf16.gmra.mxu0 %vm741_vm0, %v978_v5  ;;  %3718 = vmatmul.msk.bf16.gmra.mxu1 %vm741_vm0, %v978_v5  ;;  %vm934_vm11 = vmor %vm932_vm9, %vm933_vm10 }
 0x15e   : > { %v928_v60 = vmul.f32 %v4056_v56, %v927_v57 }
 0x160   : > { %v929_v8 = vmul.f32 0.5, %v928_v60 }
 0x162   : > { %v930_v46 = vsub.f32 1.5, %v929_v8 }
 0x164   : > { %v931_v12 = vmul.f32 %v4056_v56, %v930_v46 }
 0x166   : > { %v935_v19 = vsel %vm934_vm11, %v4056_v56, %v931_v12 }
 0x167   : > { %v952_v27 = vmul.f32 %v935_v19, %v4625_v29  ;;  %v1301_v29 = vunpack.c.l.bf16 %v1300_v41 }
 0x169   : > { %v966_v35 = vmul.f32 %v4792_v1, %v952_v27 }
 0x16b   : > { %v975_v37 = vadd.f32 %v4795_v34, %v966_v35 }
 0x16c   : > { %3675 = vmatmul.msk.bf16.gmra.mxu2 %vm741_vm0, %v979_v52  ;;  %3679 = vmatmul.msk.bf16.gmra.mxu3 %vm741_vm0, %v979_v52 }
 0x16d   : > { %3715 = vmatmul.msk.bf16.gmra.mxu0 %vm741_vm0, %v979_v52  ;;  %3719 = vmatmul.msk.bf16.gmra.mxu1 %vm741_vm0, %v979_v52 }
 0x1a3   : > { %v849_v61 = vpop.xlane.xlu2 %848 }
 0x1a4   : > { %v857_v0 = vmul.f32 %v849_v61, %v4576_v53  ;;  %v1410_v53 = vld [vmem:[%s6006_s13 + $0x18] sm:$0xff] }
 0x1a5   : > { %1483 = vmatpush.msrb.mxu2 %v1410_v53  ;;  %1757 = vmatpush.msra.mxu0 %v1410_v53 }
 0x1a6   : > { %v865_v4 = vadd.f32 1e-06, %v857_v0 }
 0x1a7   : > { %1484 = vmatpush.msrb.mxu2 %v1409_v38  ;;  %1758 = vmatpush.msra.mxu0 %v1409_v38 }
 0x1a8   : > { %4057 = vrsqrt.f32 %v865_v4  ;;  %vm942_vm13 = vweird.f32 %v865_v4 }
 0x1a9   : > { %1485 = vmatpush.msrb.mxu2 %v1408_v17  ;;  %1759 = vmatpush.msra.mxu0 %v1408_v17 }
 0x1ab   : > { %1486 = vmatpush.msrb.mxu2 %v1407_v22  ;;  %1760 = vmatpush.msra.mxu0 %v1407_v22 }
 0x1ae   : > { %v4058_v58 = vpop.eup %4057 }
 0x1af   : > { %v937_v6 = vmul.f32 %v4058_v58, %v865_v4  ;;  %vm943_vm12 = vweird.f32 %v4058_v58 }
 0x1b0   : > { %vm944_vm14 = vmor %vm942_vm13, %vm943_vm12 }
 0x1b1   : > { %v938_v16 = vmul.f32 %v4058_v58, %v937_v6 }
 0x1b3   : > { %v939_v20 = vmul.f32 0.5, %v938_v16 }
 0x1b5   : > { %v940_v25 = vsub.f32 1.5, %v939_v20 }
 0x1b7   : > { %v941_v18 = vmul.f32 %v4058_v58, %v940_v25 }
 0x1b9   : > { %v945_v28 = vsel %vm944_vm14, %v4058_v58, %v941_v18 }
 0x1ba   : > { %v953_v30 = vmul.f32 %v945_v28, %v4772_v9  ;;  %v4872_v9 = vld [vmem:[%s6001_s8] sm:$0x3] }
 0x1bb   : > { %v6025_v11 = vunpack.c.l.bf16 %v4872_v9 }
 0x1bc   : > { %v967_v36 = vmul.f32 %v4792_v1, %v953_v30  ;;  %v1303_v1 = vperm.slane %v1301_v29, 0 }
 0x1bd   : > { %v992_v43 = vperm.slane %v6025_v11, 0 }
 0x1be   : > { %v976_v39 = vadd.f32 %v4795_v34, %v967_v36  ;;  %v1304_v34 = vperm.slane %v1301_v29, 2  ;;  %v4875_v40 = vperm.slane %v1303_v1, 0 }
 0x1bf   : > { %v4885_v49 = vperm.slane %v992_v43, 0 }
 0x1c0   : > { %v980_v42 = vpack.c.bf16 %v976_v39, %v975_v37  ;;  %v4877_v5 = vperm.slane %v1304_v34, 0 }
 0x1c2   : > { %3676 = vmatmul.msk.bf16.gmra.mxu2 %vm741_vm0, %v980_v42  ;;  %3680 = vmatmul.msk.bf16.gmra.mxu3 %vm741_vm0, %v980_v42 }
 0x1c3   : > { %3716 = vmatmul.msk.bf16.gmra.mxu0 %vm741_vm0, %v980_v42  ;;  %3720 = vmatmul.msk.bf16.gmra.mxu1 %vm741_vm0, %v980_v42 }
 0x1ca   : > { %v1358_v44 = vpop.f32.mrf.mxu0  ;;  %v1387_v45 = vpop.f32.mrf.mxu1 }
 0x1cb   : > { %v4882_v47 = vadd.f32 %v1358_v44, %v4875_v40  ;;  %v1388_v48 = vadd.f32 %v1387_v45, %v4877_v5 }
 0x1cd   : > { %v1439_v50 = vmul.f32 %v4882_v47, %v4882_v47  ;;  %v2147_v56 = vpack.c.bf16 %v1388_v48, %v1388_v48 }
 0x1cf   : > { %1713 = vrot.lane.b32.xlu1 %v1439_v50, %s6029_s24  ;;  %v1059_v51 = vpop.f32.mrf.mxu2  ;;  %v2323_v0 = vunpack.c.l.b16 %v2147_v56 }
 0x1d0   : > { %v1060_v52 = vadd.f32 %v1059_v51, %v4885_v49 }
 0x1d2   : > { %3721 = vmatmul.msk.f32.vlgmr.msrb.gmra.mxu2 %vm741_vm0, %v1439_v50  ;;  %v1124_v21 = vmul.f32 0.044715, %v1060_v52  ;;  %v1360_v7 = vpop.f32.mrf.mxu0  ;;  %v1389_v54 = vpop.f32.mrf.mxu1  ;;  %v1108_v51 = vmul.f32 0.5, %v1060_v52 }
 0x1d3   : > { %v4893_v57 = vadd.f32 %v1360_v7, %v4875_v40  ;;  %v1390_v59 = vadd.f32 %v1389_v54, %v4877_v5 }
 0x1d4   : > { %v1140_v60 = vmul.f32 %v1124_v21, %v1060_v52 }
 0x1d5   : > { %v2148_v61 = vpack.c.bf16 %v1390_v59, %v1390_v59  ;;  %v1440_v62 = vmul.f32 %v4893_v57, %v4893_v57 }
 0x1d6   : > { %v1156_v63 = vmul.f32 %v1140_v60, %v1060_v52 }
 0x1d7   : > { %v2324_v3 = vunpack.c.l.b16 %v2148_v61  ;;  %1715 = vrot.lane.b32.xlu2 %v1440_v62, %s6029_s24  ;;  %v1061_v4 = vpop.f32.mrf.mxu2 }
 0x1d8   : > { %v1062_v8 = vadd.f32 %v1061_v4, %v4885_v49  ;;  %v1172_v10 = vadd.f32 %v1156_v63, %v1060_v52 }
 0x1d9   : > { %v4901_v46 = vpack.c.b16 %v2324_v3, %v2323_v0 }
 0x1da   : > { %3722 = vmatmul.msk.f32.gmra.mxu2 %vm741_vm0, %v1440_v62  ;;  %v1363_v53 = vpop.f32.mrf.mxu0  ;;  %v1126_v58 = vmul.f32 0.044715, %v1062_v8  ;;  %v1188_v38 = vmul.f32 0.7978846, %v1172_v10  ;;  %v1110_v45 = vmul.f32 0.5, %v1062_v8 }
 0x1db   : > { %v4904_v12 = vadd.f32 %v1363_v53, %v4875_v40 }
 0x1dc   : > { %v1142_v6 = vmul.f32 %v1126_v58, %v1062_v8  ;;  %4059 = vtanh.f32 %v1188_v38 }
 0x1dd   : > { %v1441_v16 = vmul.f32 %v4904_v12, %v4904_v12 }
 0x1de   : > { %v1158_v17 = vmul.f32 %v1142_v6, %v1062_v8 }
 0x1df   : > { %v1064_v19 = vpop.f32.mrf.mxu2  ;;  %1717 = vrot.lane.b32.xlu0 %v1441_v16, %s6029_s24 }
 0x1e0   : > { %v1065_v20 = vadd.f32 %v1064_v19, %v4885_v49  ;;  %v1174_v22 = vadd.f32 %v1158_v17, %v1062_v8 }
 0x1e2   : > { %3723 = vmatmul.msk.f32.gmra.mxu2 %vm741_vm0, %v1441_v16  ;;  %v1128_v25 = vmul.f32 0.044715, %v1065_v20  ;;  %v1365_v27 = vpop.f32.mrf.mxu0  ;;  %v1190_v18 = vmul.f32 0.7978846, %v1174_v22  ;;  %v4060_v39 = vpop.eup %4059 }
 0x1e3   : > { %v4912_v28 = vadd.f32 %v1365_v27, %v4875_v40  ;;  %v1220_v43 = vadd.f32 1.0, %v4060_v39  ;;  %v1112_v27 = vmul.f32 0.5, %v1065_v20 }
 0x1e4   : > { %v1144_v30 = vmul.f32 %v1128_v25, %v1065_v20  ;;  %4061 = vtanh.f32 %v1190_v18 }
 0x1e5   : > { %v1442_v35 = vmul.f32 %v4912_v28, %v4912_v28  ;;  %v4926_v60 = vmul.f32 %v1220_v43, %v1108_v51 }
 0x1e6   : > { %v1160_v37 = vmul.f32 %v1144_v30, %v1065_v20 }
 0x1e7   : > { %v1066_v36 = vpop.f32.mrf.mxu2  ;;  %1719 = vrot.lane.b32.xlu0 %v1442_v35, %s6029_s24 }
 0x1e8   : > { %v1067_v41 = vadd.f32 %v1066_v36, %v4885_v49  ;;  %v1176_v42 = vadd.f32 %v1160_v37, %v1065_v20 }
 0x1ea   : > { %3724 = vmatmul.msk.f32.gmra.mxu2 %vm741_vm0, %v1442_v35  ;;  %v1130_v29 = vmul.f32 0.044715, %v1067_v41  ;;  %v1368_v1 = vpop.f32.mrf.mxu0  ;;  %v4062_v34 = vpop.eup %4061  ;;  %v1192_v7 = vmul.f32 0.7978846, %v1176_v42  ;;  %v1114_v18 = vmul.f32 0.5, %v1067_v41 }
 0x1eb   : > { %v4920_v44 = vadd.f32 %v1368_v1, %v4875_v40  ;;  %v1222_v50 = vadd.f32 1.0, %v4062_v34 }
 0x1ec   : > { %v1146_v48 = vmul.f32 %v1130_v29, %v1067_v41  ;;  %4063 = vtanh.f32 %v1192_v7  ;;  %v1392_v7 = vpop.f32.mrf.mxu1 }
 0x1ed   : > { %v1443_v21 = vmul.f32 %v4920_v44, %v4920_v44  ;;  %v4924_v54 = vmul.f32 %v1222_v50, %v1110_v45 }
 0x1ee   : > { %v1162_v56 = vmul.f32 %v1146_v48, %v1067_v41 }
 0x1ef   : > { %v1069_v59 = vpop.f32.mrf.mxu2  ;;  %1721 = vrot.lane.b32.xlu0 %v1443_v21, %s6029_s24 }
 0x1f0   : > { %v1070_v61 = vadd.f32 %v1069_v59, %v4885_v49  ;;  %v1178_v52 = vadd.f32 %v1162_v56, %v1067_v41  ;;  %v1422_v59 = vld [vmem:[%s6007_s14 + $0x38] sm:$0xff] }
 0x1f1   : > { %1632 = vmatpush.msrb.mxu3 %v1422_v59  ;;  %1954 = vmatpush.msra.mxu1 %v1422_v59 }
 0x1f2   : > { %3725 = vmatmul.msk.f32.gmra.mxu2 %vm741_vm0, %v1443_v21  ;;  %v1132_v63 = vmul.f32 0.044715, %v1070_v61  ;;  %v1370_v0 = vpop.f32.mrf.mxu0  ;;  %v1194_v4 = vmul.f32 0.7978846, %v1178_v52  ;;  %v4064_v58 = vpop.eup %4063  ;;  %v1116_v48 = vmul.f32 0.5, %v1070_v61  ;;  %v1420_v52 = vld [vmem:[%s6007_s14 + $0x28] sm:$0xff] }
 0x1f3   : > { %v4934_v3 = vadd.f32 %v1370_v0, %v4875_v40  ;;  %v1224_v19 = vadd.f32 1.0, %v4064_v58  ;;  %v1418_v0 = vld [vmem:[%s6007_s14 + $0x18] sm:$0xff] }
 0x1f4   : > { %v1148_v8 = vmul.f32 %v1132_v63, %v1070_v61  ;;  %4065 = vtanh.f32 %v1194_v4  ;;  %v1394_v56 = vpop.f32.mrf.mxu1  ;;  %v1419_v63 = vld [vmem:[%s6007_s14 + $0x20] sm:$0xff] }
 0x1f5   : > { %v1444_v10 = vmul.f32 %v4934_v3, %v4934_v3  ;;  %v4941_v36 = vmul.f32 %v1224_v19, %v1112_v27 }
 0x1f6   : > { %v1164_v53 = vmul.f32 %v1148_v8, %v1070_v61  ;;  %v1417_v8 = vld [vmem:[%s6007_s14 + $0x10] sm:$0xff] }
 0x1f7   : > { %1723 = vrot.lane.b32.xlu2 %v1444_v10, %s6029_s24  ;;  %v1071_v6 = vpop.f32.mrf.mxu2 }
 0x1f8   : > { %v1072_v38 = vadd.f32 %v1071_v6, %v4885_v49  ;;  %v1180_v16 = vadd.f32 %v1164_v53, %v1070_v61  ;;  %v1421_v61 = vld [vmem:[%s6007_s14 + $0x30] sm:$0xff]  ;;  %v1415_v53 = vld [vmem:[%s6007_s14] sm:$0xff] }
 0x1f9   : > { %1633 = vmatpush.msrb.mxu3 %v1421_v61  ;;  %1955 = vmatpush.msra.mxu1 %v1421_v61 }
 0x1fa   : > { %3726 = vmatmul.msk.f32.gmra.mxu2 %vm741_vm0, %v1444_v10  ;;  %v1134_v17 = vmul.f32 0.044715, %v1072_v38  ;;  %v4066_v22 = vpop.eup %4065  ;;  %v1196_v35 = vmul.f32 0.7978846, %v1180_v16  ;;  %v1118_v20 = vmul.f32 0.5, %v1072_v38  ;;  %v1416_v10 = vld [vmem:[%s6007_s14 + $0x8] sm:$0xff] }
 0x1fb   : > { %v1226_v30 = vadd.f32 1.0, %v4066_v22  ;;  %1634 = vmatpush.msrb.mxu3 %v1420_v52  ;;  %1956 = vmatpush.msra.mxu1 %v1420_v52 }
 0x1fc   : > { %v1150_v25 = vmul.f32 %v1134_v17, %v1072_v38  ;;  %4067 = vtanh.f32 %v1196_v35  ;;  %v1397_v4 = vpop.f32.mrf.mxu1 }
 0x1fd   : > { %v4943_v37 = vmul.f32 %v1226_v30, %v1114_v18  ;;  %1635 = vmatpush.msrb.mxu3 %v1419_v63  ;;  %1957 = vmatpush.msra.mxu1 %v1419_v63  ;;  %v1393_v63 = vadd.f32 %v1392_v7, %v4877_v5 }
 0x1fe   : > { %v1166_v39 = vmul.f32 %v1150_v25, %v1072_v38 }
 0x1ff   : > { %1636 = vmatpush.msrb.mxu3 %v1418_v0  ;;  %1958 = vmatpush.msra.mxu1 %v1418_v0 }
 0x200   : > { %v1182_v29 = vadd.f32 %v1166_v39, %v1072_v38 }
 0x201   : > { %1637 = vmatpush.msrb.mxu3 %v1417_v8  ;;  %1959 = vmatpush.msra.mxu1 %v1417_v8 }
 0x202   : > { %v1198_v1 = vmul.f32 0.7978846, %v1182_v29  ;;  %v4068_v34 = vpop.eup %4067  ;;  %v1398_v29 = vadd.f32 %v1397_v4, %v4877_v5 }
 0x203   : > { %v1228_v43 = vadd.f32 1.0, %v4068_v34  ;;  %1638 = vmatpush.msrb.mxu3 %v1416_v10  ;;  %1960 = vmatpush.msra.mxu1 %v1416_v10 }
 0x204   : > { %4069 = vtanh.f32 %v1198_v1  ;;  %v1399_v58 = vpop.f32.mrf.mxu1 }
 0x205   : > { %v4947_v50 = vmul.f32 %v1228_v43, %v1116_v48  ;;  %1639 = vmatpush.msrb.mxu3 %v1415_v53  ;;  %1961 = vmatpush.msra.mxu1 %v1415_v53  ;;  %v1400_v18 = vadd.f32 %v1399_v58, %v4877_v5  ;;  %v1395_v48 = vadd.f32 %v1394_v56, %v4877_v5 }
 0x207   : > { %v2150_v10 = vpack.c.bf16 %v1395_v48, %v1395_v48 }
 0x209   : > { %v2326_v7 = vunpack.c.l.b16 %v2150_v10 }
 0x20a   : > { %v4070_v45 = vpop.eup %4069 }
 0x20b   : > { %v1230_v41 = vadd.f32 1.0, %v4070_v45 }
 0x20d   : > { %v4949_v51 = vmul.f32 %v1230_v41, %v1118_v20  ;;  %v2152_v20 = vpack.c.bf16 %v1400_v18, %v1400_v18 }
 0x20f   : > { %v2328_v53 = vunpack.c.l.b16 %v2152_v20 }
 0x231   : > { %v1716_v41 = vpop.permute.xlu2 %1715 }
 0x240   : > { %v1373_v6 = vpop.f32.mrf.mxu0  ;;  %v1402_v38 = vpop.f32.mrf.mxu1 }
 0x241   : > { %v4978_v16 = vadd.f32 %v1373_v6, %v4875_v40  ;;  %v1714_v17 = vpop.permute.xlu1 %1713  ;;  %v1403_v22 = vadd.f32 %v1402_v38, %v4877_v5 }
 0x242   : > { %3737 = vmatmul.msk.f32.vlgmr.msra.gmra.mxu0 %vm741_vm0, %v1714_v17  ;;  %v2149_v17 = vpack.c.bf16 %v1393_v63, %v1393_v63 }
 0x243   : > { %v1445_v19 = vmul.f32 %v4978_v16, %v4978_v16  ;;  %v2153_v1 = vpack.c.bf16 %v1403_v22, %v1403_v22 }
 0x245   : > { %1725 = vrot.lane.b32.xlu1 %v1445_v19, %s6029_s24  ;;  %3727 = vmatmul.msk.f32.gmra.mxu2 %vm741_vm0, %v1445_v19  ;;  %v1074_v25 = vpop.f32.mrf.mxu2  ;;  %v2329_v0 = vunpack.c.l.b16 %v2153_v1 }
 0x246   : > { %v4987_v27 = vadd.f32 %v1074_v25, %v4885_v49 }
 0x248   : > { %v1136_v30 = vmul.f32 0.044715, %v4987_v27  ;;  %v1375_v35 = vpop.f32.mrf.mxu0  ;;  %v1404_v39 = vpop.f32.mrf.mxu1 }
 0x249   : > { %v4993_v34 = vadd.f32 %v1375_v35, %v4875_v40  ;;  %v1405_v43 = vadd.f32 %v1404_v39, %v4877_v5  ;;  %v2151_v40 = vpack.c.bf16 %v1398_v29, %v1398_v29  ;;  %v2325_v35 = vunpack.c.l.b16 %v2149_v17 }
 0x24a   : > { %v1152_v45 = vmul.f32 %v1136_v30, %v4987_v27  ;;  %3738 = vmatmul.msk.f32.gmra.mxu0 %vm741_vm0, %v1716_v41 }
 0x24b   : > { %v2154_v59 = vpack.c.bf16 %v1405_v43, %v1405_v43  ;;  %v1446_v61 = vmul.f32 %v4993_v34, %v4993_v34  ;;  %v2327_v19 = vunpack.c.l.b16 %v2151_v40  ;;  %v5014_v1 = vpack.c.b16 %v2326_v7, %v2325_v35 }
 0x24c   : > { %v1168_v52 = vmul.f32 %v1152_v45, %v4987_v27 }
 0x24d   : > { %v2330_v4 = vunpack.c.l.b16 %v2154_v59  ;;  %1727 = vrot.lane.b32.xlu0 %v1446_v61, %s6029_s24  ;;  %3728 = vmatmul.msk.f32.gmra.mxu2 %vm741_vm0, %v1446_v61  ;;  %v1076_v56 = vpop.f32.mrf.mxu2  ;;  %v5010_v22 = vpack.c.b16 %v2328_v53, %v2327_v19 }
 0x24e   : > { %v1077_v8 = vadd.f32 %v1076_v56, %v4885_v49  ;;  %v1184_v6 = vadd.f32 %v1168_v52, %v4987_v27 }
 0x24f   : > { %v5006_v58 = vpack.c.b16 %v2330_v4, %v2329_v0  ;;  %v1120_v0 = vmul.f32 0.5, %v4987_v27 }
 0x250   : > { %v1138_v38 = vmul.f32 0.044715, %v1077_v8  ;;  %v1200_v25 = vmul.f32 0.7978846, %v1184_v6  ;;  %v1122_v4 = vmul.f32 0.5, %v1077_v8 }
 0x251   : > { %2355 = vmatpush.bf16.msra.mxu3 %v5006_v58  ;;  %v1718_v18 = vpop.permute.xlu0 %1717 }
 0x252   : > { %v1154_v5 = vmul.f32 %v1138_v38, %v1077_v8  ;;  %3739 = vmatmul.msk.f32.gmra.mxu0 %vm741_vm0, %v1718_v18  ;;  %4071 = vtanh.f32 %v1200_v25 }
 0x254   : > { %v1170_v30 = vmul.f32 %v1154_v5, %v1077_v8 }
 0x255   : > { %2356 = vmatpush.bf16.msra.mxu3 %v5010_v22  ;;  %v1488_v49 = vpop.f32.mrf.mxu2 }
 0x256   : > { %v1489_v39 = vadd.f32 1e-06, %v1488_v49  ;;  %v1186_v29 = vadd.f32 %v1170_v30, %v1077_v8 }
 0x258   : > { %4073 = vrsqrt.f32 %v1489_v39  ;;  %v1202_v43 = vmul.f32 0.7978846, %v1186_v29  ;;  %v4072_v48 = vpop.eup %4071  ;;  %vm1518_vm1 = vweird.f32 %v1489_v39  ;;  %v1724_v29 = vpop.permute.xlu2 %1723 }
 0x259   : > { %2357 = vmatpush.bf16.msra.mxu3 %v5014_v1  ;;  %v1720_v45 = vpop.permute.xlu0 %1719  ;;  %v1232_v52 = vadd.f32 1.0, %v4072_v48 }
 0x25a   : > { %4075 = vtanh.f32 %v1202_v43  ;;  %3740 = vmatmul.msk.f32.gmra.mxu0 %vm741_vm0, %v1720_v45 }
 0x25b   : > { %v5020_v6 = vmul.f32 %v1232_v52, %v1120_v0 }
 0x25d   : > { %2358 = vmatpush.bf16.msra.mxu3 %v4901_v46  ;;  %v1491_v20 = vpop.f32.mrf.mxu2 }
 0x25e   : > { %v4074_v41 = vpop.eup %4073  ;;  %v1492_v59 = vadd.f32 1e-06, %v1491_v20 }
 0x25f   : > { %v1513_v61 = vmul.f32 %v4074_v41, %v1489_v39  ;;  %vm1519_vm15 = vweird.f32 %v4074_v41 }
 0x260   : > { %4077 = vrsqrt.f32 %v1492_v59  ;;  %v4076_v63 = vpop.eup %4075  ;;  %vm1520_vm2 = vmor %vm1518_vm1, %vm1519_vm15  ;;  %vm1528_vm4 = vweird.f32 %v1492_v59 }
 0x261   : > { %v1514_v40 = vmul.f32 %v4074_v41, %v1513_v61  ;;  %v1234_v56 = vadd.f32 1.0, %v4076_v63  ;;  %v1722_v53 = vpop.permute.xlu0 %1721 }
 0x262   : > { %3741 = vmatmul.msk.f32.gmra.mxu0 %vm741_vm0, %v1722_v53 }
 0x263   : > { %v1515_v10 = vmul.f32 0.5, %v1514_v40  ;;  %v5022_v38 = vmul.f32 %v1234_v56, %v1122_v4 }
 0x265   : > { %v1516_v17 = vsub.f32 1.5, %v1515_v10  ;;  %v1494_v19 = vpop.f32.mrf.mxu2 }
 0x266   : > { %v4078_v5 = vpop.eup %4077  ;;  %v1495_v7 = vadd.f32 1e-06, %v1494_v19 }
 0x267   : > { %v1517_v18 = vmul.f32 %v4074_v41, %v1516_v17  ;;  %v1523_v27 = vmul.f32 %v4078_v5, %v1492_v59  ;;  %vm1529_vm3 = vweird.f32 %v4078_v5 }
 0x268   : > { %4079 = vrsqrt.f32 %v1495_v7  ;;  %vm1530_vm5 = vmor %vm1528_vm4, %vm1529_vm3  ;;  %vm1538_vm7 = vweird.f32 %v1495_v7 }
 0x269   : > { %v1521_v8 = vsel %vm1520_vm2, %v4074_v41, %v1517_v18  ;;  %v1524_v30 = vmul.f32 %v4078_v5, %v1523_v27 }
 0x26a   : > { %v5028_v35 = vmul.f32 %v1521_v8, %v4882_v47  ;;  %3742 = vmatmul.msk.f32.gmra.mxu0 %vm741_vm0, %v1724_v29 }
 0x26b   : > { %v1525_v49 = vmul.f32 0.5, %v1524_v30 }
 0x26c   : > { %3729 = vmatmul.msk.f32.vlgmr.msrb.gmra.mxu3 %vm741_vm0, %v5028_v35 }
 0x26d   : > { %v1526_v43 = vsub.f32 1.5, %v1525_v49  ;;  %v1497_v45 = vpop.f32.mrf.mxu2 }
 0x26e   : > { %v4080_v48 = vpop.eup %4079  ;;  %v1498_v39 = vadd.f32 1e-06, %v1497_v45 }
 0x26f   : > { %v1533_v20 = vmul.f32 %v4080_v48, %v1495_v7  ;;  %v1527_v61 = vmul.f32 %v4078_v5, %v1526_v43  ;;  %vm1539_vm6 = vweird.f32 %v4080_v48 }
 0x270   : > { %4081 = vrsqrt.f32 %v1498_v39  ;;  %vm1540_vm8 = vmor %vm1538_vm7, %vm1539_vm6  ;;  %vm1548_vm10 = vweird.f32 %v1498_v39 }
 0x271   : > { %v1534_v41 = vmul.f32 %v4080_v48, %v1533_v20  ;;  %v1531_v52 = vsel %vm1530_vm5, %v4078_v5, %v1527_v61 }
 0x272   : > { %v5034_v63 = vmul.f32 %v1531_v52, %v4893_v57 }
 0x273   : > { %v1535_v40 = vmul.f32 0.5, %v1534_v41 }
 0x274   : > { %3730 = vmatmul.msk.f32.gmra.mxu3 %vm741_vm0, %v5034_v63 }
 0x275   : > { %v1536_v0 = vsub.f32 1.5, %v1535_v40  ;;  %v1500_v4 = vpop.f32.mrf.mxu2 }
 0x276   : > { %v4082_v56 = vpop.eup %4081  ;;  %v1501_v10 = vadd.f32 1e-06, %v1500_v4 }
 0x277   : > { %v1543_v59 = vmul.f32 %v4082_v56, %v1498_v39  ;;  %v1537_v53 = vmul.f32 %v4080_v48, %v1536_v0  ;;  %vm1549_vm9 = vweird.f32 %v4082_v56 }
 0x278   : > { %4083 = vrsqrt.f32 %v1501_v10  ;;  %vm1550_vm11 = vmor %vm1548_vm10, %vm1549_vm9  ;;  %vm1558_vm13 = vweird.f32 %v1501_v10 }
 0x279   : > { %v1544_v17 = vmul.f32 %v4082_v56, %v1543_v59  ;;  %v1541_v19 = vsel %vm1540_vm8, %v4080_v48, %v1537_v53 }
 0x27a   : > { %v5039_v5 = vmul.f32 %v1541_v19, %v4904_v12  ;;  %v5058_v19 = vpop.f32.mrf.mxu3 }
 0x27b   : > { %v1545_v18 = vmul.f32 0.5, %v1544_v17 }
 0x27c   : > { %3731 = vmatmul.msk.f32.gmra.mxu3 %vm741_vm0, %v5039_v5 }
 0x27d   : > { %v1546_v27 = vsub.f32 1.5, %v1545_v18  ;;  %v1503_v8 = vpop.f32.mrf.mxu2 }
 0x27e   : > { %v4084_v30 = vpop.eup %4083  ;;  %v1504_v49 = vadd.f32 1e-06, %v1503_v8 }
 0x27f   : > { %v1553_v7 = vmul.f32 %v4084_v30, %v1501_v10  ;;  %v1547_v29 = vmul.f32 %v4082_v56, %v1546_v27  ;;  %vm1559_vm12 = vweird.f32 %v4084_v30 }
 0x280   : > { %4085 = vrsqrt.f32 %v1504_v49  ;;  %vm1560_vm14 = vmor %vm1558_vm13, %vm1559_vm12  ;;  %vm1568_vm1 = vweird.f32 %v1504_v49 }
 0x281   : > { %v1554_v43 = vmul.f32 %v4084_v30, %v1553_v7  ;;  %v1551_v45 = vsel %vm1550_vm11, %v4082_v56, %v1547_v29 }
 0x282   : > { %v5044_v48 = vmul.f32 %v1551_v45, %v4912_v28  ;;  %v5060_v18 = vpop.f32.mrf.mxu3 }
 0x283   : > { %v1555_v20 = vmul.f32 0.5, %v1554_v43 }
 0x284   : > { %3732 = vmatmul.msk.f32.gmra.mxu3 %vm741_vm0, %v5044_v48 }
 0x285   : > { %v1556_v61 = vsub.f32 1.5, %v1555_v20 }
 0x286   : > { %v4086_v41 = vpop.eup %4085 }
 0x287   : > { %v1563_v52 = vmul.f32 %v4086_v41, %v1504_v49  ;;  %v1557_v40 = vmul.f32 %v4084_v30, %v1556_v61  ;;  %vm1569_vm15 = vweird.f32 %v4086_v41 }
 0x288   : > { %vm1570_vm2 = vmor %vm1568_vm1, %vm1569_vm15 }
 0x289   : > { %v1564_v39 = vmul.f32 %v4086_v41, %v1563_v52  ;;  %v1561_v0 = vsel %vm1560_vm14, %v4084_v30, %v1557_v40 }
 0x28a   : > { %v5049_v4 = vmul.f32 %v1561_v0, %v4920_v44  ;;  %v5062_v27 = vpop.f32.mrf.mxu3 }
 0x28b   : > { %v1565_v56 = vmul.f32 0.5, %v1564_v39 }
 0x28c   : > { %3733 = vmatmul.msk.f32.gmra.mxu3 %vm741_vm0, %v5049_v4 }
 0x28d   : > { %v1566_v59 = vsub.f32 1.5, %v1565_v56 }
 0x28f   : > { %v1567_v53 = vmul.f32 %v4086_v41, %v1566_v59 }
 0x291   : > { %v1571_v17 = vsel %vm1570_vm2, %v4086_v41, %v1567_v53 }
 0x292   : > { %v5054_v10 = vmul.f32 %v1571_v17, %v4934_v3  ;;  %v5066_v49 = vpop.f32.mrf.mxu3 }
 0x294   : > { %3734 = vmatmul.msk.f32.gmra.mxu3 %vm741_vm0, %v5054_v10 }
 0x29a   : > { %v5068_v52 = vpop.f32.mrf.mxu3 }
 0x2a2   : > { %v5070_v21 = vpop.f32.mrf.mxu3 }
 0x2b7   : > { %v1726_v8 = vpop.permute.xlu1 %1725 }
 0x2b8   : > { %3743 = vmatmul.msk.f32.gmra.mxu0 %vm741_vm0, %v1726_v8 }
 0x2bf   : > { %v1728_v30 = vpop.permute.xlu0 %1727  ;;  %v1762_v7 = vpop.f32.mrf.mxu0 }
 0x2c0   : > { %3744 = vmatmul.msk.f32.gmra.mxu0 %vm741_vm0, %v1728_v30  ;;  %v1763_v29 = vadd.f32 1e-06, %v1762_v7 }
 0x2c2   : > { %4087 = vrsqrt.f32 %v1763_v29  ;;  %vm1792_vm4 = vweird.f32 %v1763_v29 }
 0x2c7   : > { %v1765_v45 = vpop.f32.mrf.mxu0 }
 0x2c8   : > { %v1506_v43 = vpop.f32.mrf.mxu2  ;;  %v4088_v61 = vpop.eup %4087  ;;  %v1766_v41 = vadd.f32 1e-06, %v1765_v45 }
 0x2c9   : > { %v1507_v20 = vadd.f32 1e-06, %v1506_v43  ;;  %v1787_v40 = vmul.f32 %v4088_v61, %v1763_v29  ;;  %vm1793_vm3 = vweird.f32 %v4088_v61 }
 0x2ca   : > { %vm1794_vm5 = vmor %vm1792_vm4, %vm1793_vm3  ;;  %vm1802_vm10 = vweird.f32 %v1766_v41 }
 0x2cb   : > { %4089 = vrsqrt.f32 %v1507_v20  ;;  %v1788_v39 = vmul.f32 %v4088_v61, %v1787_v40  ;;  %vm1578_vm8 = vweird.f32 %v1507_v20 }
 0x2cc   : > { %4091 = vrsqrt.f32 %v1766_v41 }
 0x2cd   : > { %v1789_v0 = vmul.f32 0.5, %v1788_v39 }
 0x2cf   : > { %v1790_v53 = vsub.f32 1.5, %v1789_v0  ;;  %v1768_v7 = vpop.f32.mrf.mxu0 }
 0x2d0   : > { %v1509_v56 = vpop.f32.mrf.mxu2  ;;  %v1769_v25 = vadd.f32 1e-06, %v1768_v7 }
 0x2d1   : > { %v4090_v59 = vpop.eup %4089  ;;  %v1510_v17 = vadd.f32 1e-06, %v1509_v56  ;;  %v1791_v45 = vmul.f32 %v4088_v61, %v1790_v53 }
 0x2d2   : > { %v4092_v8 = vpop.eup %4091  ;;  %v1573_v30 = vmul.f32 %v4090_v59, %v1507_v20  ;;  %vm1579_vm6 = vweird.f32 %v4090_v59  ;;  %vm1812_vm1 = vweird.f32 %v1769_v25 }
 0x2d3   : > { %v1797_v32 = vmul.f32 %v4092_v8, %v1766_v41  ;;  %4093 = vrsqrt.f32 %v1510_v17  ;;  %v1795_v39 = vsel %vm1794_vm5, %v4088_v61, %v1791_v45  ;;  %vm1803_vm7 = vweird.f32 %v4092_v8  ;;  %vm1580_vm9 = vmor %vm1578_vm8, %vm1579_vm6  ;;  %v5073_v45 = vpop.f32.mrf.mxu3 }
 0x2d4   : > { %v1574_v43 = vmul.f32 %v4090_v59, %v1573_v30  ;;  %4095 = vrsqrt.f32 %v1769_v25  ;;  %1874 = vrot.lane.b32.xlu2 %v1795_v39, %s6029_s24  ;;  %vm1804_vm11 = vmor %vm1802_vm10, %vm1803_vm7  ;;  %vm1588_vm13 = vweird.f32 %v1510_v17 }
 0x2d5   : > { %v1798_v42 = vmul.f32 %v4092_v8, %v1797_v32 }
 0x2d6   : > { %v1575_v40 = vmul.f32 0.5, %v1574_v43 }
 0x2d7   : > { %v1799_v0 = vmul.f32 0.5, %v1798_v42  ;;  %v1771_v30 = vpop.f32.mrf.mxu0 }
 0x2d8   : > { %v1576_v56 = vsub.f32 1.5, %v1575_v40  ;;  %v1772_v2 = vadd.f32 1e-06, %v1771_v30 }
 0x2d9   : > { %v4094_v62 = vpop.eup %4093  ;;  %v1800_v11 = vsub.f32 1.5, %v1799_v0 }
 0x2da   : > { %v1583_v7 = vmul.f32 %v4094_v62, %v1510_v17  ;;  %v1577_v53 = vmul.f32 %v4090_v59, %v1576_v56  ;;  %v4096_v29 = vpop.eup %4095  ;;  %4097 = vrsqrt.f32 %v1772_v2  ;;  %vm1589_vm12 = vweird.f32 %v4094_v62 }
 0x2db   : > { %v1801_v32 = vmul.f32 %v4092_v8, %v1800_v11  ;;  %v1807_v33 = vmul.f32 %v4096_v29, %v1769_v25  ;;  %vm1813_vm14 = vweird.f32 %v4096_v29  ;;  %vm1590_vm15 = vmor %vm1588_vm13, %vm1589_vm12  ;;  %vm1822_vm4 = vweird.f32 %v1772_v2 }
 0x2dc   : > { %v1584_v43 = vmul.f32 %v4094_v62, %v1583_v7  ;;  %v1581_v61 = vsel %vm1580_vm9, %v4090_v59, %v1577_v53  ;;  %vm1814_vm2 = vmor %vm1812_vm1, %vm1813_vm14 }
 0x2dd   : > { %v1805_v42 = vsel %vm1804_vm11, %v4092_v8, %v1801_v32  ;;  %v5076_v40 = vmul.f32 %v1581_v61, %v4978_v16  ;;  %v1808_v20 = vmul.f32 %v4096_v29, %v1807_v33 }
 0x2de   : > { %v1585_v39 = vmul.f32 0.5, %v1584_v43  ;;  %1876 = vrot.lane.b32.xlu1 %v1805_v42, %s6029_s24  ;;  %v5084_v42 = vpop.f32.mrf.mxu3 }
 0x2df   : > { %3735 = vmatmul.msk.f32.gmra.mxu3 %vm741_vm0, %v5076_v40  ;;  %v1809_v11 = vmul.f32 0.5, %v1808_v20  ;;  %v1774_v59 = vpop.f32.mrf.mxu0 }
 0x2e0   : > { %v1586_v41 = vsub.f32 1.5, %v1585_v39  ;;  %v4098_v7 = vpop.eup %4097  ;;  %v1775_v8 = vadd.f32 1e-06, %v1774_v59  ;;  %v1431_v59 = vld [vmem:[%s6003_s10] sm:$0xff] }
 0x2e1   : > { %v1810_v0 = vsub.f32 1.5, %v1809_v11  ;;  %v1817_v30 = vmul.f32 %v4098_v7, %v1772_v2  ;;  %vm1823_vm3 = vweird.f32 %v4098_v7 }
 0x2e2   : > { %v1587_v56 = vmul.f32 %v4094_v62, %v1586_v41  ;;  %4099 = vrsqrt.f32 %v1775_v8  ;;  %vm1824_vm5 = vmor %vm1822_vm4, %vm1823_vm3  ;;  %vm1832_vm7 = vweird.f32 %v1775_v8  ;;  %vm2181_vm3 = vcmask 130048  }
 0x2e3   : > { %v1811_v53 = vmul.f32 %v4096_v29, %v1810_v0  ;;  %v1818_v43 = vmul.f32 %v4098_v7, %v1817_v30  ;;  %vm2388_vm4 = vcmask 125952  }
 0x2e4   : > { %v1591_v33 = vsel %vm1590_vm15, %v4094_v62, %v1587_v56 }
 0x2e5   : > { %v5082_v32 = vmul.f32 %v1591_v33, %v4993_v34  ;;  %v1815_v61 = vsel %vm1814_vm2, %v4096_v29, %v1811_v53  ;;  %v1819_v17 = vmul.f32 0.5, %v1818_v43  ;;  %v1423_v53 = vld [vmem:[%s6002_s9] sm:$0xff] }
 0x2e6   : > { %1878 = vrot.lane.b32.xlu0 %v1815_v61, %s6029_s24 }
 0x2e7   : > { %3736 = vmatmul.msk.f32.gmra.mxu3 %vm741_vm0, %v5082_v32  ;;  %v1777_v20 = vpop.f32.mrf.mxu0  ;;  %v1820_v39 = vsub.f32 1.5, %v1819_v17  ;;  %v1665_v17 = vmul.f32 %v5028_v35, %v1423_v53 }
 0x2e8   : > { %v4100_v25 = vpop.eup %4099  ;;  %v1778_v62 = vadd.f32 1e-06, %v1777_v20  ;;  %v1424_v20 = vld [vmem:[%s6002_s9 + $0x8] sm:$0xff] }
 0x2e9   : > { %v1827_v11 = vmul.f32 %v4100_v25, %v1775_v8  ;;  %v1821_v41 = vmul.f32 %v4098_v7, %v1820_v39  ;;  %vm1833_vm6 = vweird.f32 %v4100_v25  ;;  %v1432_v39 = vld [vmem:[%s6003_s10 + $0x8] sm:$0xff]  ;;  %v1666_v35 = vmul.f32 %v5034_v63, %v1424_v20 }
 0x2ea   : > { %4101 = vrsqrt.f32 %v1778_v62  ;;  %vm1834_vm8 = vmor %vm1832_vm7, %vm1833_vm6  ;;  %vm1842_vm10 = vweird.f32 %v1778_v62  ;;  %vm2886_vm6 = vcmask 388352   ;;  %vm3135_vm7 = vcmask 519552  }
 0x2eb   : > { %v1828_v0 = vmul.f32 %v4100_v25, %v1827_v11  ;;  %v1825_v29 = vsel %vm1824_vm5, %v4098_v7, %v1821_v41  ;;  %vm2637_vm5 = vcmask 257152  }
 0x2ec   : > { %1880 = vrot.lane.b32.xlu2 %v1825_v29, %s6029_s24 }
 0x2ed   : > { %v1829_v30 = vmul.f32 0.5, %v1828_v0 }
 0x2ef   : > { %v1641_v56 = vpop.f32.mrf.mxu3  ;;  %v1830_v33 = vsub.f32 1.5, %v1829_v30 }
 0x2f0   : > { %v1673_v43 = vmul.f32 %v1641_v56, %v1431_v59  ;;  %v4102_v2 = vpop.eup %4101 }
 0x2f1   : > { %v1837_v61 = vmul.f32 %v4102_v2, %v1778_v62  ;;  %v1831_v7 = vmul.f32 %v4100_v25, %v1830_v33  ;;  %vm1843_vm9 = vweird.f32 %v4102_v2 }
 0x2f2   : > { %v1681_v41 = vadd.f32 %v1673_v43, %v1665_v17  ;;  %vm1844_vm11 = vmor %vm1842_vm10, %vm1843_vm9  ;;  %v1425_v43 = vld [vmem:[%s6002_s9 + $0x10] sm:$0xff] }
 0x2f3   : > { %v1838_v11 = vmul.f32 %v4102_v2, %v1837_v61  ;;  %v1835_v0 = vsel %vm1834_vm8, %v4100_v25, %v1831_v7  ;;  %v1433_v25 = vld [vmem:[%s6003_s10 + $0x10] sm:$0xff] }
 0x2f4   : > { %1882 = vrot.lane.b32.xlu1 %v1835_v0, %s6029_s24  ;;  %v1689_v30 = vpack.c.bf16 %v1681_v41, %v1681_v41  ;;  %v1426_v41 = vld [vmem:[%s6002_s9 + $0x18] sm:$0xff] }
 0x2f5   : > { %v1839_v59 = vmul.f32 0.5, %v1838_v11  ;;  %v1434_v0 = vld [vmem:[%s6003_s10 + $0x18] sm:$0xff] }
 0x2f6   : > { %v2163_v61 = vunpack.c.l.b16 %v1689_v30 }
 0x2f7   : > { %v1644_v29 = vpop.f32.mrf.mxu3  ;;  %v1840_v8 = vsub.f32 1.5, %v1839_v59 }
 0x2f8   : > { %v1674_v56 = vmul.f32 %v1644_v29, %v1432_v39  ;;  %v1667_v39 = vmul.f32 %v5039_v5, %v1425_v43  ;;  %v1435_v5 = vld [vmem:[%s6003_s10 + $0x20] sm:$0xff] }
 0x2f9   : > { %v1841_v26 = vmul.f32 %v4102_v2, %v1840_v8  ;;  %v1427_v43 = vld [vmem:[%s6002_s9 + $0x20] sm:$0xff] }
 0x2fa   : > { %v1682_v53 = vadd.f32 %v1674_v56, %v1666_v35 }
 0x2fb   : > { %v1845_v63 = vsel %vm1844_vm11, %v4102_v2, %v1841_v26  ;;  %v1668_v26 = vmul.f32 %v5044_v48, %v1426_v41  ;;  %v1669_v48 = vmul.f32 %v5049_v4, %v1427_v43 }
 0x2fc   : > { %v1690_v33 = vpack.c.bf16 %v1682_v53, %v1682_v53  ;;  %1884 = vrot.lane.b32.xlu0 %v1845_v63, %s6029_s24 }
 0x2fe   : > { %v2164_v17 = vunpack.c.l.b16 %v1690_v33 }
 0x2ff   : > { %v1647_v7 = vpop.f32.mrf.mxu3 }
 0x300   : > { %v5112_v20 = vpack.c.b16 %v2164_v17, %v2163_v61  ;;  %v1675_v62 = vmul.f32 %v1647_v7, %v1433_v25  ;;  %v1428_v61 = vld [vmem:[%s6002_s9 + $0x28] sm:$0xff] }
 0x301   : > { %v1436_v17 = vld [vmem:[%s6003_s10 + $0x28] sm:$0xff] }
 0x302   : > { %v1683_v11 = vadd.f32 %v1675_v62, %v1667_v39  ;;  %v1670_v39 = vmul.f32 %v5054_v10, %v1428_v61 }
 0x304   : > { %v1691_v59 = vpack.c.bf16 %v1683_v11, %v1683_v11 }
 0x306   : > { %v2165_v8 = vunpack.c.l.b16 %v1691_v59 }
 0x307   : > { %v1650_v29 = vpop.f32.mrf.mxu3 }
 0x308   : > { %v1676_v2 = vmul.f32 %v1650_v29, %v1434_v0 }
 0x30a   : > { %v1684_v35 = vadd.f32 %v1676_v2, %v1668_v26 }
 0x30c   : > { %v1692_v56 = vpack.c.bf16 %v1684_v35, %v1684_v35 }
 0x30e   : > { %v2166_v30 = vunpack.c.l.b16 %v1692_v56 }
 0x30f   : > { %v1653_v53 = vpop.f32.mrf.mxu3 }
 0x310   : > { %v5125_v33 = vpack.c.b16 %v2166_v30, %v2165_v8  ;;  %v1677_v25 = vmul.f32 %v1653_v53, %v1435_v5 }
 0x312   : > { %v1685_v63 = vadd.f32 %v1677_v25, %v1669_v48 }
 0x314   : > { %v1693_v11 = vpack.c.bf16 %v1685_v63, %v1685_v63 }
 0x316   : > { %v2167_v29 = vunpack.c.l.b16 %v1693_v11 }
 0x317   : > { %v1656_v7 = vpop.f32.mrf.mxu3 }
 0x318   : > { %v1678_v62 = vmul.f32 %v1656_v7, %v1436_v17 }
 0x31a   : > { %v1686_v41 = vadd.f32 %v1678_v62, %v1670_v39 }
 0x31c   : > { %v1694_v0 = vpack.c.bf16 %v1686_v41, %v1686_v41 }
 0x31e   : > { %v2168_v26 = vunpack.c.l.b16 %v1694_v0 }
 0x320   : > { %v5138_v2 = vpack.c.b16 %v2168_v26, %v2167_v29 }
 0x32e   : > { %v1875_v4 = vpop.permute.xlu2 %1874 }
 0x32f   : > { %v5141_v59 = vmul.f32 %v1875_v4, %v4882_v47 }
 0x331   : > { %1914 = vrot.lane.b32.xlu2 %v5141_v59, %s6029_s24 }
 0x335   : > { %v1780_v35 = vpop.f32.mrf.mxu0 }
 0x336   : > { %v1781_v56 = vadd.f32 1e-06, %v1780_v35 }
 0x338   : > { %4103 = vrsqrt.f32 %v1781_v56  ;;  %vm1852_vm13 = vweird.f32 %v1781_v56 }
 0x33d   : > { %v1783_v8 = vpop.f32.mrf.mxu0 }
 0x33e   : > { %v4104_v10 = vpop.eup %4103  ;;  %v1784_v30 = vadd.f32 1e-06, %v1783_v8 }
 0x33f   : > { %v1847_v5 = vmul.f32 %v4104_v10, %v1781_v56  ;;  %vm1853_vm12 = vweird.f32 %v4104_v10 }
 0x340   : > { %4105 = vrsqrt.f32 %v1784_v30  ;;  %vm1854_vm14 = vmor %vm1852_vm13, %vm1853_vm12  ;;  %vm1862_vm1 = vweird.f32 %v1784_v30 }
 0x341   : > { %v1848_v53 = vmul.f32 %v4104_v10, %v1847_v5 }
 0x343   : > { %v1849_v43 = vmul.f32 0.5, %v1848_v53 }
 0x345   : > { %v1850_v25 = vsub.f32 1.5, %v1849_v43 }
 0x346   : > { %v4106_v48 = vpop.eup %4105  ;;  %v1881_v29 = vpop.permute.xlu2 %1880 }
 0x347   : > { %v1857_v61 = vmul.f32 %v4106_v48, %v1784_v30  ;;  %v1851_v17 = vmul.f32 %v4104_v10, %v1850_v25  ;;  %vm1863_vm15 = vweird.f32 %v4106_v48  ;;  %v5153_v26 = vmul.f32 %v1881_v29, %v4912_v28  ;;  %v1429_v28 = vld [vmem:[%s6002_s9 + $0x30] sm:$0xff]  ;;  %v1438_v30 = vld [vmem:[%s6003_s10 + $0x38] sm:$0xff] }
 0x348   : > { %vm1864_vm2 = vmor %vm1862_vm1, %vm1863_vm15 }
 0x349   : > { %v1858_v47 = vmul.f32 %v4106_v48, %v1857_v61  ;;  %v1855_v63 = vsel %vm1854_vm14, %v4104_v10, %v1851_v17  ;;  %v1671_v10 = vmul.f32 %v5076_v40, %v1429_v28 }
 0x34a   : > { %1886 = vrot.lane.b32.xlu1 %v1855_v63, %s6029_s24 }
 0x34b   : > { %v1859_v7 = vmul.f32 0.5, %v1858_v47 }
 0x34d   : > { %v1860_v39 = vsub.f32 1.5, %v1859_v7 }
 0x34f   : > { %v1861_v62 = vmul.f32 %v4106_v48, %v1860_v39 }
 0x350   : > { %v1877_v11 = vpop.permute.xlu1 %1876 }
 0x351   : > { %v5147_v41 = vmul.f32 %v1877_v11, %v4893_v57  ;;  %v1865_v0 = vsel %vm1864_vm2, %v4106_v48, %v1861_v62  ;;  %v1437_v57 = vld [vmem:[%s6003_s10 + $0x30] sm:$0xff] }
 0x352   : > { %1888 = vrot.lane.b32.xlu2 %v1865_v0, %s6029_s24 }
 0x353   : > { %1916 = vrot.lane.b32.xlu0 %v5147_v41, %s6029_s24 }
 0x358   : > { %v1879_v4 = vpop.permute.xlu0 %1878 }
 0x359   : > { %v5156_v35 = vmul.f32 %v1879_v4, %v4904_v12  ;;  %v1430_v12 = vld [vmem:[%s6002_s9 + $0x38] sm:$0xff]  ;;  %v1698_v4 = vld [vmem:[%s6004_s11 + $0x8] sm:$0xff] }
 0x35a   : > { %v1672_v48 = vmul.f32 %v5082_v32, %v1430_v12  ;;  %v1700_v32 = vld [vmem:[%s6004_s11 + $0x18] sm:$0xff] }
 0x35b   : > { %1920 = vrot.lane.b32.xlu0 %v5153_v26, %s6029_s24  ;;  %1918 = vrot.lane.b32.xlu1 %v5156_v35, %s6029_s24 }
 0x362   : > { %v1659_v56 = vpop.f32.mrf.mxu3 }
 0x363   : > { %v1679_v8 = vmul.f32 %v1659_v56, %v1437_v57  ;;  %v1701_v56 = vld [vmem:[%s6004_s11 + $0x20] sm:$0xff] }
 0x365   : > { %v1687_v5 = vadd.f32 %v1679_v8, %v1671_v10 }
 0x366   : > { %v1883_v53 = vpop.permute.xlu1 %1882 }
 0x367   : > { %v5176_v43 = vmul.f32 %v1883_v53, %v4920_v44  ;;  %v1695_v40 = vpack.c.bf16 %v1687_v5, %v1687_v5  ;;  %v1697_v44 = vld [vmem:[%s6004_s11] sm:$0xff] }
 0x368   : > { %v1705_v5 = vld [vmem:[%s6005_s12] sm:$0xff] }
 0x369   : > { %1922 = vrot.lane.b32.xlu2 %v5176_v43, %s6029_s24  ;;  %v2169_v63 = vunpack.c.l.b16 %v1695_v40  ;;  %v1706_v40 = vld [vmem:[%s6005_s12 + $0x8] sm:$0xff] }
 0x36a   : > { %v1662_v25 = vpop.f32.mrf.mxu3 }
 0x36b   : > { %v1680_v61 = vmul.f32 %v1662_v25, %v1438_v30 }
 0x36d   : > { %v1688_v17 = vadd.f32 %v1680_v61, %v1672_v48 }
 0x36e   : > { %v1885_v39 = vpop.permute.xlu0 %1884 }
 0x36f   : > { %v1696_v47 = vpack.c.bf16 %v1688_v17, %v1688_v17  ;;  %v5182_v62 = vmul.f32 %v1885_v39, %v4934_v3 }
 0x371   : > { %v2170_v7 = vunpack.c.l.b16 %v1696_v47  ;;  %1924 = vrot.lane.b32.xlu1 %v5182_v62, %s6029_s24 }
 0x373   : > { %v5184_v11 = vpack.c.b16 %v2170_v7, %v2169_v63  ;;  %v1707_v63 = vld [vmem:[%s6005_s12 + $0x10] sm:$0xff] }
 0x374   : > { %v1703_v7 = vld [vmem:[%s6004_s11 + $0x30] sm:$0xff] }
 0x379   : > { %1995 = vrot.lane.b32.xlu1 %v1697_v44, %s6029_s24 }
 0x381   : > { %2001 = vrot.lane.b32.xlu1 %v1700_v32, %s6029_s24  ;;  %v1708_v32 = vld [vmem:[%s6005_s12 + $0x18] sm:$0xff] }
 0x38b   : > { %v1915_v0 = vpop.permute.xlu2 %1914 }
 0x38c   : > { %3745 = vmatmul.msk.f32.vlgmr.msra.gmra.mxu1 %vm741_vm0, %v1915_v0 }
 0x3ac   : > { %v1889_v3 = vpop.permute.xlu2 %1888 }
 0x3ad   : > { %v5198_v29 = vmul.f32 %v1889_v3, %v4993_v34  ;;  %v1699_v34 = vld [vmem:[%s6004_s11 + $0x10] sm:$0xff] }
 0x3af   : > { %1928 = vrot.lane.b32.xlu2 %v5198_v29, %s6029_s24 }
 0x3b7   : > { %1997 = vrot.lane.b32.xlu2 %v1698_v4, %s6029_s24  ;;  %v1709_v4 = vld [vmem:[%s6005_s12 + $0x20] sm:$0xff] }
 0x3bc   : > { %v1887_v57 = vpop.permute.xlu1 %1886 }
 0x3bd   : > { %v5210_v28 = vmul.f32 %v1887_v57, %v4978_v16 }
 0x3bf   : > { %2003 = vrot.lane.b32.xlu2 %v1701_v56, %s6029_s24  ;;  %1926 = vrot.lane.b32.xlu0 %v5210_v28, %s6029_s24  ;;  %v1702_v56 = vld [vmem:[%s6004_s11 + $0x28] sm:$0xff] }
 0x3c3   : > { %v1923_v16 = vpop.permute.xlu2 %1922 }
 0x3c5   : > { %v1917_v8 = vpop.permute.xlu0 %1916 }
 0x3c6   : > { %3746 = vmatmul.msk.f32.gmra.mxu1 %vm741_vm0, %v1917_v8  ;;  %v1710_v8 = vld [vmem:[%s6005_s12 + $0x28] sm:$0xff] }
 0x3c7   : > { %1999 = vrot.lane.b32.xlu0 %v1699_v34, %s6029_s24 }
 0x3cd   : > { %v1919_v10 = vpop.permute.xlu1 %1918  ;;  %v1921_v12 = vpop.permute.xlu0 %1920 }
 0x3ce   : > { %3747 = vmatmul.msk.f32.gmra.mxu1 %vm741_vm0, %v1919_v10 }
 0x3d6   : > { %3748 = vmatmul.msk.f32.gmra.mxu1 %vm741_vm0, %v1921_v12 }
 0x3de   : > { %3749 = vmatmul.msk.f32.gmra.mxu1 %vm741_vm0, %v1923_v16  ;;  %v1704_v16 = vld [vmem:[%s6004_s11 + $0x38] sm:$0xff] }
 0x3e3   : > { %v1925_v30 = vpop.permute.xlu1 %1924 }
 0x3e6   : > { %3750 = vmatmul.msk.f32.gmra.mxu1 %vm741_vm0, %v1925_v30 }
 0x3eb   : > { %v1996_v30 = vpop.permute.xlu1 %1995 }
 0x409   : > { %v1963_v53 = vpop.f32.mrf.mxu1  ;;  %v1929_v61 = vpop.permute.xlu2 %1928 }
 0x40a   : > { %v2027_v25 = vmul.f32 %v1963_v53, %v1705_v5  ;;  %v1711_v5 = vld [vmem:[%s6005_s12 + $0x30] sm:$0xff] }
 0x40c   : > { %2043 = vrot.lane.b32.xlu0 %v2027_v25, %s6029_s24 }
 0x431   : > { %v1927_v48 = vpop.permute.xlu0 %1926 }
 0x432   : > { %3751 = vmatmul.msk.f32.gmra.mxu1 %vm741_vm0, %v1927_v48  ;;  %v2002_v48 = vpop.permute.xlu1 %2001 }
 0x439   : > { %v2000_v53 = vpop.permute.xlu0 %1999 }
 0x43a   : > { %3752 = vmatmul.msk.f32.gmra.mxu1 %vm741_vm0, %v1929_v61 }
 0x443   : > { %v1966_v17 = vpop.f32.mrf.mxu1 }
 0x444   : > { %v2028_v47 = vmul.f32 %v1966_v17, %v1706_v40  ;;  %v1998_v40 = vpop.permute.xlu2 %1997  ;;  %v1712_v17 = vld [vmem:[%s6005_s12 + $0x38] sm:$0xff] }
 0x446   : > { %2045 = vrot.lane.b32.xlu1 %v2028_v47, %s6029_s24 }
 0x44b   : > { %v1969_v39 = vpop.f32.mrf.mxu1 }
 0x44c   : > { %v2029_v44 = vmul.f32 %v1969_v39, %v1707_v63  ;;  %v2019_v63 = vmul.f32 %v1996_v30, %v5141_v59 }
 0x44e   : > { %2007 = vrot.lane.b32.xlu1 %v1703_v7, %s6029_s24  ;;  %2047 = vrot.lane.b32.xlu2 %v2029_v44, %s6029_s24  ;;  %v2020_v7 = vmul.f32 %v1998_v40, %v5147_v41 }
 0x453   : > { %v1972_v0 = vpop.f32.mrf.mxu1 }
 0x454   : > { %v2030_v3 = vmul.f32 %v1972_v0, %v1708_v32 }
 0x456   : > { %2049 = vrot.lane.b32.xlu0 %v2030_v3, %s6029_s24 }
 0x45b   : > { %v1975_v57 = vpop.f32.mrf.mxu1 }
 0x45c   : > { %v2031_v34 = vmul.f32 %v1975_v57, %v1709_v4  ;;  %v2004_v57 = vpop.permute.xlu2 %2003 }
 0x45e   : > { %2005 = vrot.lane.b32.xlu0 %v1702_v56, %s6029_s24  ;;  %2051 = vrot.lane.b32.xlu1 %v2031_v34, %s6029_s24  ;;  %v2022_v34 = vmul.f32 %v2002_v48, %v5153_v26 }
 0x463   : > { %v1978_v10 = vpop.f32.mrf.mxu1 }
 0x464   : > { %v2032_v12 = vmul.f32 %v1978_v10, %v1710_v8  ;;  %v2021_v8 = vmul.f32 %v2000_v53, %v5156_v35 }
 0x466   : > { %2053 = vrot.lane.b32.xlu2 %v2032_v12, %s6029_s24 }
 0x46e   : > { %2009 = vrot.lane.b32.xlu2 %v1704_v16, %s6029_s24 }
 0x47e   : > { %v2044_v47 = vpop.permute.xlu0 %2043 }
 0x47f   : > { %v2067_v0 = vadd.f32 %v2044_v47, %v2019_v63 }
 0x4a8   : > { %v2048_v56 = vpop.permute.xlu2 %2047 }
 0x4a9   : > { %v2069_v12 = vadd.f32 %v2048_v56, %v2021_v8 }
 0x4af   : > { %v1981_v25 = vpop.f32.mrf.mxu1 }
 0x4b0   : > { %v2033_v61 = vmul.f32 %v1981_v25, %v1711_v5  ;;  %v2023_v25 = vmul.f32 %v2004_v57, %v5176_v43 }
 0x4b2   : > { %2055 = vrot.lane.b32.xlu0 %v2033_v61, %s6029_s24 }
 0x4b7   : > { %v1984_v39 = vpop.f32.mrf.mxu1 }
 0x4b8   : > { %v2046_v44 = vpop.permute.xlu1 %2045  ;;  %v2034_v32 = vmul.f32 %v1984_v39, %v1712_v17 }
 0x4b9   : > { %v2068_v3 = vadd.f32 %v2046_v44, %v2020_v7 }
 0x4ba   : > { %2057 = vrot.lane.b32.xlu1 %v2034_v32, %s6029_s24 }
 0x4bb   : > { %v4017_v4 = vpack.i.bf16 %v2068_v3, %v2067_v0 }
 0x4bd   : > { %4018 = vrot.lane.b32.xlu0 %v4017_v4, %s6029_s24 }
 0x4c0   : > { %v2008_v10 = vpop.permute.xlu1 %2007  ;;  %v2054_v40 = vpop.permute.xlu2 %2053 }
 0x4c8   : > { %v2050_v59 = vpop.permute.xlu0 %2049  ;;  %v2010_v26 = vpop.permute.xlu2 %2009 }
 0x4c9   : > { %v2070_v41 = vadd.f32 %v2050_v59, %v2022_v34  ;;  %v2026_v53 = vmul.f32 %v2010_v26, %v5198_v29 }
 0x4cb   : > { %v4022_v16 = vpack.i.bf16 %v2070_v41, %v2069_v12 }
 0x4cd   : > { %4023 = vrot.lane.b32.xlu2 %v4022_v16, %s6029_s24 }
 0x4d0   : > { %v2006_v30 = vpop.permute.xlu0 %2005  ;;  %v2052_v5 = vpop.permute.xlu1 %2051 }
 0x4d1   : > { %v2024_v61 = vmul.f32 %v2006_v30, %v5182_v62  ;;  %v2071_v47 = vadd.f32 %v2052_v5, %v2023_v25  ;;  %v2025_v62 = vmul.f32 %v2008_v10, %v5210_v28 }
 0x4d3   : > { %v2072_v17 = vadd.f32 %v2054_v40, %v2024_v61 }
 0x4d5   : > { %v4027_v63 = vpack.i.bf16 %v2072_v17, %v2071_v47  ;;  %2397 = vrot.lane.b32.xlu2 %v5112_v20, %s4349_s26 }
 0x4d7   : > { %4028 = vrot.lane.b32.xlu1 %v4027_v63, %s6029_s24 }
 0x4dd   : > { %2401 = vrot.lane.b32.xlu2 %v5138_v2, %s4349_s26 }
 0x4e5   : > { %2550 = vrot.lane.b32.xlu2 %v5006_v58, %s4349_s26 }
 0x4ed   : > { %2546 = vrot.lane.b32.xlu2 %v5014_v1, %s4349_s26 }
 0x4f5   : > { %2646 = vrot.lane.b32.xlu2 %v5112_v20, %s4350_s25 }
 0x524   : > { %v2056_v35 = vpop.permute.xlu0 %2055 }
 0x525   : > { %v2073_v7 = vadd.f32 %v2056_v35, %v2025_v62 }
 0x527   : > { %v4024_v43 = vpop.permute.xlu2 %4023 }
 0x528   : > { %v4025_v28 = vunpack.i.l.bf16 %v4024_v43  ;;  %v4026_v29 = vunpack.i.h.bf16 %v4024_v43 }
 0x52c   : > { %v2058_v48 = vpop.permute.xlu1 %2057 }
 0x52d   : > { %v2074_v39 = vadd.f32 %v2058_v48, %v2026_v53 }
 0x52f   : > { %v4032_v44 = vpack.i.bf16 %v2074_v39, %v2073_v7  ;;  %v4019_v32 = vpop.permute.xlu0 %4018  ;;  %v2398_v0 = vpop.permute.xlu2 %2397 }
 0x530   : > { %v4020_v3 = vunpack.i.l.bf16 %v4019_v32  ;;  %v4021_v4 = vunpack.i.h.bf16 %v4019_v32 }
 0x531   : > { %4033 = vrot.lane.b32.xlu0 %v4032_v44, %s6029_s24 }
 0x532   : > { %2107 = vxpose.xlu1.b32.start [1/8] (short) (narrow) %v4020_v3, 64 }
 0x537   : > { %v5292_v57 = vpop.permute.xlu2 %2401 }
 0x539   : > { %2399 = vrot.lane.b32.xlu0 %v5125_v33, %s4349_s26 }
 0x53a   : > { %2108 = vxpose.xlu1.b32.cont [2/8] (short) (narrow) %v4021_v4, 64 }
 0x53f   : > { %v2551_v56 = vpop.permute.xlu2 %2550 }
 0x540   : > { %2572 = vmatpush.bf16.msrb.mxu1 %v2551_v56 }
 0x541   : > { %2403 = vrot.lane.b32.xlu0 %v5184_v11, %s4349_s26 }
 0x542   : > { %2109 = vxpose.xlu1.b32.cont [3/8] (short) (narrow) %v4025_v28, 64 }
 0x547   : > { %v2547_v25 = vpop.permute.xlu2 %2546 }
 0x549   : > { %2548 = vrot.lane.b32.xlu0 %v5010_v22, %s4349_s26  ;;  %v4029_v34 = vpop.permute.xlu1 %4028 }
 0x54a   : > { %2110 = vxpose.xlu1.b32.cont [4/8] (short) (narrow) %v4026_v29, 64  ;;  %v4030_v8 = vunpack.i.l.bf16 %v4029_v34  ;;  %v4031_v10 = vunpack.i.h.bf16 %v4029_v34 }
 0x552   : > { %2111 = vxpose.xlu1.b32.cont [5/8] (short) (narrow) %v4030_v8, 64 }
 0x55a   : > { %2112 = vxpose.xlu1.b32.cont [6/8] (short) (narrow) %v4031_v10, 64 }
 0x5a3   : > { %v4034_v59 = vpop.permute.xlu0 %4033 }
 0x5a4   : > { %v4035_v12 = vunpack.i.l.bf16 %v4034_v59  ;;  %v4036_v16 = vunpack.i.h.bf16 %v4034_v59 }
 0x5a6   : > { %2113 = vxpose.xlu1.b32.cont [7/8] (short) (narrow) %v4035_v12, 64 }
 0x5ab   : > { %v2400_v41 = vpop.permute.xlu0 %2399 }
 0x5ae   : > { %2114 = vxpose.xlu1.b32.end [8/8] (short) (narrow) %v4036_v16, 64 }
 0x5b3   : > { %v2404_v30 = vpop.permute.xlu0 %2403 }
 0x5bb   : > { %v2549_v5 = vpop.permute.xlu0 %2548 }
 0x5bc   : > { %2573 = vmatpush.bf16.msrb.mxu1 %v2549_v5 }
 0x5c0   : > { %2574 = vmatpush.bf16.msrb.mxu1 %v2547_v25 }
 0x608   : > { %2544 = vrot.lane.b32.xlu1 %v4901_v46, %s4349_s26  ;;  %s3962_s26 = smul.u32 24, %s4477_s1 }
 0x610   : > { %2897 = vrot.lane.b32.xlu1 %v5125_v33, %s4351_s20 }
 0x618   : > { %2650 = vrot.lane.b32.xlu1 %v5138_v2, %s4350_s25 }
 0x61a   : > { %v2123_v61 = vpop.trf.xlu1 }
 0x61b   : > { %v2139_v40 = vpack.c.bf16 %v2123_v61, %v2123_v61 }
 0x61d   : > { %v2177_v63 = vunpack.c.l.b16 %v2139_v40 }
 0x620   : > { %2899 = vrot.lane.b32.xlu1 %v5138_v2, %s4351_s20 }
 0x622   : > { %v2124_v17 = vpop.trf.xlu1 }
 0x623   : > { %v2140_v47 = vpack.c.bf16 %v2124_v17, %v2124_v17 }
 0x625   : > { %v2178_v26 = vunpack.c.l.b16 %v2140_v47 }
 0x627   : > { %v2179_v35 = vpack.c.b16 %v2178_v26, %v2177_v63 }
 0x628   : > { %2652 = vrot.lane.b32.xlu1 %v5184_v11, %s4350_s25 }
 0x629   : > { %2201 = vmatpush.bf16.msra.mxu2 %v2179_v35 }
 0x62a   : > { %v2125_v43 = vpop.trf.xlu1 }
 0x62b   : > { %v2141_v62 = vpack.c.bf16 %v2125_v43, %v2125_v43 }
 0x62c   : > { %3753 = vmatmul.msk.bf16.vlgmr.msra.gmra.mxu2 %vm2181_vm3, %v5112_v20 }
 0x62d   : > { %v2407_v7 = vunpack.c.l.b16 %v2141_v62 }
 0x632   : > { %v2126_v53 = vpop.trf.xlu1 }
 0x633   : > { %v2142_v48 = vpack.c.bf16 %v2126_v53, %v2126_v53 }
 0x635   : > { %v2408_v39 = vunpack.c.l.b16 %v2142_v48 }
 0x637   : > { %v2409_v44 = vpack.c.b16 %v2408_v39, %v2407_v7 }
 0x639   : > { %2430 = vmatpush.bf16.msrb.mxu0 %v2409_v44 }
 0x63a   : > { %v2127_v32 = vpop.trf.xlu1 }
 0x63b   : > { %v2143_v3 = vpack.c.bf16 %v2127_v32, %v2127_v32 }
 0x63c   : > { %3754 = vmatmul.msk.bf16.gmra.mxu2 %vm2181_vm3, %v5125_v33  ;;  %3761 = vmatmul.msk.bf16.vlgmr.msrb.gmra.mxu0 %vm2181_vm3, %v2398_v0  ;;  %v2647_v0 = vpop.permute.xlu2 %2646 }
 0x63d   : > { %v2656_v28 = vunpack.c.l.b16 %v2143_v3 }
 0x642   : > { %v2128_v4 = vpop.trf.xlu1 }
 0x643   : > { %v2144_v56 = vpack.c.bf16 %v2128_v4, %v2128_v4 }
 0x645   : > { %v2657_v29 = vunpack.c.l.b16 %v2144_v56 }
 0x647   : > { %v2658_v34 = vpack.c.b16 %v2657_v29, %v2656_v28 }
 0x649   : > { %2679 = vmatpush.bf16.msrb.mxu2 %v2658_v34 }
 0x64a   : > { %v2129_v8 = vpop.trf.xlu1 }
 0x64b   : > { %v2145_v10 = vpack.c.bf16 %v2129_v8, %v2129_v8 }
 0x64c   : > { %3755 = vmatmul.msk.bf16.gmra.mxu2 %vm2181_vm3, %v5138_v2  ;;  %3762 = vmatmul.msk.bf16.gmra.mxu0 %vm2181_vm3, %v2400_v41 }
 0x64d   : > { %v2905_v12 = vunpack.c.l.b16 %v2145_v10 }
 0x652   : > { %v2130_v59 = vpop.trf.xlu1 }
 0x653   : > { %v2146_v16 = vpack.c.bf16 %v2130_v59, %v2130_v59 }
 0x655   : > { %v2906_v5 = vunpack.c.l.b16 %v2146_v16 }
 0x657   : > { %v2907_v25 = vpack.c.b16 %v2906_v5, %v2905_v12 }
 0x659   : > { %2928 = vmatpush.bf16.msra.mxu0 %v2907_v25 }
 0x65c   : > { %3756 = vmatmul.msk.bf16.gmra.mxu2 %vm2181_vm3, %v5184_v11  ;;  %3763 = vmatmul.msk.bf16.gmra.mxu0 %vm2181_vm3, %v5292_v57 }
 0x66c   : > { %3764 = vmatmul.msk.bf16.gmra.mxu0 %vm2181_vm3, %v2404_v30  ;;  %3769 = vmatmul.msk.bf16.vlgmr.msrb.gmra.mxu2 %vm2181_vm3, %v2647_v0 }
 0x67a   : > { %v2545_v2 = vpop.permute.xlu1 %2544 }
 0x67b   : > { %2575 = vmatpush.bf16.msrb.mxu1 %v2545_v2 }
 0x67f   : > { %3959 = vmatpush.bf16.msra.mxu1 %v2907_v25 }
 0x6af   : > { %v5324_v41 = vpop.f32.mrf.mxu2 }
 0x6b0   : > { %v2223_v61 = vsel %vm741_vm0, %v5324_v41, -inf }
 0x6b1   : > { %2224 = vmax.xlane.f32.xlu1 %v2223_v61 }
 0x6b7   : > { %v5328_v40 = vpop.f32.mrf.mxu2 }
 0x6b9   : > { %v2432_v17 = vpop.f32.mrf.mxu0 }
 0x6ba   : > { %v2452_v47 = vsel %vm741_vm0, %v2432_v17, -inf }
 0x6bb   : > { %2453 = vmax.xlane.f32.xlu2 %v2452_v47 }
 0x6bf   : > { %v5331_v57 = vpop.f32.mrf.mxu2 }
 0x6c1   : > { %v2434_v30 = vpop.f32.mrf.mxu0 }
 0x6c2   : > { %v2455_v63 = vsel %vm741_vm0, %v2434_v30, -inf }
 0x6c3   : > { %2456 = vmax.xlane.f32.xlu0 %v2455_v63 }
 0x6c7   : > { %v5334_v26 = vpop.f32.mrf.mxu2 }
 0x6c9   : > { %v2437_v35 = vpop.f32.mrf.mxu0 }
 0x6ca   : > { %v2458_v43 = vsel %vm741_vm0, %v2437_v35, -inf }
 0x6cb   : > { %2459 = vmax.xlane.f32.xlu2 %v2458_v43 }
 0x6cf   : > { %v5337_v62 = vpop.f32.mrf.mxu2 }
 0x6d1   : > { %v2439_v53 = vpop.f32.mrf.mxu0 }
 0x6d2   : > { %v2461_v48 = vsel %vm741_vm0, %v2439_v53, -inf }
 0x6d3   : > { %2462 = vmax.xlane.f32.xlu0 %v2461_v48 }
 0x6d7   : > { %v5340_v7 = vpop.f32.mrf.mxu2 }
 0x6d9   : > { %v2442_v39 = vpop.f32.mrf.mxu0 }
 0x6da   : > { %v2464_v44 = vsel %vm741_vm0, %v2442_v39, -inf }
 0x6db   : > { %2465 = vmax.xlane.f32.xlu2 %v2464_v44 }
 0x6df   : > { %v5343_v32 = vpop.f32.mrf.mxu2 }
 0x6e1   : > { %v2444_v3 = vpop.f32.mrf.mxu0 }
 0x6e2   : > { %v2467_v4 = vsel %vm741_vm0, %v2444_v3, -inf }
 0x6e3   : > { %2468 = vmax.xlane.f32.xlu0 %v2467_v4 }
 0x6e7   : > { %v5346_v28 = vpop.f32.mrf.mxu2 }
 0x6e8   : > { %v2244_v56 = vsel %vm741_vm0, %v5346_v28, -inf }
 0x6e9   : > { %v2447_v29 = vpop.f32.mrf.mxu0  ;;  %2245 = vmax.xlane.f32.xlu1 %v2244_v56 }
 0x6ea   : > { %v2470_v34 = vsel %vm741_vm0, %v2447_v29, -inf }
 0x6eb   : > { %2471 = vmax.xlane.f32.xlu2 %v2470_v34 }
 0x6f1   : > { %v2449_v8 = vpop.f32.mrf.mxu0 }
 0x6f2   : > { %v2473_v10 = vsel %vm741_vm0, %v2449_v8, -inf }
 0x6f3   : > { %2474 = vmax.xlane.f32.xlu0 %v2473_v10 }
 0x72e   : > { %v2454_v59 = vpop.xlane.xlu2 %2453 }
 0x72f   : > { %v2476_v12 = vsub.f32 %v2432_v17, %v2454_v59 }
 0x731   : > { %v2484_v16 = vmul.f32 1.442695, %v2476_v12 }
 0x733   : > { %4107 = vpow2.f32 %v2484_v16 }
 0x736   : > { %v2457_v5 = vpop.xlane.xlu0 %2456 }
 0x737   : > { %v2477_v25 = vsub.f32 %v2434_v30, %v2457_v5 }
 0x739   : > { %v5352_v0 = vpop.eup %4107  ;;  %v2486_v2 = vmul.f32 1.442695, %v2477_v25 }
 0x73a   : > { %v2500_v61 = vsel %vm741_vm0, %v5352_v0, 0.0 }
 0x73b   : > { %4109 = vpow2.f32 %v2486_v2  ;;  %2501 = vadd.xlane.f32.xlu0 %v2500_v61 }
 0x73e   : > { %v2460_v47 = vpop.xlane.xlu2 %2459 }
 0x73f   : > { %v2478_v63 = vsub.f32 %v2437_v35, %v2460_v47 }
 0x741   : > { %v5356_v43 = vpop.eup %4109  ;;  %v2488_v48 = vmul.f32 1.442695, %v2478_v63 }
 0x742   : > { %v2503_v17 = vsel %vm741_vm0, %v5356_v43, 0.0 }
 0x743   : > { %4111 = vpow2.f32 %v2488_v48  ;;  %2504 = vadd.xlane.f32.xlu0 %v2503_v17 }
 0x746   : > { %v2463_v44 = vpop.xlane.xlu0 %2462 }
 0x747   : > { %v2479_v30 = vsub.f32 %v2439_v53, %v2463_v44 }
 0x749   : > { %v5360_v4 = vpop.eup %4111  ;;  %v2490_v56 = vmul.f32 1.442695, %v2479_v30 }
 0x74a   : > { %v2506_v34 = vsel %vm741_vm0, %v5360_v4, 0.0 }
 0x74b   : > { %4113 = vpow2.f32 %v2490_v56  ;;  %2507 = vadd.xlane.f32.xlu2 %v2506_v34 }
 0x74e   : > { %v2466_v10 = vpop.xlane.xlu2 %2465 }
 0x74f   : > { %v2480_v35 = vsub.f32 %v2442_v39, %v2466_v10  ;;  %v5384_v10 = vpop.permute.xlu1 %2897 }
 0x751   : > { %v5364_v59 = vpop.eup %4113  ;;  %v2492_v12 = vmul.f32 1.442695, %v2480_v35 }
 0x752   : > { %v2509_v16 = vsel %vm741_vm0, %v5364_v59, 0.0 }
 0x753   : > { %4115 = vpow2.f32 %v2492_v12  ;;  %2510 = vadd.xlane.f32.xlu0 %v2509_v16  ;;  %v3922_v16 = vld [vmem:[%s6009_s16 + $0x70] sm:$0xff] }
 0x756   : > { %v2469_v5 = vpop.xlane.xlu0 %2468 }
 0x757   : > { %v2481_v53 = vsub.f32 %v2444_v3, %v2469_v5  ;;  %v5388_v35 = vpop.permute.xlu1 %2650 }
 0x759   : > { %v5368_v25 = vpop.eup %4115  ;;  %v2494_v2 = vmul.f32 1.442695, %v2481_v53  ;;  %v2229_v53 = vsel %vm741_vm0, %v5331_v57, -inf }
 0x75a   : > { %v2512_v61 = vsel %vm741_vm0, %v5368_v25, 0.0 }
 0x75b   : > { %4117 = vpow2.f32 %v2494_v2  ;;  %2513 = vadd.xlane.f32.xlu0 %v2512_v61  ;;  %v3920_v2 = vld [vmem:[%s6009_s16 + $0x60] sm:$0xff] }
 0x75e   : > { %v2472_v63 = vpop.xlane.xlu2 %2471 }
 0x75f   : > { %v2482_v3 = vsub.f32 %v2447_v29, %v2472_v63  ;;  %v3923_v29 = vld [vmem:[%s6009_s16 + $0x78] sm:$0xff]  ;;  %v5399_v12 = vpop.permute.xlu1 %2899 }
 0x760   : > { %3370 = vmatpush.bf16.msrb.mxu0 %v3923_v29 }
 0x761   : > { %v5372_v47 = vpop.eup %4117  ;;  %v2496_v48 = vmul.f32 1.442695, %v2482_v3 }
 0x762   : > { %v2515_v39 = vsel %vm741_vm0, %v5372_v47, 0.0 }
 0x763   : > { %2895 = vrot.lane.b32.xlu2 %v5112_v20, %s4351_s20  ;;  %2516 = vadd.xlane.f32.xlu0 %v2515_v39  ;;  %4119 = vpow2.f32 %v2496_v48  ;;  %v6060_v39 = vunpack.c.l.bf16 %v4872_v9  ;;  %v3919_v48 = vld [vmem:[%s6009_s16 + $0x58] sm:$0xff] }
 0x764   : > { %3371 = vmatpush.bf16.msrb.mxu0 %v3922_v16 }
 0x765   : > { %v993_v63 = vperm.slane %v6060_v39, 2 }
 0x766   : > { %v2475_v30 = vpop.xlane.xlu0 %2474 }
 0x767   : > { %v2483_v56 = vsub.f32 %v2449_v8, %v2475_v30  ;;  %v2226_v8 = vsel %vm741_vm0, %v5328_v40, -inf  ;;  %v5412_v61 = vpop.permute.xlu1 %2652  ;;  %v3918_v30 = vld [vmem:[%s6009_s16 + $0x50] sm:$0xff] }
 0x769   : > { %v5380_v17 = vpop.eup %4119  ;;  %v2498_v34 = vmul.f32 1.442695, %v2483_v56  ;;  %v5424_v56 = vperm.slane %v993_v63, 0  ;;  %v2238_v63 = vsel %vm741_vm0, %v5340_v7, -inf }
 0x76a   : > { %v2518_v44 = vsel %vm741_vm0, %v5380_v17, 0.0 }
 0x76b   : > { %4121 = vpow2.f32 %v2498_v34  ;;  %v5435_v16 = vadd.f32 %v5058_v19, %v5424_v56  ;;  %v3916_v19 = vld [vmem:[%s6009_s16 + $0x40] sm:$0xff] }
 0x76f   : > { %v2225_v9 = vpop.xlane.xlu1 %2224 }
 0x771   : > { %v5386_v20 = vpop.eup %4121 }
 0x777   : > { %2648 = vrot.lane.b32.xlu0 %v5125_v33, %s4350_s25  ;;  %v2521_v33 = vsel %vm741_vm0, %v5386_v20, 0.0 }
 0x78c   : > { %2519 = vadd.xlane.f32.xlu2 %v2518_v44  ;;  %v2235_v44 = vsel %vm741_vm0, %v5337_v62, -inf }
 0x7a1   : > { %2522 = vadd.xlane.f32.xlu0 %v2521_v33  ;;  %v5428_v33 = vadd.f32 %v5060_v18, %v5424_v56 }
 0x7a3   : > { %v1127_v18 = vmul.f32 0.044715, %v5428_v33 }
 0x7a4   : > { %2901 = vrot.lane.b32.xlu2 %v5184_v11, %s4351_s20  ;;  %v3921_v11 = vld [vmem:[%s6009_s16 + $0x68] sm:$0xff] }
 0x7a5   : > { %3372 = vmatpush.bf16.msrb.mxu0 %v3921_v11 }
 0x7a9   : > { %2227 = vmax.xlane.f32.xlu0 %v2226_v8  ;;  %3373 = vmatpush.bf16.msrb.mxu0 %v3920_v2  ;;  %v3917_v8 = vld [vmem:[%s6009_s16 + $0x48] sm:$0xff] }
 0x7ad   : > { %3374 = vmatpush.bf16.msrb.mxu0 %v3919_v48 }
 0x7ae   : > { %v2502_v5 = vpop.xlane.xlu0 %2501 }
 0x7af   : > { %4123 = vrcp.f32 %v2502_v5  ;;  %v2247_v5 = vsub.f32 %v5324_v41, %v2225_v9  ;;  %v1143_v41 = vmul.f32 %v1127_v18, %v5428_v33 }
 0x7b1   : > { %2230 = vmax.xlane.f32.xlu0 %v2229_v53  ;;  %3375 = vmatpush.bf16.msrb.mxu0 %v3918_v30  ;;  %v2255_v48 = vmul.f32 1.442695, %v2247_v5  ;;  %v1159_v30 = vmul.f32 %v1143_v41, %v5428_v33 }
 0x7b3   : > { %v1175_v5 = vadd.f32 %v1159_v30, %v5428_v33  ;;  %v5477_v30 = vpop.f32.mrf.mxu2 }
 0x7b5   : > { %v4124_v34 = vpop.eup %4123  ;;  %3376 = vmatpush.bf16.msrb.mxu0 %v3917_v8 }
 0x7b6   : > { %v2505_v3 = vpop.xlane.xlu0 %2504  ;;  %v2532_v11 = vmul.f32 %v4124_v34, %v5352_v0  ;;  %v2241_v34 = vsel %vm741_vm0, %v5343_v32, -inf }
 0x7b7   : > { %4125 = vrcp.f32 %v2505_v3  ;;  %v1125_v3 = vmul.f32 0.044715, %v5435_v16 }
 0x7b9   : > { %2236 = vmax.xlane.f32.xlu0 %v2235_v44  ;;  %3377 = vmatpush.bf16.msrb.mxu0 %v3916_v19  ;;  %v1141_v0 = vmul.f32 %v1125_v3, %v5435_v16  ;;  %v1191_v19 = vmul.f32 0.7978846, %v1175_v5 }
 0x7bb   : > { %v1157_v9 = vmul.f32 %v1141_v0, %v5435_v16 }
 0x7bd   : > { %v4126_v29 = vpop.eup %4125  ;;  %v1173_v18 = vadd.f32 %v1157_v9, %v5435_v16 }
 0x7be   : > { %v2533_v53 = vmul.f32 %v4126_v29, %v5356_v43  ;;  %v2508_v2 = vpop.xlane.xlu2 %2507 }
 0x7bf   : > { %4127 = vrcp.f32 %v2508_v2 }
 0x7c0   : > { %v2540_v39 = vpack.c.bf16 %v2533_v53, %v2532_v11  ;;  %4129 = vpow2.f32 %v2255_v48  ;;  %v5460_v11 = vadd.f32 %v5066_v49, %v5424_v56  ;;  %v2232_v53 = vsel %vm741_vm0, %v5334_v26, -inf }
 0x7c1   : > { %2239 = vmax.xlane.f32.xlu0 %v2238_v63 }
 0x7c2   : > { %3765 = vmatmul.msk.bf16.vlgmr.msrb.gmra.mxu1 %vm741_vm0, %v2540_v39  ;;  %v5467_v39 = vadd.f32 %v5062_v27, %v5424_v56  ;;  %v1131_v49 = vmul.f32 0.044715, %v5460_v11 }
 0x7c4   : > { %v1147_v27 = vmul.f32 %v1131_v49, %v5460_v11 }
 0x7c5   : > { %v4128_v29 = vpop.eup %4127 }
 0x7c6   : > { %v2896_v43 = vpop.permute.xlu2 %2895  ;;  %v2511_v44 = vpop.xlane.xlu0 %2510  ;;  %v2534_v3 = vmul.f32 %v4128_v29, %v5360_v4  ;;  %v1163_v9 = vmul.f32 %v1147_v27, %v5460_v11 }
 0x7c7   : > { %4131 = vrcp.f32 %v2511_v44  ;;  %3777 = vmatmul.msk.bf16.vlgmr.msra.gmra.mxu0 %vm2181_vm3, %v2896_v43  ;;  %v5455_v8 = vpop.eup %4129  ;;  %v1189_v43 = vmul.f32 0.7978846, %v1173_v18  ;;  %v1129_v44 = vmul.f32 0.044715, %v5467_v39  ;;  %v1101_v18 = vadd.f32 %v5070_v21, %v5424_v56 }
 0x7c8   : > { %v2271_v41 = vsel %vm741_vm0, %v5455_v8, 0.0  ;;  %4133 = vtanh.f32 %v1191_v19  ;;  %v1109_v21 = vmul.f32 0.5, %v5435_v16  ;;  %v1106_v16 = vadd.f32 %v5084_v42, %v5424_v56 }
 0x7c9   : > { %2242 = vmax.xlane.f32.xlu0 %v2241_v34  ;;  %v1145_v4 = vmul.f32 %v1129_v44, %v5467_v39  ;;  %v2701_v34 = vsel %vm741_vm0, %v5477_v30, -inf  ;;  %v1135_v44 = vmul.f32 0.044715, %v1101_v18 }
 0x7cb   : > { %v1161_v5 = vmul.f32 %v1145_v4, %v5467_v39 }
 0x7cd   : > { %v4132_v2 = vpop.eup %4131  ;;  %2233 = vmax.xlane.f32.xlu2 %v2232_v53 }
 0x7ce   : > { %v2514_v63 = vpop.xlane.xlu0 %2513  ;;  %v2535_v48 = vmul.f32 %v4132_v2, %v5364_v59  ;;  %v4134_v29 = vpop.eup %4133 }
 0x7cf   : > { %4135 = vrcp.f32 %v2514_v63  ;;  %v1179_v63 = vadd.f32 %v1163_v9, %v5460_v11 }
 0x7d0   : > { %v2541_v0 = vpack.c.bf16 %v2535_v48, %v2534_v3  ;;  %4137 = vtanh.f32 %v1189_v43  ;;  %v1223_v48 = vadd.f32 1.0, %v4134_v29  ;;  %v1111_v43 = vmul.f32 0.5, %v5428_v33 }
 0x7d1   : > { %2272 = vadd.xlane.f32.xlu0 %v2271_v41  ;;  %v1177_v41 = vadd.f32 %v1161_v5, %v5467_v39  ;;  %v1195_v4 = vmul.f32 0.7978846, %v1179_v63  ;;  %v1151_v29 = vmul.f32 %v1135_v44, %v1101_v18 }
 0x7d2   : > { %3766 = vmatmul.msk.bf16.gmra.mxu1 %vm741_vm0, %v2541_v0 }
 0x7d3   : > { %v1193_v9 = vmul.f32 0.7978846, %v1177_v41  ;;  %v1167_v5 = vmul.f32 %v1151_v29, %v1101_v18  ;;  %v1115_v41 = vmul.f32 0.5, %v5460_v11 }
 0x7d5   : > { %v4136_v53 = vpop.eup %4135 }
 0x7d6   : > { %v2517_v59 = vpop.xlane.xlu0 %2516  ;;  %v4138_v2 = vpop.eup %4137  ;;  %v2536_v19 = vmul.f32 %v4136_v53, %v5368_v25 }
 0x7d7   : > { %4139 = vrcp.f32 %v2517_v59  ;;  %3778 = vmatmul.msk.bf16.gmra.mxu0 %vm2181_vm3, %v5384_v10  ;;  %v1099_v10 = vadd.f32 %v5068_v52, %v5424_v56  ;;  %v1221_v0 = vadd.f32 1.0, %v4138_v2  ;;  %v1239_v59 = vmul.f32 %v1223_v48, %v1111_v43 }
 0x7d8   : > { %4141 = vtanh.f32 %v1195_v4  ;;  %v1139_v43 = vmul.f32 0.044715, %v1106_v16 }
 0x7d9   : > { %2702 = vmax.xlane.f32.xlu0 %v2701_v34  ;;  %v1133_v34 = vmul.f32 0.044715, %v1099_v10  ;;  %v1237_v52 = vmul.f32 %v1221_v0, %v1109_v21  ;;  %4143 = vtanh.f32 %v1193_v9 }
 0x7da   : > { %v1155_v9 = vmul.f32 %v1139_v43, %v1106_v16  ;;  %v1123_v43 = vmul.f32 0.5, %v1106_v16 }
 0x7db   : > { %v1253_v25 = vpack.c.bf16 %v1239_v59, %v1237_v52 }
 0x7dc   : > { %v1171_v29 = vmul.f32 %v1155_v9, %v1106_v16 }
 0x7dd   : > { %v4140_v3 = vpop.eup %4139 }
 0x7de   : > { %v2537_v49 = vmul.f32 %v4140_v3, %v5372_v47  ;;  %v1149_v47 = vmul.f32 %v1133_v34, %v1099_v10  ;;  %v4142_v33 = vpop.eup %4141  ;;  %v1183_v3 = vadd.f32 %v1167_v5, %v1101_v18  ;;  %v1119_v5 = vmul.f32 0.5, %v1101_v18 }
 0x7df   : > { %v4144_v63 = vpop.eup %4143  ;;  %v1227_v48 = vadd.f32 1.0, %v4142_v33 }
 0x7e0   : > { %v2542_v27 = vpack.c.bf16 %v2537_v49, %v2536_v19  ;;  %v1165_v2 = vmul.f32 %v1149_v47, %v1099_v10  ;;  %v1104_v19 = vadd.f32 %v5073_v45, %v5424_v56  ;;  %v1225_v0 = vadd.f32 1.0, %v4144_v63 }
 0x7e1   : > { %v1199_v44 = vmul.f32 0.7978846, %v1183_v3  ;;  %v1243_v4 = vmul.f32 %v1227_v48, %v1115_v41 }
 0x7e2   : > { %3767 = vmatmul.msk.bf16.gmra.mxu1 %vm741_vm0, %v2542_v27  ;;  %v1181_v49 = vadd.f32 %v1165_v2, %v1099_v10  ;;  %v1113_v27 = vmul.f32 0.5, %v5467_v39  ;;  %v1137_v21 = vmul.f32 0.044715, %v1104_v19  ;;  %v1117_v2 = vmul.f32 0.5, %v1099_v10 }
 0x7e3   : > { %4145 = vtanh.f32 %v1199_v44  ;;  %v1121_v18 = vmul.f32 0.5, %v1104_v19 }
 0x7e4   : > { %v1197_v59 = vmul.f32 0.7978846, %v1181_v49  ;;  %v1241_v34 = vmul.f32 %v1225_v0, %v1113_v27  ;;  %v1153_v52 = vmul.f32 %v1137_v21, %v1104_v19 }
 0x7e6   : > { %v1255_v42 = vpack.c.bf16 %v1243_v4, %v1241_v34  ;;  %4147 = vtanh.f32 %v1197_v59  ;;  %v1169_v56 = vmul.f32 %v1153_v52, %v1104_v19 }
 0x7e7   : > { %3378 = vmatmul.bf16.vlgmr.msrb.gmra.mxu0 %v1253_v25  ;;  %v1187_v25 = vadd.f32 %v1171_v29, %v1106_v16 }
 0x7e8   : > { %v1185_v39 = vadd.f32 %v1169_v56, %v1104_v19 }
 0x7e9   : > { %v2649_v53 = vpop.permute.xlu0 %2648  ;;  %v4146_v45 = vpop.eup %4145  ;;  %v1203_v33 = vmul.f32 0.7978846, %v1187_v25 }
 0x7ea   : > { %3770 = vmatmul.msk.bf16.gmra.mxu2 %vm2181_vm3, %v2649_v53  ;;  %v1231_v47 = vadd.f32 1.0, %v4146_v45  ;;  %v1201_v3 = vmul.f32 0.7978846, %v1185_v39 }
 0x7eb   : > { %4149 = vtanh.f32 %v1203_v33 }
 0x7ec   : > { %v4148_v11 = vpop.eup %4147  ;;  %v1247_v63 = vmul.f32 %v1231_v47, %v1119_v5  ;;  %4151 = vtanh.f32 %v1201_v3 }
 0x7ed   : > { %v1229_v53 = vadd.f32 1.0, %v4148_v11 }
 0x7ef   : > { %v1245_v48 = vmul.f32 %v1229_v53, %v1117_v2 }
 0x7f1   : > { %v1257_v49 = vpack.c.bf16 %v1247_v63, %v1245_v48  ;;  %v4150_v41 = vpop.eup %4149 }
 0x7f2   : > { %v1235_v0 = vadd.f32 1.0, %v4150_v41 }
 0x7f4   : > { %v1251_v4 = vmul.f32 %v1235_v0, %v1123_v43 }
 0x7f7   : > { %3383 = vmatmul.bf16.gmra.mxu0 %v1255_v42 }
 0x7fa   : > { %3771 = vmatmul.msk.bf16.gmra.mxu2 %vm2181_vm3, %v5388_v35  ;;  %v4152_v35 = vpop.eup %4151 }
 0x7fb   : > { %v1233_v44 = vadd.f32 1.0, %v4152_v35 }
 0x7fd   : > { %v1249_v10 = vmul.f32 %v1233_v44, %v1121_v18 }
 0x7ff   : > { %v2520_v27 = vpop.xlane.xlu2 %2519  ;;  %v1259_v59 = vpack.c.bf16 %v1251_v4, %v1249_v10 }
 0x800   : > { %4153 = vrcp.f32 %v2520_v27 }
 0x806   : > { %v4154_v34 = vpop.eup %4153 }
 0x807   : > { %3388 = vmatmul.bf16.gmra.mxu0 %v1257_v49  ;;  %v2538_v42 = vmul.f32 %v4154_v34, %v5380_v17  ;;  %v5517_v17 = vpop.f32.mrf.mxu2  ;;  %v2902_v39 = vpop.permute.xlu2 %2901 }
 0x80a   : > { %3772 = vmatmul.msk.bf16.gmra.mxu2 %vm2181_vm3, %v5412_v61 }
 0x814   : > { %v2523_v21 = vpop.xlane.xlu0 %2522 }
 0x815   : > { %4155 = vrcp.f32 %v2523_v21 }
 0x817   : > { %3393 = vmatmul.bf16.gmra.mxu0 %v1259_v59 }
 0x81b   : > { %v4156_v9 = vpop.eup %4155 }
 0x81c   : > { %v2539_v52 = vmul.f32 %v4156_v9, %v5386_v20  ;;  %v2228_v61 = vpop.xlane.xlu0 %2227 }
 0x81d   : > { %v2248_v29 = vsub.f32 %v5328_v40, %v2228_v61 }
 0x81e   : > { %v2543_v16 = vpack.c.bf16 %v2539_v52, %v2538_v42 }
 0x81f   : > { %v2257_v45 = vmul.f32 1.442695, %v2248_v29 }
 0x820   : > { %3768 = vmatmul.msk.bf16.gmra.mxu1 %vm741_vm0, %v2543_v16  ;;  %v2246_v16 = vpop.xlane.xlu1 %2245 }
 0x821   : > { %4157 = vpow2.f32 %v2257_v45 }
 0x824   : > { %v2231_v19 = vpop.xlane.xlu0 %2230 }
 0x825   : > { %v2249_v56 = vsub.f32 %v5331_v57, %v2231_v19  ;;  %v2704_v57 = vsel %vm741_vm0, %v5517_v17, -inf  ;;  %v2254_v19 = vsub.f32 %v5346_v28, %v2246_v16 }
 0x827   : > { %v5513_v11 = vpop.eup %4157  ;;  %v2259_v25 = vmul.f32 1.442695, %v2249_v56 }
 0x828   : > { %v2274_v47 = vsel %vm741_vm0, %v5513_v11, 0.0 }
 0x829   : > { %4159 = vpow2.f32 %v2259_v25  ;;  %2275 = vadd.xlane.f32.xlu1 %v2274_v47 }
 0x82c   : > { %v2237_v5 = vpop.xlane.xlu0 %2236 }
 0x82d   : > { %v2251_v63 = vsub.f32 %v5337_v62, %v2237_v5 }
 0x82f   : > { %v5519_v20 = vpop.eup %4159  ;;  %v2263_v49 = vmul.f32 1.442695, %v2251_v63 }
 0x830   : > { %3779 = vmatmul.msk.bf16.vlgmr.msra.gmra.mxu1 %vm2181_vm3, %v5399_v12  ;;  %v2277_v40 = vsel %vm741_vm0, %v5519_v20, 0.0 }
 0x831   : > { %2278 = vadd.xlane.f32.xlu2 %v2277_v40  ;;  %2705 = vmax.xlane.f32.xlu1 %v2704_v57  ;;  %v2269_v57 = vmul.f32 1.442695, %v2254_v19 }
 0x834   : > { %v2240_v48 = vpop.xlane.xlu0 %2239 }
 0x83c   : > { %v2243_v0 = vpop.xlane.xlu0 %2242 }
 0x83d   : > { %v2253_v44 = vsub.f32 %v5343_v32, %v2243_v0  ;;  %v2252_v32 = vsub.f32 %v5340_v7, %v2240_v48 }
 0x83f   : > { %v2267_v4 = vmul.f32 1.442695, %v2253_v44  ;;  %v5555_v34 = vpop.f32.mrf.mxu1  ;;  %v2265_v42 = vmul.f32 1.442695, %v2252_v32 }
 0x840   : > { %v2234_v53 = vpop.xlane.xlu2 %2233  ;;  %3780 = vmatmul.msk.bf16.gmra.mxu1 %vm2181_vm3, %v2902_v39 }
 0x841   : > { %v2250_v33 = vsub.f32 %v5334_v26, %v2234_v53 }
 0x843   : > { %v2261_v2 = vmul.f32 1.442695, %v2250_v33 }
 0x844   : > { %v5530_v3 = vpop.f32.mrf.mxu0  ;;  %v2273_v40 = vpop.xlane.xlu0 %2272 }
 0x845   : > { %4161 = vpow2.f32 %v2261_v2  ;;  %v2950_v12 = vsel %vm741_vm0, %v5530_v3, -inf }
 0x846   : > { %2951 = vmax.xlane.f32.xlu1 %v2950_v12  ;;  %4163 = vpow2.f32 %v2263_v49 }
 0x847   : > { %4165 = vpow2.f32 %v2267_v4  ;;  %v5560_v52 = vpop.f32.mrf.mxu1 }
 0x848   : > { %4167 = vpow2.f32 %v2265_v42 }
 0x849   : > { %4169 = vpow2.f32 %v2269_v57 }
 0x84b   : > { %v5534_v41 = vpop.eup %4161 }
 0x84c   : > { %v5536_v35 = vpop.f32.mrf.mxu0  ;;  %v2280_v26 = vsel %vm741_vm0, %v5534_v41, 0.0  ;;  %v5542_v43 = vpop.eup %4163 }
 0x84d   : > { %2281 = vadd.xlane.f32.xlu0 %v2280_v26  ;;  %v2953_v62 = vsel %vm741_vm0, %v5536_v35, -inf  ;;  %v2283_v18 = vsel %vm741_vm0, %v5542_v43, 0.0  ;;  %v5553_v59 = vpop.eup %4165  ;;  %v2703_v33 = vpop.xlane.xlu0 %2702 }
 0x84e   : > { %2954 = vmax.xlane.f32.xlu2 %v2953_v62  ;;  %v2289_v9 = vsel %vm741_vm0, %v5553_v59, 0.0  ;;  %v5566_v45 = vpop.eup %4167  ;;  %v2725_v63 = vsub.f32 %v5477_v30, %v2703_v33 }
 0x84f   : > { %v2286_v56 = vsel %vm741_vm0, %v5566_v45, 0.0  ;;  %v5575_v47 = vpop.f32.mrf.mxu1  ;;  %v5587_v2 = vpop.eup %4169 }
 0x850   : > { %v2292_v49 = vsel %vm741_vm0, %v5587_v2, 0.0  ;;  %v2733_v26 = vmul.f32 1.442695, %v2725_v63 }
 0x852   : > { %4171 = vpow2.f32 %v2733_v26 }
 0x853   : > { %4173 = vrcp.f32 %v2273_v40 }
 0x854   : > { %v5545_v27 = vpop.f32.mrf.mxu0 }
 0x855   : > { %v2956_v5 = vsel %vm741_vm0, %v5545_v27, -inf }
 0x856   : > { %2284 = vadd.xlane.f32.xlu2 %v2283_v18 }
 0x857   : > { %v5585_v53 = vpop.f32.mrf.mxu1 }
 0x858   : > { %v5602_v30 = vpop.eup %4171 }
 0x859   : > { %v2749_v32 = vsel %vm741_vm0, %v5602_v30, 0.0 }
 0x85c   : > { %v5549_v10 = vpop.f32.mrf.mxu0 }
 0x85d   : > { %v2959_v21 = vsel %vm741_vm0, %v5549_v10, -inf }
 0x85e   : > { %2960 = vmax.xlane.f32.xlu2 %v2959_v21 }
 0x85f   : > { %v5596_v62 = vpop.f32.mrf.mxu1 }
 0x866   : > { %2290 = vadd.xlane.f32.xlu2 %v2289_v9 }
 0x867   : > { %v5604_v18 = vpop.f32.mrf.mxu1 }
 0x86d   : > { %v5562_v61 = vpop.f32.mrf.mxu2 }
 0x86e   : > { %v2707_v29 = vsel %vm741_vm0, %v5562_v61, -inf }
 0x86f   : > { %2708 = vmax.xlane.f32.xlu0 %v2707_v29  ;;  %v4174_v29 = vpop.eup %4173 }
 0x870   : > { %v2303_v19 = vmul.f32 %v4174_v29, %v5455_v8 }
 0x875   : > { %v5569_v7 = vpop.f32.mrf.mxu2 }
 0x876   : > { %v2710_v25 = vsel %vm741_vm0, %v5569_v7, -inf }
 0x877   : > { %2287 = vadd.xlane.f32.xlu0 %v2286_v56  ;;  %2711 = vmax.xlane.f32.xlu1 %v2710_v25 }
 0x87d   : > { %v5577_v39 = vpop.f32.mrf.mxu2 }
 0x87e   : > { %2799 = vrot.lane.b32.xlu2 %v5006_v58, %s4350_s25  ;;  %v2713_v28 = vsel %vm741_vm0, %v5577_v39, -inf }
 0x87f   : > { %2714 = vmax.xlane.f32.xlu0 %v2713_v28  ;;  %2957 = vmax.xlane.f32.xlu1 %v2956_v5 }
 0x885   : > { %v5590_v12 = vpop.f32.mrf.mxu2 }
 0x886   : > { %v2716_v48 = vsel %vm741_vm0, %v5590_v12, -inf }
 0x887   : > { %2717 = vmax.xlane.f32.xlu1 %v2716_v48  ;;  %2293 = vadd.xlane.f32.xlu0 %v2292_v49 }
 0x88d   : > { %v5598_v0 = vpop.f32.mrf.mxu2 }
 0x88e   : > { %v2719_v44 = vsel %vm741_vm0, %v5598_v0, -inf }
 0x88f   : > { %2720 = vmax.xlane.f32.xlu0 %v2719_v44 }
 0x895   : > { %v5606_v4 = vpop.f32.mrf.mxu2 }
 0x896   : > { %v2722_v21 = vsel %vm741_vm0, %v5606_v4, -inf }
 0x897   : > { %2723 = vmax.xlane.f32.xlu1 %v2722_v21  ;;  %2750 = vadd.xlane.f32.xlu0 %v2749_v32 }
 0x89c   : > { %v2276_v9 = vpop.xlane.xlu1 %2275 }
 0x89d   : > { %4175 = vrcp.f32 %v2276_v9  ;;  %v5612_v42 = vpop.f32.mrf.mxu1 }
 0x8a3   : > { %v4176_v16 = vpop.eup %4175 }
 0x8a4   : > { %v2304_v56 = vmul.f32 %v4176_v16, %v5513_v11  ;;  %v2706_v25 = vpop.xlane.xlu1 %2705  ;;  %v2279_v49 = vpop.xlane.xlu2 %2278 }
 0x8a5   : > { %v2726_v57 = vsub.f32 %v5517_v17, %v2706_v25  ;;  %v5617_v28 = vpop.f32.mrf.mxu1 }
 0x8a6   : > { %v2311_v5 = vpack.c.bf16 %v2304_v56, %v2303_v19 }
 0x8a7   : > { %v2735_v33 = vmul.f32 1.442695, %v2726_v57 }
 0x8a8   : > { %3757 = vmatmul.msk.bf16.vlgmr.msra.gmra.mxu3 %vm741_vm0, %v2311_v5 }
 0x8a9   : > { %4177 = vpow2.f32 %v2735_v33 }
 0x8aa   : > { %4179 = vrcp.f32 %v2279_v49 }
 0x8ab   : > { %2797 = vrot.lane.b32.xlu0 %v5010_v22, %s4350_s25 }
 0x8ad   : > { %v5622_v40 = vpop.f32.mrf.mxu1 }
 0x8ae   : > { %v2962_v48 = vsel %vm741_vm0, %v5622_v40, -inf }
 0x8af   : > { %v5624_v63 = vpop.eup %4177 }
 0x8b0   : > { %v2752_v8 = vsel %vm741_vm0, %v5624_v63, 0.0  ;;  %v4180_v32 = vpop.eup %4179 }
 0x8b1   : > { %2753 = vadd.xlane.f32.xlu1 %v2752_v8  ;;  %v2305_v16 = vmul.f32 %v4180_v32, %v5519_v20 }
 0x8b5   : > { %v5628_v11 = vpop.f32.mrf.mxu1 }
 0x8b6   : > { %v2965_v17 = vsel %vm741_vm0, %v5628_v11, -inf }
 0x8b7   : > { %2966 = vmax.xlane.f32.xlu2 %v2965_v17 }
 0x8b9   : > { %2963 = vmax.xlane.f32.xlu1 %v2962_v48  ;;  %v2952_v33 = vpop.xlane.xlu1 %2951 }
 0x8c0   : > { %v2282_v26 = vpop.xlane.xlu0 %2281 }
 0x8c1   : > { %4181 = vrcp.f32 %v2282_v26  ;;  %v2955_v44 = vpop.xlane.xlu2 %2954 }
 0x8c2   : > { %v2975_v21 = vsub.f32 %v5536_v35, %v2955_v44 }
 0x8c4   : > { %v2984_v29 = vmul.f32 1.442695, %v2975_v21 }
 0x8c6   : > { %4183 = vpow2.f32 %v2984_v29 }
 0x8c7   : > { %v4182_v9 = vpop.eup %4181 }
 0x8c8   : > { %v2306_v19 = vmul.f32 %v4182_v9, %v5534_v41 }
 0x8c9   : > { %v2285_v56 = vpop.xlane.xlu2 %2284 }
 0x8ca   : > { %v2312_v25 = vpack.c.bf16 %v2306_v19, %v2305_v16  ;;  %4185 = vrcp.f32 %v2285_v56 }
 0x8cc   : > { %3758 = vmatmul.msk.bf16.gmra.mxu3 %vm741_vm0, %v2312_v25  ;;  %v5640_v57 = vpop.eup %4183 }
 0x8cd   : > { %v3001_v35 = vsel %vm741_vm0, %v5640_v57, 0.0 }
 0x8cf   : > { %3048 = vrot.lane.b32.xlu2 %v5006_v58, %s4351_s20  ;;  %v2974_v58 = vsub.f32 %v5530_v3, %v2952_v33 }
 0x8d0   : > { %v4186_v32 = vpop.eup %4185 }
 0x8d1   : > { %v2961_v5 = vpop.xlane.xlu2 %2960  ;;  %v2982_v17 = vmul.f32 1.442695, %v2974_v58 }
 0x8d2   : > { %2795 = vrot.lane.b32.xlu1 %v5014_v1, %s4350_s25 }
 0x8d5   : > { %3002 = vadd.xlane.f32.xlu0 %v3001_v35 }
 0x8d9   : > { %v2291_v20 = vpop.xlane.xlu2 %2290 }
 0x8da   : > { %3046 = vrot.lane.b32.xlu1 %v5010_v22, %s4351_s20  ;;  %v2977_v22 = vsub.f32 %v5549_v10, %v2961_v5 }
 0x8dc   : > { %v2988_v3 = vmul.f32 1.442695, %v2977_v22 }
 0x8e1   : > { %v2800_v41 = vpop.permute.xlu2 %2799 }
 0x8e2   : > { %2821 = vmatpush.bf16.msrb.mxu3 %v2800_v41  ;;  %v2709_v8 = vpop.xlane.xlu0 %2708  ;;  %2793 = vrot.lane.b32.xlu1 %v4901_v46, %s4350_s25  ;;  %s4352_s25 = smov 16  }
 0x8e3   : > { %v2727_v21 = vsub.f32 %v5562_v61, %v2709_v8 }
 0x8e5   : > { %v2737_v29 = vmul.f32 1.442695, %v2727_v21 }
 0x8ea   : > { %v2288_v48 = vpop.xlane.xlu0 %2287  ;;  %3044 = vrot.lane.b32.xlu1 %v5014_v1, %s4351_s20  ;;  %v2712_v49 = vpop.xlane.xlu1 %2711  ;;  %v2307_v1 = vmul.f32 %v4186_v32, %v5542_v43 }
 0x8eb   : > { %4187 = vrcp.f32 %v2288_v48  ;;  %v2728_v26 = vsub.f32 %v5569_v7, %v2712_v49 }
 0x8ec   : > { %4189 = vpow2.f32 %v2982_v17 }
 0x8ed   : > { %v2739_v44 = vmul.f32 1.442695, %v2728_v26 }
 0x8ef   : > { %4191 = vpow2.f32 %v2739_v44 }
 0x8f0   : > { %4193 = vpow2.f32 %v2988_v3  ;;  %v5688_v3 = vpop.f32.mrf.mxu1 }
 0x8f1   : > { %v4188_v9 = vpop.eup %4187  ;;  %4195 = vpow2.f32 %v2737_v29 }
 0x8f2   : > { %v5656_v16 = vpop.xlane.xlu0 %2714  ;;  %v2958_v19 = vpop.xlane.xlu1 %2957  ;;  %v2308_v56 = vmul.f32 %v4188_v9, %v5566_v45  ;;  %4197 = vrcp.f32 %v2291_v20 }
 0x8f3   : > { %v5660_v25 = vpop.eup %4189  ;;  %v2976_v61 = vsub.f32 %v5545_v27, %v2958_v19 }
 0x8f4   : > { %v2313_v7 = vpack.c.bf16 %v2308_v56, %v2307_v1  ;;  %v2998_v43 = vsel %vm741_vm0, %v5660_v25, 0.0 }
 0x8f5   : > { %v5662_v10 = vpop.eup %4191  ;;  %v2986_v45 = vmul.f32 1.442695, %v2976_v61 }
 0x8f6   : > { %3759 = vmatmul.msk.bf16.gmra.mxu3 %vm741_vm0, %v2313_v7  ;;  %v2758_v5 = vsel %vm741_vm0, %v5662_v10, 0.0  ;;  %v5670_v41 = vpop.eup %4193 }
 0x8f7   : > { %2759 = vadd.xlane.f32.xlu0 %v2758_v5  ;;  %v5672_v8 = vpop.eup %4195  ;;  %v3007_v58 = vsel %vm741_vm0, %v5670_v41, 0.0 }
 0x8f8   : > { %2999 = vadd.xlane.f32.xlu2 %v2998_v43  ;;  %v4198_v17 = vpop.eup %4197  ;;  %v2755_v48 = vsel %vm741_vm0, %v5672_v8, 0.0  ;;  %v5694_v19 = vpop.f32.mrf.mxu1 }
 0x8f9   : > { %v2309_v26 = vmul.f32 %v4198_v17, %v5553_v59  ;;  %v2971_v1 = vsel %vm741_vm0, %v5694_v19, -inf }
 0x8fa   : > { %v2294_v35 = vpop.xlane.xlu0 %2293  ;;  %v2718_v33 = vpop.xlane.xlu1 %2717 }
 0x8fb   : > { %4199 = vrcp.f32 %v2294_v35  ;;  %v2730_v27 = vsub.f32 %v5590_v12, %v2718_v33 }
 0x8fc   : > { %4201 = vpow2.f32 %v2986_v45 }
 0x8fd   : > { %v2743_v49 = vmul.f32 1.442695, %v2730_v27 }
 0x8ff   : > { %3008 = vadd.xlane.f32.xlu0 %v3007_v58  ;;  %4203 = vpow2.f32 %v2743_v49 }
 0x900   : > { %2756 = vadd.xlane.f32.xlu2 %v2755_v48 }
 0x901   : > { %v4200_v20 = vpop.eup %4199 }
 0x902   : > { %v2310_v22 = vmul.f32 %v4200_v20, %v5587_v2  ;;  %v5681_v44 = vpop.eup %4201  ;;  %v2721_v32 = vpop.xlane.xlu0 %2720  ;;  %v2968_v2 = vsel %vm741_vm0, %v5688_v3, -inf }
 0x903   : > { %v3004_v12 = vsel %vm741_vm0, %v5681_v44, 0.0  ;;  %v2731_v48 = vsub.f32 %v5598_v0, %v2721_v32 }
 0x904   : > { %v2314_v21 = vpack.c.bf16 %v2310_v22, %v2309_v26 }
 0x905   : > { %v5686_v9 = vpop.eup %4203  ;;  %v2745_v22 = vmul.f32 1.442695, %v2731_v48 }
 0x906   : > { %3760 = vmatmul.msk.bf16.gmra.mxu3 %vm741_vm0, %v2314_v21  ;;  %v2764_v59 = vsel %vm741_vm0, %v5686_v9, 0.0 }
 0x908   : > { %3005 = vadd.xlane.f32.xlu2 %v3004_v12 }
 0x90a   : > { %v2751_v29 = vpop.xlane.xlu0 %2750  ;;  %v2724_v56 = vpop.xlane.xlu1 %2723 }
 0x90b   : > { %v2732_v27 = vsub.f32 %v5606_v4, %v2724_v56 }
 0x90d   : > { %v2747_v49 = vmul.f32 1.442695, %v2732_v27 }
 0x910   : > { %2765 = vadd.xlane.f32.xlu2 %v2764_v59 }
 0x914   : > { %2969 = vmax.xlane.f32.xlu1 %v2968_v2 }
 0x91c   : > { %2972 = vmax.xlane.f32.xlu1 %v2971_v1 }
 0x91d   : > { %v2798_v7 = vpop.permute.xlu0 %2797 }
 0x91e   : > { %2822 = vmatpush.bf16.msrb.mxu3 %v2798_v7  ;;  %v2729_v7 = vsub.f32 %v5577_v39, %v5656_v16 }
 0x924   : > { %v2754_v61 = vpop.xlane.xlu1 %2753 }
 0x92a   : > { %v2967_v5 = vpop.xlane.xlu2 %2966 }
 0x92b   : > { %v2979_v43 = vsub.f32 %v5628_v11, %v2967_v5  ;;  %v2360_v45 = vpop.f32.mrf.mxu3 }
 0x92c   : > { %v2380_v35 = vpack.c.bf16 %v2360_v45, %v2360_v45  ;;  %v2964_v33 = vpop.xlane.xlu1 %2963 }
 0x92d   : > { %v2992_v58 = vmul.f32 1.442695, %v2979_v43  ;;  %v2978_v17 = vsub.f32 %v5622_v40, %v2964_v33  ;;  %v2741_v33 = vmul.f32 1.442695, %v2729_v7 }
 0x92e   : > { %2389 = vst.msk [vmem:[#allocation2] sm:$0xf] %vm2388_vm4, %v2380_v35 }
 0x92f   : > { %4205 = vpow2.f32 %v2992_v58  ;;  %v2990_v20 = vmul.f32 1.442695, %v2978_v17 }
 0x931   : > { %4207 = vpow2.f32 %v2990_v20 }
 0x932   : > { %v3049_v26 = vpop.permute.xlu2 %3048  ;;  %4209 = vpow2.f32 %v2747_v49 }
 0x933   : > { %v2362_v11 = vpop.f32.mrf.mxu3  ;;  %3070 = vmatpush.bf16.msrb.mxu1 %v3049_v26  ;;  %4211 = vpow2.f32 %v2745_v22 }
 0x934   : > { %v2381_v21 = vpack.c.bf16 %v2362_v11, %v2362_v11  ;;  %4213 = vrcp.f32 %v2754_v61 }
 0x935   : > { %v5703_v12 = vpop.eup %4205  ;;  %3042 = vrot.lane.b32.xlu1 %v4901_v46, %s4351_s20  ;;  %4215 = vrcp.f32 %v2751_v29 }
 0x936   : > { %2390 = vst.msk [vmem:[#allocation2 + $0x4] sm:$0xf] %vm2388_vm4, %v2381_v21  ;;  %v3013_v0 = vsel %vm741_vm0, %v5703_v12, 0.0  ;;  %4217 = vpow2.f32 %v2741_v33 }
 0x937   : > { %v5710_v4 = vpop.eup %4207  ;;  %3014 = vadd.xlane.f32.xlu2 %v3013_v0 }
 0x938   : > { %v3010_v40 = vsel %vm741_vm0, %v5710_v4, 0.0  ;;  %v5714_v32 = vpop.eup %4209 }
 0x939   : > { %3011 = vadd.xlane.f32.xlu0 %v3010_v40  ;;  %v5716_v59 = vpop.eup %4211  ;;  %v2770_v46 = vsel %vm741_vm0, %v5714_v32, 0.0 }
 0x93a   : > { %v2767_v2 = vsel %vm741_vm0, %v5716_v59, 0.0  ;;  %v4214_v5 = vpop.eup %4213 }
 0x93b   : > { %v4216_v35 = vpop.eup %4215  ;;  %v2782_v27 = vmul.f32 %v4214_v5, %v5624_v63 }
 0x93c   : > { %v2781_v58 = vmul.f32 %v4216_v35, %v5602_v30  ;;  %v5729_v39 = vpop.eup %4217 }
 0x93d   : > { %v2761_v63 = vsel %vm741_vm0, %v5729_v39, 0.0 }
 0x93e   : > { %v2789_v29 = vpack.c.bf16 %v2782_v27, %v2781_v58 }
 0x93f   : > { %2771 = vadd.xlane.f32.xlu2 %v2770_v46 }
 0x941   : > { %2768 = vadd.xlane.f32.xlu0 %v2767_v2 }
 0x944   : > { %v2796_v1 = vpop.permute.xlu1 %2795 }
 0x945   : > { %2823 = vmatpush.bf16.msrb.mxu3 %v2796_v1 }
 0x948   : > { %v3003_v20 = vpop.xlane.xlu0 %3002 }
 0x94c   : > { %v3047_v56 = vpop.permute.xlu1 %3046 }
 0x94d   : > { %3071 = vmatpush.bf16.msrb.mxu1 %v3047_v56 }
 0x94f   : > { %v2365_v43 = vpop.f32.mrf.mxu3 }
 0x950   : > { %v2382_v45 = vpack.c.bf16 %v2365_v43, %v2365_v43 }
 0x952   : > { %2391 = vst.msk [vmem:[#allocation2 + $0x8] sm:$0xf] %vm2388_vm4, %v2382_v45 }
 0x954   : > { %v2794_v17 = vpop.permute.xlu1 %2793 }
 0x955   : > { %2824 = vmatpush.bf16.msrb.mxu3 %v2794_v17 }
 0x957   : > { %v2367_v61 = vpop.f32.mrf.mxu3 }
 0x958   : > { %v2383_v48 = vpack.c.bf16 %v2367_v61, %v2367_v61  ;;  %3773 = vmatmul.msk.bf16.vlgmr.msrb.gmra.mxu3 %vm741_vm0, %v2789_v29 }
 0x95a   : > { %2392 = vst.msk [vmem:[#allocation2 + $0xc] sm:$0xf] %vm2388_vm4, %v2383_v48 }
 0x95c   : > { %v3045_v16 = vpop.permute.xlu1 %3044 }
 0x95d   : > { %3072 = vmatpush.bf16.msrb.mxu1 %v3045_v16 }
 0x95f   : > { %2762 = vadd.xlane.f32.xlu1 %v2761_v63  ;;  %v2597_v63 = vpack.c.bf16 %v5555_v34, %v5555_v34 }
 0x96a   : > { %v2760_v49 = vpop.xlane.xlu0 %2759 }
 0x96b   : > { %v3000_v30 = vpop.xlane.xlu2 %2999  ;;  %4219 = vrcp.f32 %v2760_v49 }
 0x971   : > { %v4220_v22 = vpop.eup %4219 }
 0x972   : > { %v2784_v40 = vmul.f32 %v4220_v22, %v5662_v10 }
 0x973   : > { %v2757_v26 = vpop.xlane.xlu2 %2756 }
 0x974   : > { %4221 = vrcp.f32 %v2757_v26 }
 0x979   : > { %v2370_v11 = vpop.f32.mrf.mxu3 }
 0x97a   : > { %v4222_v21 = vpop.eup %4221  ;;  %v2384_v0 = vpack.c.bf16 %v2370_v11, %v2370_v11 }
 0x97b   : > { %v2783_v46 = vmul.f32 %v4222_v21, %v5672_v8  ;;  %v3006_v11 = vpop.xlane.xlu2 %3005  ;;  %v3009_v21 = vpop.xlane.xlu0 %3008 }
 0x97c   : > { %2393 = vst.msk [vmem:[#allocation2 + $0x10] sm:$0xf] %vm2388_vm4, %v2384_v0 }
 0x97d   : > { %v2790_v2 = vpack.c.bf16 %v2784_v40, %v2783_v46 }
 0x97f   : > { %3774 = vmatmul.msk.bf16.gmra.mxu3 %vm741_vm0, %v2790_v2 }
 0x981   : > { %v2372_v1 = vpop.f32.mrf.mxu3 }
 0x982   : > { %v2385_v56 = vpack.c.bf16 %v2372_v1, %v2372_v1  ;;  %v3915_v1 = vld [vmem:[%s6009_s16 + $0x38] sm:$0xff] }
 0x983   : > { %3341 = vmatpush.bf16.msra.mxu3 %v3915_v1 }
 0x984   : > { %2394 = vst.msk [vmem:[#allocation2 + $0x14] sm:$0xf] %vm2388_vm4, %v2385_v56 }
 0x987   : > { %v2970_v7 = vpop.xlane.xlu1 %2969 }
 0x988   : > { %v2980_v5 = vsub.f32 %v5688_v3, %v2970_v7  ;;  %v3913_v7 = vld [vmem:[%s6009_s16 + $0x28] sm:$0xff] }
 0x989   : > { %v2375_v43 = vpop.f32.mrf.mxu3 }
 0x98a   : > { %v2994_v45 = vmul.f32 1.442695, %v2980_v5  ;;  %v2386_v35 = vpack.c.bf16 %v2375_v43, %v2375_v43 }
 0x98c   : > { %4223 = vpow2.f32 %v2994_v45  ;;  %2395 = vst.msk [vmem:[#allocation2 + $0x18] sm:$0xf] %vm2388_vm4, %v2386_v35  ;;  %v3912_v45 = vld [vmem:[%s6009_s16 + $0x20] sm:$0xff] }
 0x98f   : > { %v2973_v10 = vpop.xlane.xlu1 %2972 }
 0x990   : > { %v2981_v8 = vsub.f32 %v5694_v19, %v2973_v10  ;;  %v3909_v10 = vld [vmem:[%s6009_s16 + $0x8] sm:$0xff] }
 0x991   : > { %v2377_v33 = vpop.f32.mrf.mxu3 }
 0x992   : > { %v5741_v27 = vpop.eup %4223  ;;  %v2996_v58 = vmul.f32 1.442695, %v2981_v8  ;;  %v2387_v17 = vpack.c.bf16 %v2377_v33, %v2377_v33 }
 0x993   : > { %v3016_v29 = vsel %vm741_vm0, %v5741_v27, 0.0 }
 0x994   : > { %4225 = vpow2.f32 %v2996_v58  ;;  %2396 = vst.msk [vmem:[#allocation2 + $0x1c] sm:$0xf] %vm2388_vm4, %v2387_v17  ;;  %3017 = vadd.xlane.f32.xlu0 %v3016_v29 }
 0x995   : > { %4227 = vrcp.f32 %v3000_v30  ;;  %v2766_v30 = vpop.xlane.xlu2 %2765 }
 0x996   : > { %4229 = vrcp.f32 %v3003_v20 }
 0x997   : > { %4231 = vrcp.f32 %v3006_v11 }
 0x998   : > { %4233 = vrcp.f32 %v3009_v21 }
 0x99a   : > { %v5746_v3 = vpop.eup %4225 }
 0x99b   : > { %v3019_v61 = vsel %vm741_vm0, %v5746_v3, 0.0  ;;  %v4228_v19 = vpop.eup %4227 }
 0x99c   : > { %3020 = vadd.xlane.f32.xlu2 %v3019_v61  ;;  %v4230_v48 = vpop.eup %4229  ;;  %v3030_v16 = vmul.f32 %v4228_v19, %v5660_v25  ;;  %v2598_v25 = vpack.c.bf16 %v5560_v52, %v5560_v52  ;;  %v3908_v61 = vld [vmem:[%s6009_s16] sm:$0xff] }
 0x99d   : > { %v3031_v49 = vmul.f32 %v4230_v48, %v5640_v57  ;;  %v4232_v20 = vpop.eup %4231 }
 0x99e   : > { %v4234_v34 = vpop.eup %4233  ;;  %v3032_v57 = vmul.f32 %v4232_v20, %v5681_v44  ;;  %v3914_v44 = vld [vmem:[%s6009_s16 + $0x30] sm:$0xff]  ;;  %v6061_v20 = vpack.c.bf16 %v4924_v54, %v4926_v60 }
 0x99f   : > { %v3038_v22 = vpack.c.bf16 %v3031_v49, %v3030_v16  ;;  %v3033_v0 = vmul.f32 %v4234_v34, %v5670_v41  ;;  %3342 = vmatpush.bf16.msra.mxu3 %v3914_v44  ;;  %v2600_v44 = vpack.c.bf16 %v5585_v53, %v5585_v53  ;;  %v2602_v53 = vpack.c.bf16 %v5604_v18, %v5604_v18 }
 0x9a1   : > { %v3039_v46 = vpack.c.bf16 %v3033_v0, %v3032_v57  ;;  %v6062_v57 = vpack.c.bf16 %v4943_v37, %v4941_v36  ;;  %v6063_v36 = vpack.c.bf16 %v4949_v51, %v4947_v50 }
 0x9a3   : > { %3343 = vmatpush.bf16.msra.mxu3 %v3913_v7 }
 0x9a7   : > { %v3043_v26 = vpop.permute.xlu1 %3042  ;;  %3344 = vmatpush.bf16.msra.mxu3 %v3912_v45 }
 0x9a8   : > { %2613 = vrot.lane.b32.xlu0 %v2597_v63, %s4352_s25  ;;  %3073 = vmatpush.bf16.msrb.mxu1 %v3043_v26 }
 0x9aa   : > { %v3015_v2 = vpop.xlane.xlu2 %3014 }
 0x9ab   : > { %3781 = vmatmul.msk.bf16.vlgmr.msrb.gmra.mxu1 %vm741_vm0, %v3038_v22 }
 0x9ac   : > { %v3012_v40 = vpop.xlane.xlu0 %3011 }
 0x9ad   : > { %4235 = vrcp.f32 %v3012_v40 }
 0x9ae   : > { %4237 = vrcp.f32 %v3015_v2 }
 0x9af   : > { %4239 = vrcp.f32 %v2766_v30 }
 0x9b2   : > { %v2772_v63 = vpop.xlane.xlu2 %2771 }
 0x9b3   : > { %v4236_v52 = vpop.eup %4235 }
 0x9b4   : > { %2615 = vrot.lane.b32.xlu2 %v2598_v25, %s4352_s25  ;;  %v4238_v56 = vpop.eup %4237  ;;  %v3034_v41 = vmul.f32 %v4236_v52, %v5710_v4  ;;  %v3911_v4 = vld [vmem:[%s6009_s16 + $0x18] sm:$0xff]  ;;  %v2769_v19 = vpop.xlane.xlu0 %2768  ;;  %v2599_v52 = vpack.c.bf16 %v5575_v47, %v5575_v47 }
 0x9b5   : > { %v3035_v5 = vmul.f32 %v4238_v56, %v5703_v12  ;;  %3345 = vmatpush.bf16.msra.mxu3 %v3911_v4  ;;  %v3910_v12 = vld [vmem:[%s6009_s16 + $0x10] sm:$0xff]  ;;  %v4240_v8 = vpop.eup %4239  ;;  %v2604_v4 = vpack.c.bf16 %v5617_v28, %v5617_v28  ;;  %v2603_v28 = vpack.c.bf16 %v5612_v42, %v5612_v42  ;;  %v3937_v42 = vld [vmem:[%s6008_s15 + $0x8] sm:$0xff] }
 0x9b6   : > { %v2786_v58 = vmul.f32 %v4240_v8, %v5686_v9 }
 0x9b7   : > { %v3040_v43 = vpack.c.bf16 %v3035_v5, %v3034_v41 }
 0x9b9   : > { %3346 = vmatpush.bf16.msra.mxu3 %v3910_v12 }
 0x9bb   : > { %3782 = vmatmul.msk.bf16.gmra.mxu1 %vm741_vm0, %v3039_v46 }
 0x9bd   : > { %3347 = vmatpush.bf16.msra.mxu3 %v3909_v10 }
 0x9c1   : > { %3348 = vmatpush.bf16.msra.mxu3 %v3908_v61  ;;  %v3939_v61 = vld [vmem:[%s6008_s15 + $0x18] sm:$0xff] }
 0x9c2   : > { %3220 = vmatpush.bf16.msra.mxu2 %v3939_v61 }
 0x9cb   : > { %3783 = vmatmul.msk.bf16.gmra.mxu1 %vm741_vm0, %v3040_v43 }
 0x9d2   : > { %v2763_v35 = vpop.xlane.xlu1 %2762 }
 0x9d3   : > { %4241 = vrcp.f32 %v2763_v35 }
 0x9d4   : > { %4243 = vrcp.f32 %v2769_v19 }
 0x9d5   : > { %4245 = vrcp.f32 %v2772_v63 }
 0x9d9   : > { %v4242_v33 = vpop.eup %4241 }
 0x9da   : > { %v2785_v17 = vmul.f32 %v4242_v33, %v5729_v39  ;;  %v4244_v49 = vpop.eup %4243 }
 0x9db   : > { %v2826_v29 = vpop.f32.mrf.mxu3  ;;  %v4246_v26 = vpop.eup %4245  ;;  %v2787_v22 = vmul.f32 %v4244_v49, %v5716_v59 }
 0x9dc   : > { %v2846_v48 = vpack.c.bf16 %v2826_v29, %v2826_v29  ;;  %v2791_v16 = vpack.c.bf16 %v2786_v58, %v2785_v17  ;;  %v2788_v11 = vmul.f32 %v4246_v26, %v5714_v32 }
 0x9de   : > { %2862 = vrot.lane.b32.xlu1 %v2846_v48, %s4353_s22  ;;  %3775 = vmatmul.msk.bf16.gmra.mxu3 %vm741_vm0, %v2791_v16  ;;  %v2792_v21 = vpack.c.bf16 %v2788_v11, %v2787_v22  ;;  %v3938_v48 = vld [vmem:[%s6008_s15 + $0x10] sm:$0xff]  ;;  %v3936_v16 = vld [vmem:[%s6008_s15] sm:$0xff] }
 0x9df   : > { %3221 = vmatpush.bf16.msra.mxu2 %v3938_v48 }
 0x9e3   : > { %v2828_v9 = vpop.f32.mrf.mxu3  ;;  %3222 = vmatpush.bf16.msra.mxu2 %v3937_v42 }
 0x9e4   : > { %v2847_v39 = vpack.c.bf16 %v2828_v9, %v2828_v9 }
 0x9e6   : > { %2864 = vrot.lane.b32.xlu0 %v2847_v39, %s4353_s22 }
 0x9e7   : > { %3223 = vmatpush.bf16.msra.mxu2 %v3936_v16 }
 0x9ee   : > { %3776 = vmatmul.msk.bf16.gmra.mxu3 %vm741_vm0, %v2792_v21 }
 0x9fe   : > { %3349 = vmatmul.bf16.vlgmr.msra.gmra.mxu3 %v6061_v20 }
 0xa02   : > { %v2831_v25 = vpop.f32.mrf.mxu3 }
 0xa03   : > { %v2848_v30 = vpack.c.bf16 %v2831_v25, %v2831_v25 }
 0xa05   : > { %2866 = vrot.lane.b32.xlu1 %v2848_v30, %s4353_s22 }
 0xa07   : > { %v3018_v34 = vpop.xlane.xlu0 %3017 }
 0xa08   : > { %4247 = vrcp.f32 %v3018_v34 }
 0xa0a   : > { %v2833_v50 = vpop.f32.mrf.mxu3 }
 0xa0b   : > { %v2849_v41 = vpack.c.bf16 %v2833_v50, %v2833_v50  ;;  %v3399_v50 = vld [vmem:[%s6010_s17] sm:$0x1] }
 0xa0e   : > { %3354 = vmatmul.bf16.gmra.mxu3 %v6062_v57  ;;  %v4248_v32 = vpop.eup %4247 }
 0xa0f   : > { %v3021_v59 = vpop.xlane.xlu2 %3020  ;;  %v3036_v40 = vmul.f32 %v4248_v32, %v5741_v27  ;;  %v6064_v27 = vpack.c.bf16 %v5022_v38, %v5020_v6  ;;  %v2601_v38 = vpack.c.bf16 %v5596_v62, %v5596_v62 }
 0xa10   : > { %4249 = vrcp.f32 %v3021_v59 }
 0xa16   : > { %v4250_v0 = vpop.eup %4249 }
 0xa17   : > { %v3037_v54 = vmul.f32 %v4250_v0, %v5746_v3  ;;  %v2616_v60 = vpop.permute.xlu2 %2615 }
 0xa18   : > { %2639 = vst.msk [vmem:[#allocation2 + $0x4] sm:$0xf] %vm2637_vm5, %v2616_v60 }
 0xa19   : > { %v3041_v46 = vpack.c.bf16 %v3037_v54, %v3036_v40 }
 0xa1a   : > { %v2614_v2 = vpop.permute.xlu0 %2613 }
 0xa1b   : > { %2638 = vst.msk [vmem:[#allocation2] sm:$0xf] %vm2637_vm5, %v2614_v2  ;;  %3784 = vmatmul.msk.bf16.gmra.mxu1 %vm741_vm0, %v3041_v46 }
 0xa1e   : > { %3359 = vmatmul.bf16.gmra.mxu3 %v6063_v36 }
 0xa28   : > { %v3075_v37 = vpop.f32.mrf.mxu1 }
 0xa29   : > { %v3095_v1 = vpack.c.bf16 %v3075_v37, %v3075_v37 }
 0xa2b   : > { %3111 = vrot.lane.b32.xlu0 %v3095_v1, %s4354_s23 }
 0xa2e   : > { %3364 = vmatmul.bf16.gmra.mxu3 %v6064_v27 }
 0xa30   : > { %v3077_v3 = vpop.f32.mrf.mxu1 }
 0xa31   : > { %v3096_v56 = vpack.c.bf16 %v3077_v3, %v3077_v3 }
 0xa33   : > { %2617 = vrot.lane.b32.xlu0 %v2599_v52, %s4352_s25  ;;  %3113 = vrot.lane.b32.xlu2 %v3096_v56, %s4354_s23 }
 0xa38   : > { %v3080_v51 = vpop.f32.mrf.mxu1 }
 0xa39   : > { %v3097_v47 = vpack.c.bf16 %v3080_v51, %v3080_v51  ;;  %v6065_v51 = vunpack.c.l.bf16 %v4631_v31 }
 0xa3b   : > { %2868 = vrot.lane.b32.xlu0 %v2849_v41, %s4353_s22  ;;  %2619 = vrot.lane.b32.xlu2 %v2600_v44, %s4352_s25  ;;  %v738_v44 = vperm.slane %v6065_v51, 2  ;;  %v3400_v41 = vunpack.c.l.bf16 %v3399_v50 }
 0xa40   : > { %v3082_v6 = vpop.f32.mrf.mxu1 }
 0xa41   : > { %v3098_v7 = vpack.c.bf16 %v3082_v6, %v3082_v6 }
 0xa43   : > { %2621 = vrot.lane.b32.xlu0 %v2601_v38, %s4352_s25  ;;  %3115 = vrot.lane.b32.xlu2 %v3097_v47, %s4354_s23  ;;  %v3379_v38 = vpop.f32.mrf.mxu0 }
 0xa44   : > { %3117 = vrot.lane.b32.xlu1 %v3098_v7, %s4354_s23  ;;  %v768_v7 = vadd.f32 %v4829_v55, %v738_v44 }
 0xa48   : > { %v3085_v5 = vpop.f32.mrf.mxu1 }
 0xa49   : > { %v3099_v45 = vpack.c.bf16 %v3085_v5, %v3085_v5  ;;  %v5890_v5 = vperm.slane %v3400_v41, 0 }
 0xa4b   : > { %2623 = vrot.lane.b32.xlu2 %v2602_v53, %s4352_s25  ;;  %v3381_v55 = vpop.f32.mrf.mxu0 }
 0xa50   : > { %v2863_v43 = vpop.permute.xlu1 %2862  ;;  %v3087_v12 = vpop.f32.mrf.mxu1 }
 0xa51   : > { %2887 = vst.msk [vmem:[#allocation2] sm:$0xf] %vm2886_vm6, %v2863_v43  ;;  %v3100_v8 = vpack.c.bf16 %v3087_v12, %v3087_v12 }
 0xa53   : > { %3119 = vrot.lane.b32.xlu2 %v3099_v45, %s4354_s23  ;;  %v5895_v45 = vperm.slane %v768_v7, 0 }
 0xa58   : > { %v2865_v62 = vpop.permute.xlu0 %2864 }
 0xa59   : > { %2888 = vst.msk [vmem:[#allocation2 + $0x4] sm:$0xf] %vm2886_vm6, %v2865_v62 }
 0xa5b   : > { %2627 = vrot.lane.b32.xlu2 %v2604_v4, %s4352_s25 }
 0xa61   : > { %v2836_v35 = vpop.f32.mrf.mxu3 }
 0xa62   : > { %v2850_v18 = vpack.c.bf16 %v2836_v35, %v2836_v35 }
 0xa64   : > { %2870 = vrot.lane.b32.xlu1 %v2850_v18, %s4353_s22 }
 0xa69   : > { %v2838_v10 = vpop.f32.mrf.mxu3 }
 0xa6a   : > { %v2851_v33 = vpack.c.bf16 %v2838_v10, %v2838_v10 }
 0xa6c   : > { %3121 = vrot.lane.b32.xlu1 %v3100_v8, %s4354_s23  ;;  %2872 = vrot.lane.b32.xlu0 %v2851_v33, %s4353_s22 }
 0xa71   : > { %v2841_v58 = vpop.f32.mrf.mxu3 }
 0xa72   : > { %v2852_v17 = vpack.c.bf16 %v2841_v58, %v2841_v58 }
 0xa74   : > { %2625 = vrot.lane.b32.xlu0 %v2603_v28, %s4352_s25  ;;  %2874 = vrot.lane.b32.xlu1 %v2852_v17, %s4353_s22  ;;  %s3461_s25 = scalar_lea.hbm %s6067_s21, %s3962_s26 }
 0xa75   : > { %s3464_s3 = sshll.u32 %s3461_s25, 4  ;;  %s3465_s3 = int_to_ptr.hbm [resolvable:$true] %s3464_s3 }
 0xa77   : > { %v2867_v34 = vpop.permute.xlu1 %2866 }
 0xa79   : > { %v2843_v29 = vpop.f32.mrf.mxu3 }
 0xa7a   : > { %v2853_v19 = vpack.c.bf16 %v2843_v29, %v2843_v29  ;;  %v3384_v29 = vpop.f32.mrf.mxu0 }
 0xa7c   : > { %2876 = vrot.lane.b32.xlu0 %v2853_v19, %s4353_s22  ;;  %s3960_s22 = smul.u32 24, %s5893_s28 }
 0xa81   : > { %v3350_v6 = vpop.f32.mrf.mxu3 }
 0xa89   : > { %v3352_v4 = vpop.f32.mrf.mxu3 }
 0xa8d   : > { %v3114_v63 = vpop.permute.xlu2 %3113 }
 0xa8e   : > { %3137 = vst.msk [vmem:[#allocation2 + $0x4] sm:$0xf] %vm3135_vm7, %v3114_v63 }
 0xa95   : > { %v2620_v9 = vpop.permute.xlu2 %2619 }
 0xa96   : > { %2641 = vst.msk [vmem:[#allocation2 + $0xc] sm:$0xf] %vm2637_vm5, %v2620_v9 }
 0xa98   : > { %v3090_v39 = vpop.f32.mrf.mxu1 }
 0xa99   : > { %v3101_v49 = vpack.c.bf16 %v3090_v39, %v3090_v39 }
 0xa9b   : > { %3123 = vrot.lane.b32.xlu2 %v3101_v49, %s4354_s23 }
 0xa9d   : > { %v3112_v26 = vpop.permute.xlu0 %3111  ;;  %v3116_v22 = vpop.permute.xlu2 %3115 }
 0xa9e   : > { %3136 = vst.msk [vmem:[#allocation2] sm:$0xf] %vm3135_vm7, %v3112_v26 }
 0xaa0   : > { %v3092_v11 = vpop.f32.mrf.mxu1 }
 0xaa1   : > { %v3102_v21 = vpack.c.bf16 %v3092_v11, %v3092_v11 }
 0xaa3   : > { %3125 = vrot.lane.b32.xlu1 %v3102_v21, %s4354_s23  ;;  %s5901_s23 = scalar_lea.vmem [#allocation3], %s3960_s22  ;;  %s4265_s22 = sshra.s32 %s3465_s3, 4  ;;  %s4266_s22 = int_to_ptr.hbm [resolvable:$true] %s4265_s22 }
 0xaa4   : > { %s3462_s20 = sshll.u32 %s5901_s23, 4  ;;  %s4267_s24 = scalar_lea.hbm %s4266_s22, 24  ;;  %s3463_s20 = int_to_ptr.vmem [resolvable:$true] %s3462_s20 }
 0xaa5   : > { %v2618_v20 = vpop.permute.xlu0 %2617  ;;  %v2624_v25 = vpop.permute.xlu2 %2623  ;;  %v3932_v30 = vld [vmem:[#allocation2] sm:$0xff]  ;;  %p4268_p11 = scmp.ne.s32.totalorder %s4266_s22, %s4267_s24  ;;  %p4272_p0 = scmp.lt.s32.totalorder %s4266_s22, %s6068_s18 }
 0xaa6   : > { %2640 = vst.msk [vmem:[#allocation2 + $0x8] sm:$0xf] %vm2637_vm5, %v2618_v20  ;;  %3817 = vmatmul.msk.bf16.vlgmr.msra.gmra.mxu2 %vm741_vm0, %v3932_v30  ;;  %p4273_p1 = scmp.lt.s32.totalorder %s4271_s0, %s4267_s24 }
 0xaa7   : > { %2889 = vst.msk [vmem:[#allocation2 + $0x8] sm:$0xf] %vm2886_vm6, %v2867_v34  ;;  %p4269_p12 = pnand %p4268_p11, %p4494_p5 }
 0xaa8   : > { %3138 = vst.msk [vmem:[#allocation2 + $0x8] sm:$0xf] %vm3135_vm7, %v3116_v22  ;;  %p4274_p2 = por %p4273_p1, %p4272_p0 }
 0xaa9   : > { %2643 = vst.msk [vmem:[#allocation2 + $0x14] sm:$0xf] %vm2637_vm5, %v2624_v25  ;;  %p4270_p13 = pneg %p4269_p12 }
 0xaab   : > { %p4275_p3 = pnand %p4274_p2, %p4270_p13 }
 0xaad   : > { %v2869_v57 = vpop.permute.xlu0 %2868  ;;  %v3120_v59 = vpop.permute.xlu2 %3119 }
 0xaae   : > { %2890 = vst.msk [vmem:[#allocation2 + $0xc] sm:$0xf] %vm2886_vm6, %v2869_v57 }
 0xab5   : > { %v2622_v32 = vpop.permute.xlu0 %2621  ;;  %v2628_v0 = vpop.permute.xlu2 %2627 }
 0xab6   : > { %2642 = vst.msk [vmem:[#allocation2 + $0x10] sm:$0xf] %vm2637_vm5, %v2622_v32  ;;  %v3118_v40 = vpop.permute.xlu1 %3117 }
 0xab7   : > { %2645 = vst.msk [vmem:[#allocation2 + $0x1c] sm:$0xf] %vm2637_vm5, %v2628_v0 }
 0xab8   : > { %3139 = vst.msk [vmem:[#allocation2 + $0xc] sm:$0xf] %vm3135_vm7, %v3118_v40 }
 0xabf   : > { %v3933_v54 = vld [vmem:[#allocation2 + $0x8] sm:$0xff] }
 0xac0   : > { %3818 = vmatmul.msk.bf16.gmra.mxu2 %vm741_vm0, %v3933_v54 }
 0xad6   : > { %v2871_v60 = vpop.permute.xlu1 %2870 }
 0xad7   : > { %2891 = vst.msk [vmem:[#allocation2 + $0x10] sm:$0xf] %vm2886_vm6, %v2871_v60 }
 0xad8   : > { %3140 = vst.msk [vmem:[#allocation2 + $0x10] sm:$0xf] %vm3135_vm7, %v3120_v59 }
 0xade   : > { %v2873_v46 = vpop.permute.xlu0 %2872  ;;  %v3122_v2 = vpop.permute.xlu1 %3121 }
 0xadf   : > { %2892 = vst.msk [vmem:[#allocation2 + $0x14] sm:$0xf] %vm2886_vm6, %v2873_v46 }
 0xae0   : > { %3141 = vst.msk [vmem:[#allocation2 + $0x14] sm:$0xf] %vm3135_vm7, %v3122_v2 }
 0xae6   : > { %v2626_v36 = vpop.permute.xlu0 %2625  ;;  %v2875_v37 = vpop.permute.xlu1 %2874 }
 0xae7   : > { %2644 = vst.msk [vmem:[#allocation2 + $0x18] sm:$0xf] %vm2637_vm5, %v2626_v36  ;;  %v3934_v1 = vld [vmem:[#allocation2 + $0x10] sm:$0xff] }
 0xae8   : > { %2893 = vst.msk [vmem:[#allocation2 + $0x18] sm:$0xf] %vm2886_vm6, %v2875_v37  ;;  %3819 = vmatmul.msk.bf16.gmra.mxu2 %vm741_vm0, %v3934_v1 }
 0xaee   : > { %v2877_v27 = vpop.permute.xlu0 %2876 }
 0xaef   : > { %2894 = vst.msk [vmem:[#allocation2 + $0x1c] sm:$0xf] %vm2886_vm6, %v2877_v27 }
 0xaf5   : > { %v3124_v3 = vpop.permute.xlu2 %3123 }
 0xaf6   : > { %3142 = vst.msk [vmem:[#allocation2 + $0x18] sm:$0xf] %vm3135_vm7, %v3124_v3 }
 0xb15   : > { %v3126_v52 = vpop.permute.xlu1 %3125 }
 0xb16   : > { %3143 = vst.msk [vmem:[#allocation2 + $0x1c] sm:$0xf] %vm3135_vm7, %v3126_v52 }
 0xb1d   : > { %v3935_v56 = vld [vmem:[#allocation2 + $0x18] sm:$0xff] }
 0xb1e   : > { %3820 = vmatmul.msk.bf16.gmra.mxu2 %vm741_vm0, %v3935_v56  ;;  %vm3435_vm0 = vcmask 519168  }
 0xb29   : > { %v3225_v47 = vpop.f32.mrf.mxu2 }
 0xb2a   : > { %v3351_v53 = vadd.f32 %v3350_v6, %v3225_v47 }
 0xb2c   : > { %v3380_v43 = vadd.f32 %v3379_v38, %v3351_v53 }
 0xb2e   : > { %v3402_v62 = vadd.f32 %v5890_v5, %v3380_v43 }
 0xb30   : > { %v3411_v31 = vmul.f32 %v5895_v45, %v3402_v62 }
 0xb31   : > { %v3227_v35 = vpop.f32.mrf.mxu2 }
 0xb32   : > { %v3419_v18 = vadd.f32 %v4536_v14, %v3411_v31  ;;  %v3353_v12 = vadd.f32 %v3352_v4, %v3227_v35  ;;  %v3355_v14 = vpop.f32.mrf.mxu3 }
 0xb34   : > { %v3427_v10 = vpack.c.bf16 %v3419_v18, %v3419_v18  ;;  %v3382_v8 = vadd.f32 %v3381_v55, %v3353_v12 }
 0xb36   : > { %3436 = vst.msk [vmem:[%s5901_s23] sm:$0xf] %vm3435_vm0, %v3427_v10  ;;  %v3403_v33 = vadd.f32 %v5890_v5, %v3382_v8 }
 0xb38   : > { %v3412_v58 = vmul.f32 %v5895_v45, %v3403_v33 }
 0xb3a   : > { %v3420_v28 = vadd.f32 %v4554_v24, %v3412_v58  ;;  %v3357_v63 = vpop.f32.mrf.mxu3  ;;  %v3386_v24 = vpop.f32.mrf.mxu0 }
 0xb3c   : > { %v3428_v17 = vpack.c.bf16 %v3420_v28, %v3420_v28 }
 0xb3e   : > { %3437 = vst.msk [vmem:[%s5901_s23 + $0x4] sm:$0xf] %vm3435_vm0, %v3428_v17 }
 0xb42   : > { %v3360_v30 = vpop.f32.mrf.mxu3  ;;  %v3389_v34 = vpop.f32.mrf.mxu0 }
 0xb43   : > { %v3230_v61 = vpop.f32.mrf.mxu2 }
 0xb44   : > { %v3356_v19 = vadd.f32 %v3355_v14, %v3230_v61 }
 0xb46   : > { %v3385_v48 = vadd.f32 %v3384_v29, %v3356_v19 }
 0xb48   : > { %v3404_v42 = vadd.f32 %v5890_v5, %v3385_v48 }
 0xb4a   : > { %v3413_v16 = vmul.f32 %v5895_v45, %v3404_v42  ;;  %v3362_v40 = vpop.f32.mrf.mxu3  ;;  %v3391_v46 = vpop.f32.mrf.mxu0 }
 0xb4b   : > { %v3232_v9 = vpop.f32.mrf.mxu2 }
 0xb4c   : > { %v3421_v39 = vadd.f32 %v4534_v13, %v3413_v16  ;;  %v3358_v49 = vadd.f32 %v3357_v63, %v3232_v9 }
 0xb4e   : > { %v3429_v26 = vpack.c.bf16 %v3421_v39, %v3421_v39  ;;  %v3387_v22 = vadd.f32 %v3386_v24, %v3358_v49 }
 0xb50   : > { %3438 = vst.msk [vmem:[%s5901_s23 + $0x8] sm:$0xf] %vm3435_vm0, %v3429_v26  ;;  %v3405_v11 = vadd.f32 %v5890_v5, %v3387_v22 }
 0xb52   : > { %v3414_v21 = vmul.f32 %v5895_v45, %v3405_v11 }
 0xb54   : > { %v3422_v20 = vadd.f32 %v4552_v23, %v3414_v21 }
 0xb56   : > { %v3430_v25 = vpack.c.bf16 %v3422_v20, %v3422_v20 }
 0xb58   : > { %3439 = vst.msk [vmem:[%s5901_s23 + $0xc] sm:$0xf] %vm3435_vm0, %v3430_v25 }
 0xb6b   : > { %v3235_v13 = vpop.f32.mrf.mxu2 }
 0xb6c   : > { %v3361_v57 = vadd.f32 %v3360_v30, %v3235_v13 }
 0xb6e   : > { %v3390_v59 = vadd.f32 %v3389_v34, %v3361_v57 }
 0xb70   : > { %v3406_v32 = vadd.f32 %v5890_v5, %v3390_v59 }
 0xb72   : > { %v3415_v0 = vmul.f32 %v5895_v45, %v3406_v32 }
 0xb73   : > { %v3237_v54 = vpop.f32.mrf.mxu2 }
 0xb74   : > { %v3423_v60 = vadd.f32 %v4538_v15, %v3415_v0  ;;  %v3363_v23 = vadd.f32 %v3362_v40, %v3237_v54  ;;  %v6069_v15 = vld [vmem:[#allocation16_spill] sm:$0xff] }
 0xb76   : > { %v3431_v2 = vpack.c.bf16 %v3423_v60, %v3423_v60  ;;  %v3392_v36 = vadd.f32 %v3391_v46, %v3363_v23 }
 0xb78   : > { %3440 = vst.msk [vmem:[%s5901_s23 + $0x10] sm:$0xf] %vm3435_vm0, %v3431_v2  ;;  %v3407_v37 = vadd.f32 %v5890_v5, %v3392_v36 }
 0xb7a   : > { %v3416_v1 = vmul.f32 %v5895_v45, %v3407_v37 }
 0xb7c   : > { %v3424_v27 = vadd.f32 %v6069_v15, %v3416_v1 }
 0xb7e   : > { %v3432_v3 = vpack.c.bf16 %v3424_v27, %v3424_v27 }
 0xb80   : > { %3441 = vst.msk [vmem:[%s5901_s23 + $0x14] sm:$0xf] %vm3435_vm0, %v3432_v3 }
 0xb81   : > { %4278 = shalt.err (!%p4275_p3)
}
 0xb82   : > { %s6031_s23 = smov 4   ;;  %s6070_s4 = smov 64   ;;  %v3365_v52 = vpop.f32.mrf.mxu3  ;;  %v3394_v56 = vpop.f32.mrf.mxu0  ;;  %v6071_v7 = vld [vmem:[#allocation17_spill] sm:$0xff]  ;;  %v6073_v12 = vld [vmem:[#allocation18_spill] sm:$0xff] }
 0xb83   : > { %3963 = dma.vmem_to_hbm [thread:$0]  (%p4494_p5), %s3463_s20, 384, %s3465_s3, %s3445_s27, %s6070_s4, %s6070_s4, %s6031_s23  }
 0xb84   : > { %s3602_s24 = sshll.u32 %s5893_s28, 3  ;;  %s3940_s22 = sshll.u32 %s4477_s1, 3 }
 0xb85   : > { %s632_s20 = scalar_lea.vmem [#allocation5], %s3602_s24  ;;  %s6072_s26 = sld [smem:[#allocation27_spill]] }
 0xb86   : > { %s3479_s0 = sshll.u32 %s632_s20, 4  ;;  %s3450_s1 = scalar_lea.sflag [#allocation6], %s5893_s28  ;;  %s3480_s0 = int_to_ptr.vmem [resolvable:$true] %s3479_s0 }
 0xb8a   : > { %v3367_v38 = vpop.f32.mrf.mxu3  ;;  %v3396_v62 = vpop.f32.mrf.mxu0 }
 0xb8b   : > { %s3478_s19 = scalar_lea.hbm %s6072_s26, %s3940_s22  ;;  %s4299_s27 = scalar_lea.hbm %s6072_s26, 16 }
 0xb8c   : > { %s3481_s21 = sshll.u32 %s3478_s19, 4  ;;  %s3482_s21 = int_to_ptr.hbm [resolvable:$true] %s3481_s21 }
 0xb8d   : > { %s4293_s25 = sshra.s32 %s3482_s21, 4  ;;  %s4294_s25 = int_to_ptr.hbm [resolvable:$true] %s4293_s25 }
 0xb8e   : > { %s4295_s24 = scalar_lea.hbm %s4294_s25, 8  ;;  %p4300_p9 = scmp.lt.s32.totalorder %s4294_s25, %s6072_s26 }
 0xb8f   : > { %p4296_p4 = scmp.ne.s32.totalorder %s4294_s25, %s4295_s24  ;;  %p4301_p10 = scmp.lt.s32.totalorder %s4299_s27, %s4295_s24 }
 0xb91   : > { %p4297_p7 = pnand %p4296_p4, %p4494_p5  ;;  %p4302_p11 = por %p4301_p10, %p4300_p9 }
 0xb93   : > { %p4298_p8 = pneg %p4297_p7 }
 0xb95   : > { %p4303_p12 = pnand %p4302_p11, %p4298_p8 }
 0xba1   : > { %v3240_v50 = vpop.f32.mrf.mxu2 }
 0xba2   : > { %v3366_v51 = vadd.f32 %v3365_v52, %v3240_v50 }
 0xba4   : > { %v3395_v44 = vadd.f32 %v3394_v56, %v3366_v51 }
 0xba6   : > { %v3408_v41 = vadd.f32 %v5890_v5, %v3395_v44 }
 0xba8   : > { %v3417_v6 = vmul.f32 %v5895_v45, %v3408_v41 }
 0xba9   : > { %v3242_v47 = vpop.f32.mrf.mxu2 }
 0xbaa   : > { %v3425_v53 = vadd.f32 %v6071_v7, %v3417_v6  ;;  %v3368_v43 = vadd.f32 %v3367_v38, %v3242_v47 }
 0xbac   : > { %v3433_v31 = vpack.c.bf16 %v3425_v53, %v3425_v53  ;;  %v3397_v4 = vadd.f32 %v3396_v62, %v3368_v43 }
 0xbae   : > { %v3409_v35 = vadd.f32 %v5890_v5, %v3397_v4  ;;  %3442 = vst.msk [vmem:[%s632_s20] sm:$0xf] %vm3435_vm0, %v3433_v31 }
 0xbb0   : > { %v3418_v18 = vmul.f32 %v5895_v45, %v3409_v35 }
 0xbb2   : > { %v3426_v55 = vadd.f32 %v6073_v12, %v3418_v18 }
 0xbb4   : > { %v3434_v10 = vpack.c.bf16 %v3426_v55, %v3426_v55 }
 0xbb6   : > { %3443 = vst.msk [vmem:[%s632_s20 + $0x4] sm:$0xf] %vm3435_vm0, %v3434_v10 }
 0xbb7   : > { %4306 = shalt.err (!%p4303_p12)
}
 0xbb8   : > { %s6074_s28 = smov 4  }
 0xbb9   : > { %3964 = dma.vmem_to_hbm [thread:$0]  (%p4494_p5), %s3480_s0, 128, %s3482_s21, %s3450_s1, %s6070_s4, %s6070_s4, %s6074_s28  }
 0xbba PF: > { %s6075_s20 = sld [smem:[#allocation11_spill]] }
 0xbbb   : > { %s6076_s5 = sld [smem:[#allocation9_spill]] }
 0xbc0   : > { %p3974_p13 = scmp.ge.s32.totalorder %s6075_s20, 2 }
 0xbc1   : > { %s3496_s22 = sand.u32 1, %s6076_s5  }
 0xbc2   : > { %p3968_p0 = pnand %p3974_p13, %p4498_p6  ;;  %s3497_s23 = scalar_lea.sflag [#allocation4], %s3496_s22 }
 0xbc4   : > { %p3969_p1 = pneg %p3968_p0 }
 0xbc6   : > { %4324 = dma.done.wait (%p3969_p1), %s3497_s23, 384  }
 0xbc7   : > { %4326 = vsyncadd (%p3969_p1), %s3497_s23, 4294966912  ;;  %s3507_s25 = scalar_lea.sflag [#allocation6], %s3496_s22 }
 0xbc8   : > { %4328 = dma.done.wait (%p3969_p1), %s3507_s25, 128  }
 0xbc9   : > { %4330 = vsyncadd (%p3969_p1), %s3507_s25, 4294967168  ;;  %s6078_s21 = sld [smem:[#allocation12_spill]]  ;;  %s6081_s0 = smov %s4337_s30 }
 0xbca   : > { %s6079_s2 = sld [smem:[#allocation10_spill]] }
 0xbcb   : > { %s6080_s20 = sld [smem:[#allocation13_spill]] }
 0xbcf   : > { %p33_p5 = scmp.ge.s32.totalorder %s6078_s21, 4  }
 0xbd0   : > { %s6082_s30 = smov %s6079_s2 }
 0xbd1   :  { %35 = sbr.rel (!%p33_p5) target bundleno = 15 (0xf), region = 150 }
 0xbd6   :  { %3513 = vsyncpa [#allocation4], 1 }
 0xbd7   :  { %3515 = vsyncpa [#allocation4 + $0x1], 1 }
 0xbd8   :  { %3516 = vsyncpa [#allocation6], 1 }
 0xbd9   :  { %3518 = vsyncpa [#allocation6 + $0x1], 1 }

</bundles_post_ra>
